<compile_context>
chip_gen: v6e
topology: v6e:2x2x1
jax: 0.10.0
libtpu: 0.0.40
codegen_flags: <defaults>
</compile_context>

<pallas_src>
import functools
import math

import jax
import jax.numpy as jnp
import numpy as np
from jax.experimental import pallas as pl
from jax.experimental.pallas import tpu as pltpu


_CPARAMS = pltpu.CompilerParams(dimension_semantics=("arbitrary",))


# ---------------- in-kernel helpers ----------------

def _act(x, act):
    if act == "relu":
        return jnp.maximum(x, 0.0)
    if act == "tanh":
        return jnp.tanh(x)
    return x


def _bn(x, gamma, beta, eps=1e-5):
    # training-mode BatchNorm2d: biased batch stats over the pixel (lane) axis, f32.
    mean = jnp.mean(x, axis=1, keepdims=True)
    var = jnp.mean(jnp.square(x - mean), axis=1, keepdims=True)
    return (x - mean) * jax.lax.rsqrt(var + eps) * gamma + beta


# ---------------- Pallas kernels (single VMEM-resident block each) ----------------

def _conv_kernel(w_ref, p_ref, b_ref, o_ref, *, act):
    acc = jnp.dot(w_ref[...], p_ref[...], preferred_element_type=jnp.float32)
    o_ref[...] = _act(acc + b_ref[...], act)


def _conv_bn_kernel(w_ref, p_ref, b_ref, g_ref, bb_ref, o_ref, *, act):
    acc = jnp.dot(w_ref[...], p_ref[...], preferred_element_type=jnp.float32)
    o_ref[...] = _bn(_act(acc + b_ref[...], act), g_ref[...], bb_ref[...])


def _conv_bn_up_kernel(w_ref, p_ref, b_ref, g_ref, bb_ref, u_ref, o_ref, *, act):
    acc = jnp.dot(w_ref[...], p_ref[...], preferred_element_type=jnp.float32)
    y = _bn(_act(acc + b_ref[...], act), g_ref[...], bb_ref[...])
    # fused bilinear upsample: one matmul against the (block-diag) Kronecker interp matrix.
    o_ref[...] = jnp.dot(y.astype(jnp.bfloat16), u_ref[...],
                         preferred_element_type=jnp.float32)


def _bn_kernel(x_ref, g_ref, bb_ref, o_ref):
    o_ref[...] = _bn(x_ref[...], g_ref[...], bb_ref[...])


# ---------------- pallas_call wrappers ----------------

def _full_spec(shape):
    # whole-array block (exempt from the (8,128) divisibility rule), grid=(1,).
    return pl.BlockSpec(shape, lambda i: (0,) * len(shape))


def fused_conv_matmul(w_mat, patchesT, bias, *, act,
                      gamma=None, beta=None, up_mat=None):
    """out(C_out, M) = [upsample o] [BN o] act(W @ patchesT + bias).

    Pixel axis M is the minor (lane) axis of the output -> lane-dense stores.
    Matmul inputs bf16, accumulation + epilogue f32.  All operands are small
    enough to be VMEM-resident, so one full block (no padding copies).
    """
    c_out, _ = w_mat.shape
    _, m = patchesT.shape
    args = [w_mat.astype(jnp.bfloat16),
            patchesT.astype(jnp.bfloat16),
            bias.astype(jnp.float32).reshape(c_out, 1)]
    if gamma is None:
        kernel = functools.partial(_conv_kernel, act=act)
        out_m = m
    else:
        args += [gamma.astype(jnp.float32).reshape(c_out, 1),
                 beta.astype(jnp.float32).reshape(c_out, 1)]
        if up_mat is None:
            kernel = functools.partial(_conv_bn_kernel, act=act)
            out_m = m
        else:
            args.append(up_mat.astype(jnp.bfloat16))
            kernel = functools.partial(_conv_bn_up_kernel, act=act)
            out_m = up_mat.shape[1]
    return pl.pallas_call(
        kernel,
        out_shape=jax.ShapeDtypeStruct((c_out, out_m), jnp.float32),
        grid=(1,),
        in_specs=[_full_spec(a.shape) for a in args],
        out_specs=_full_spec((c_out, out_m)),
        compiler_params=_CPARAMS,
    )(*args)


def batchnorm_cm(x_cm, gamma, beta):
    """Training-mode BatchNorm2d on a channel-major (C, N*H*W) activation (f32)."""
    c, m = x_cm.shape
    return pl.pallas_call(
        _bn_kernel,
        out_shape=jax.ShapeDtypeStruct((c, m), jnp.float32),
        grid=(1,),
        in_specs=[_full_spec((c, m)), _full_spec((c, 1)), _full_spec((c, 1))],
        out_specs=_full_spec((c, m)),
        compiler_params=_CPARAMS,
    )(x_cm,
      gamma.astype(jnp.float32).reshape(c, 1),
      beta.astype(jnp.float32).reshape(c, 1))


# ---------------- conv / conv-transpose / upsample plumbing ----------------

def _im2col_T(x, k, stride):
    """x: (C, N, H, W) -> transposed patch matrix (C*k*k, N*OH*OW), plus (OH, OW).

    Row order (cin, kh, kw) matches weight.reshape(C_out, C_in*k*k); column order
    (n, oh, ow) is the channel-major pixel axis.  Built in bf16 to halve HBM bytes.
    """
    c, n, h, w = x.shape
    oh = (h - k) // stride + 1
    ow = (w - k) // stride + 1
    taps = []
    for kh in range(k):
        for kw in range(k):
            taps.append(x[:, :, kh:kh + stride * (oh - 1) + 1:stride,
                              kw:kw + stride * (ow - 1) + 1:stride])
    p = jnp.stack(taps, axis=1)                        # (C, k*k, N, OH, OW)
    return p.reshape(c * k * k, n * oh * ow), oh, ow


def conv2d_cm(x, w, b, *, stride, act, gamma=None, beta=None, up_mat=None):
    """PyTorch Conv2d (valid padding) on channel-major x: (C_in, N, H, W)."""
    c_out, c_in, k, _ = w.shape
    p, oh, ow = _im2col_T(x.astype(jnp.bfloat16), k, stride)
    out = fused_conv_matmul(w.reshape(c_out, c_in * k * k), p, b, act=act,
                            gamma=gamma, beta=beta, up_mat=up_mat)
    return out, oh, ow


# Phase-selection tensor S[phase, tap_idx, k] for the stride-2 sub-pixel decomposition:
# even outputs (phase 0) use taps [w4, w2, w0], odd outputs (phase 1) use [0, w3, w1];
# all phases read the same 3-wide windows of the 2-padded input.
_PHASE_SELECT = np.zeros((2, 3, 5), np.float32)
for _a in range(3):
    _PHASE_SELECT[0, _a, 4 - 2 * _a] = 1.0
for _a in (1, 2):
    _PHASE_SELECT[1, _a, 5 - 2 * _a] = 1.0


def conv_transpose2d_cm(x, w_t, b, *, act):
    """PyTorch ConvTranspose2d (k=5, stride=2, padding=0) on channel-major x.

    Sub-pixel decomposition: the 4 output stride-phases are 3x3 stride-1 correlations of
    the 2-padded input; their kernels are stacked on the output-channel axis so the whole
    layer is ONE lane-dense matmul, followed by an interleave of the phase outputs.
    """
    c_in, c_out, k, _ = w_t.shape
    assert k == 5, "sub-pixel decomposition specialised to kernel_size=5, stride=2"
    _, n, h, w = x.shape
    oh, ow = 2 * h + 3, 2 * w + 3
    s = jnp.asarray(_PHASE_SELECT)
    wp = jnp.einsum('xak,ybl,iokl->xyoiab', s, s, w_t)       # (2, 2, C_out, C_in, 3, 3)
    w_mat = wp.reshape(4 * c_out, c_in * 9)
    b4 = jnp.tile(b, 4)
    xpad = jnp.pad(x.astype(jnp.bfloat16), ((0, 0), (0, 0), (2, 2), (2, 2)))
    p, ph, pw = _im2col_T(xpad, 3, 1)                        # ph = H+2, pw = W+2
    z = fused_conv_matmul(w_mat, p, b4, act=act)             # (4*C_out, N*(H+2)*(W+2))
    z = z.reshape(2, 2, c_out, n, ph, pw)
    out = jnp.zeros((c_out, n, oh, ow), jnp.float32)
    out = out.at[:, :, 0::2, 0::2].set(z[0, 0])
    out = out.at[:, :, 0::2, 1::2].set(z[0, 1, :, :, :, :w + 1])
    out = out.at[:, :, 1::2, 0::2].set(z[1, 0, :, :, :h + 1, :])
    out = out.at[:, :, 1::2, 1::2].set(z[1, 1, :, :, :h + 1, :w + 1])
    return out


def _interp_matrix(in_size, out_size):
    """Bilinear interpolation weights, align_corners=True (UpsamplingBilinear2d)."""
    r = np.zeros((out_size, in_size), dtype=np.float64)
    if out_size == 1:
        r[0, 0] = 1.0
    else:
        src = np.arange(out_size, dtype=np.float64) * (in_size - 1) / (out_size - 1)
        lo = np.minimum(np.floor(src).astype(np.int64), in_size - 1)
        hi = np.minimum(lo + 1, in_size - 1)
        frac = src - lo
        np.add.at(r, (np.arange(out_size), lo), 1.0 - frac)
        np.add.at(r, (np.arange(out_size), hi), frac)
    return r


def _upsample_matrix_T(h, w, scale, n):
    """Right-multiply matrix (N*H*W, N*OH*OW) applying the full 2D bilinear upsample to a
    channel-major (C, N*H*W) activation in one matmul (Kronecker product of the two 1-D
    interp matrices, block-diagonal over the batch; fine for small N)."""
    oh, ow = int(math.floor(h * scale)), int(math.floor(w * scale))
    bmat = np.kron(_interp_matrix(h, oh), _interp_matrix(w, ow))   # (OH*OW, H*W)
    ut = np.zeros((n * h * w, n * oh * ow), np.float32)
    for i in range(n):
        ut[i * h * w:(i + 1) * h * w, i * oh * ow:(i + 1) * oh * ow] = bmat.T
    return jnp.asarray(ut), oh, ow


# ---------------- auto_enc parameters & forward ----------------

def init_params(key, in_ch):
    def conv_p(k_, cout, cin, ksz):
        bound = 1.0 / math.sqrt(cin * ksz * ksz)
        kw, kb = jax.random.split(k_)
        w = jax.random.uniform(kw, (cout, cin, ksz, ksz), jnp.float32, -bound, bound)
        b = jax.random.uniform(kb, (cout,), jnp.float32, -bound, bound)
        return w, b

    def convT_p(k_, cin, cout, ksz):
        bound = 1.0 / math.sqrt(cout * ksz * ksz)
        kw, kb = jax.random.split(k_)
        w = jax.random.uniform(kw, (cin, cout, ksz, ksz), jnp.float32, -bound, bound)
        b = jax.random.uniform(kb, (cout,), jnp.float32, -bound, bound)
        return w, b

    keys = jax.random.split(key, 5)
    p = {}
    p["enc1_w"], p["enc1_b"] = conv_p(keys[0], 16 * in_ch, in_ch, 5)
    p["ebn1_g"], p["ebn1_b"] = jnp.ones((16 * in_ch,)), jnp.zeros((16 * in_ch,))
    p["enc2_w"], p["enc2_b"] = conv_p(keys[1], 8 * in_ch, 16 * in_ch, 5)
    p["ebn2_g"], p["ebn2_b"] = jnp.ones((8 * in_ch,)), jnp.zeros((8 * in_ch,))
    p["dconv5_w"], p["dconv5_b"] = conv_p(keys[2], 16 * in_ch, 8 * in_ch, 5)
    p["dec3_w"], p["dec3_b"] = convT_p(keys[3], 16 * in_ch, 8 * in_ch, 5)
    p["dbn1_g"], p["dbn1_b"] = jnp.ones((8 * in_ch,)), jnp.zeros((8 * in_ch,))
    p["dec4_w"], p["dec4_b"] = convT_p(keys[4], 8 * in_ch, in_ch, 5)
    return p


def auto_enc_forward(p, x_nchw):
    n = x_nchw.shape[0]
    x = jnp.transpose(x_nchw, (1, 0, 2, 3))          # NCHW -> channel-major (C, N, H, W)

    # ---------- encode ----------
    # enc1 -> relu -> ebn1                               (one fused kernel)
    y, h1, w1 = conv2d_cm(x, p["enc1_w"], p["enc1_b"], stride=2, act="relu",
                          gamma=p["ebn1_g"], beta=p["ebn1_b"])
    y = y.reshape(-1, n, h1, w1)
    # enc2 -> relu -> ebn2 -> 2.4x bilinear upsample     (one fused kernel)
    h2, w2 = (h1 - 5) // 2 + 1, (w1 - 5) // 2 + 1
    up_t, hu, wu = _upsample_matrix_T(h2, w2, 2.4, n)
    y, _, _ = conv2d_cm(y, p["enc2_w"], p["enc2_b"], stride=2, act="relu",
                        gamma=p["ebn2_g"], beta=p["ebn2_b"], up_mat=up_t)
    y = y.reshape(-1, n, hu, wu)

    # ---------- decode ----------
    y, h3, w3 = conv2d_cm(y, p["dconv5_w"], p["dconv5_b"], stride=2, act="relu")
    y = y.reshape(-1, n, h3, w3)
    y = conv_transpose2d_cm(y, p["dec3_w"], p["dec3_b"], act="relu")
    c3, _, h4, w4 = y.shape
    y = batchnorm_cm(y.reshape(c3, n * h4 * w4), p["dbn1_g"], p["dbn1_b"])
    y = y.reshape(c3, n, h4, w4)
    y = conv_transpose2d_cm(y, p["dec4_w"], p["dec4_b"], act="tanh")
    return jnp.transpose(y, (1, 0, 2, 3))            # back to NCHW at the boundary


if __name__ == "__main__":
    in_ch, batch, size = 2, 2, 49       # 49x49 matches the original script's input size
    key = jax.random.PRNGKey(0)
    k_params, k_x = jax.random.split(key)
    params = init_params(k_params, in_ch)
    x = jax.random.normal(k_x, (batch, in_ch, size, size), jnp.float32)

    fwd = jax.jit(auto_enc_forward)
    y = fwd(params, x)
    jax.block_until_ready(y)
    assert y.shape == (batch, in_ch, size, size), y.shape
    assert bool(jnp.all(jnp.isfinite(y)))
    print("KERNEL_OK")
</pallas_src>

<mosaic_0001>
module attributes {stable_mosaic.version = 11 : i64} {
  func.func @_conv_bn_kernel(%arg0: i32, %arg1: memref<32x50xbf16, #tpu.memory_space<vmem>>, %arg2: memref<50x1058xbf16, #tpu.memory_space<vmem>>, %arg3: memref<32x1xf32, #tpu.memory_space<vmem>>, %arg4: memref<32x1xf32, #tpu.memory_space<vmem>>, %arg5: memref<32x1xf32, #tpu.memory_space<vmem>>, %arg6: memref<32x1058xf32, #tpu.memory_space<vmem>>) attributes {dimension_semantics = [#tpu.dimension_semantics<arbitrary>], iteration_bounds = array<i64: 1>, scalar_prefetch = 0 : i64, scratch_operands = 0 : i64, tpu.core_type = #tpu.core_type<tc>, window_params = [{pipeline_mode = #tpu.pipeline_mode<synchronous>, transform_indices = @transform_0, window_bounds = array<i64: 32, 50>}, {pipeline_mode = #tpu.pipeline_mode<synchronous>, transform_indices = @transform_1, window_bounds = array<i64: 50, 1058>}, {pipeline_mode = #tpu.pipeline_mode<synchronous>, transform_indices = @transform_2, window_bounds = array<i64: 32, 1>}, {pipeline_mode = #tpu.pipeline_mode<synchronous>, transform_indices = @transform_3, window_bounds = array<i64: 32, 1>}, {pipeline_mode = #tpu.pipeline_mode<synchronous>, transform_indices = @transform_4, window_bounds = array<i64: 32, 1>}, {pipeline_mode = #tpu.pipeline_mode<synchronous>, transform_indices = @transform_5, window_bounds = array<i64: 32, 1058>}]} {
    %c0 = arith.constant 0 : index
    %c0_0 = arith.constant 0 : index
    %0 = vector.load %arg1[%c0, %c0_0] : memref<32x50xbf16, #tpu.memory_space<vmem>>, vector<32x50xbf16>
    %c0_1 = arith.constant 0 : index
    %c0_2 = arith.constant 0 : index
    %1 = vector.load %arg2[%c0_1, %c0_2] : memref<50x1058xbf16, #tpu.memory_space<vmem>>, vector<50x1058xbf16>
    %cst = arith.constant dense<0.000000e+00> : vector<32x1058xf32>
    %2 = tpu.matmul %0, %1, %cst {dimension_numbers = #tpu.dot_dimension_numbers<[1], [0], [0], [1], [0, 0, 1, 1], [], []>} : vector<32x50xbf16>, vector<50x1058xbf16>, vector<32x1058xf32> -> vector<32x1058xf32>
    %c0_3 = arith.constant 0 : index
    %c0_4 = arith.constant 0 : index
    %3 = vector.load %arg3[%c0_3, %c0_4] : memref<32x1xf32, #tpu.memory_space<vmem>>, vector<32x1xf32>
    %4 = vector.broadcast %3 : vector<32x1xf32> to vector<32x1058xf32>
    %5 = arith.addf %2, %4 : vector<32x1058xf32>
    %cst_5 = arith.constant 0.000000e+00 : f32
    %6 = vector.broadcast %cst_5 : f32 to vector<32x1058xf32>
    %7 = arith.maximumf %5, %6 : vector<32x1058xf32>
    %c0_6 = arith.constant 0 : index
    %c0_7 = arith.constant 0 : index
    %8 = vector.load %arg4[%c0_6, %c0_7] : memref<32x1xf32, #tpu.memory_space<vmem>>, vector<32x1xf32>
    %c0_8 = arith.constant 0 : index
    %c0_9 = arith.constant 0 : index
    %9 = vector.load %arg5[%c0_8, %c0_9] : memref<32x1xf32, #tpu.memory_space<vmem>>, vector<32x1xf32>
    %cst_10 = arith.constant dense<0.000000e+00> : vector<32xf32>
    %10 = vector.multi_reduction <add>, %7, %cst_10 [1] : vector<32x1058xf32> to vector<32xf32>
    %11 = vector.shape_cast %10 : vector<32xf32> to vector<32x1xf32>
    %cst_11 = arith.constant 1.058000e+03 : f32
    %12 = vector.broadcast %cst_11 : f32 to vector<32x1xf32>
    %13 = arith.divf %11, %12 : vector<32x1xf32>
    %14 = vector.broadcast %13 : vector<32x1xf32> to vector<32x1058xf32>
    %15 = arith.subf %7, %14 : vector<32x1058xf32>
    %16 = arith.mulf %15, %15 : vector<32x1058xf32>
    %cst_12 = arith.constant dense<0.000000e+00> : vector<32xf32>
    %17 = vector.multi_reduction <add>, %16, %cst_12 [1] : vector<32x1058xf32> to vector<32xf32>
    %18 = vector.shape_cast %17 : vector<32xf32> to vector<32x1xf32>
    %cst_13 = arith.constant 1.058000e+03 : f32
    %19 = vector.broadcast %cst_13 : f32 to vector<32x1xf32>
    %20 = arith.divf %18, %19 : vector<32x1xf32>
    %21 = vector.broadcast %13 : vector<32x1xf32> to vector<32x1058xf32>
    %22 = arith.subf %7, %21 : vector<32x1058xf32>
    %cst_14 = arith.constant 9.99999974E-6 : f32
    %23 = vector.broadcast %cst_14 : f32 to vector<32x1xf32>
    %24 = arith.addf %20, %23 : vector<32x1xf32>
    %25 = math.rsqrt %24 : vector<32x1xf32>
    %26 = vector.broadcast %25 : vector<32x1xf32> to vector<32x1058xf32>
    %27 = arith.mulf %22, %26 : vector<32x1058xf32>
    %28 = vector.broadcast %8 : vector<32x1xf32> to vector<32x1058xf32>
    %29 = arith.mulf %27, %28 : vector<32x1058xf32>
    %30 = vector.broadcast %9 : vector<32x1xf32> to vector<32x1058xf32>
    %31 = arith.addf %29, %30 : vector<32x1058xf32>
    %c0_15 = arith.constant 0 : index
    %c0_16 = arith.constant 0 : index
    %32 = vector.load %arg6[%c0_15, %c0_16] : memref<32x1058xf32, #tpu.memory_space<vmem>>, vector<32x1058xf32>
    tpu.vector_store %arg6[%c0_15, %c0_16], %31 {strides = array<i32>} : memref<32x1058xf32, #tpu.memory_space<vmem>>, vector<32x1058xf32>,
    return
  }
  func.func @transform_0(%arg0: i32) -> (i32, i32) {
    %c0_i32 = arith.constant 0 : i32
    %c0_i32_0 = arith.constant 0 : i32
    %c0_i32_1 = arith.constant 0 : i32
    return %c0_i32, %c0_i32_0 : i32, i32
  }
  func.func @transform_1(%arg0: i32) -> (i32, i32) {
    %c0_i32 = arith.constant 0 : i32
    %c0_i32_0 = arith.constant 0 : i32
    %c0_i32_1 = arith.constant 0 : i32
    return %c0_i32, %c0_i32_0 : i32, i32
  }
  func.func @transform_2(%arg0: i32) -> (i32, i32) {
    %c0_i32 = arith.constant 0 : i32
    %c0_i32_0 = arith.constant 0 : i32
    %c0_i32_1 = arith.constant 0 : i32
    return %c0_i32, %c0_i32_0 : i32, i32
  }
  func.func @transform_3(%arg0: i32) -> (i32, i32) {
    %c0_i32 = arith.constant 0 : i32
    %c0_i32_0 = arith.constant 0 : i32
    %c0_i32_1 = arith.constant 0 : i32
    return %c0_i32, %c0_i32_0 : i32, i32
  }
  func.func @transform_4(%arg0: i32) -> (i32, i32) {
    %c0_i32 = arith.constant 0 : i32
    %c0_i32_0 = arith.constant 0 : i32
    %c0_i32_1 = arith.constant 0 : i32
    return %c0_i32, %c0_i32_0 : i32, i32
  }
  func.func @transform_5(%arg0: i32) -> (i32, i32) {
    %c0_i32 = arith.constant 0 : i32
    %c0_i32_0 = arith.constant 0 : i32
    %c0_i32_1 = arith.constant 0 : i32
    return %c0_i32, %c0_i32_0 : i32, i32
  }
}

module attributes {stable_mosaic.version = 11 : i64} {
  func.func @_conv_bn_up_kernel(%arg0: i32, %arg1: memref<16x800xbf16, #tpu.memory_space<vmem>>, %arg2: memref<800x200xbf16, #tpu.memory_space<vmem>>, %arg3: memref<16x1xf32, #tpu.memory_space<vmem>>, %arg4: memref<16x1xf32, #tpu.memory_space<vmem>>, %arg5: memref<16x1xf32, #tpu.memory_space<vmem>>, %arg6: memref<200x1152xbf16, #tpu.memory_space<vmem>>, %arg7: memref<16x1152xf32, #tpu.memory_space<vmem>>) attributes {dimension_semantics = [#tpu.dimension_semantics<arbitrary>], iteration_bounds = array<i64: 1>, scalar_prefetch = 0 : i64, scratch_operands = 0 : i64, tpu.core_type = #tpu.core_type<tc>, window_params = [{pipeline_mode = #tpu.pipeline_mode<synchronous>, transform_indices = @transform_0, window_bounds = array<i64: 16, 800>}, {pipeline_mode = #tpu.pipeline_mode<synchronous>, transform_indices = @transform_1, window_bounds = array<i64: 800, 200>}, {pipeline_mode = #tpu.pipeline_mode<synchronous>, transform_indices = @transform_2, window_bounds = array<i64: 16, 1>}, {pipeline_mode = #tpu.pipeline_mode<synchronous>, transform_indices = @transform_3, window_bounds = array<i64: 16, 1>}, {pipeline_mode = #tpu.pipeline_mode<synchronous>, transform_indices = @transform_4, window_bounds = array<i64: 16, 1>}, {pipeline_mode = #tpu.pipeline_mode<synchronous>, transform_indices = @transform_5, window_bounds = array<i64: 200, 1152>}, {pipeline_mode = #tpu.pipeline_mode<synchronous>, transform_indices = @transform_6, window_bounds = array<i64: 16, 1152>}]} {
    %c0 = arith.constant 0 : index
    %c0_0 = arith.constant 0 : index
    %0 = vector.load %arg1[%c0, %c0_0] : memref<16x800xbf16, #tpu.memory_space<vmem>>, vector<16x800xbf16>
    %c0_1 = arith.constant 0 : index
    %c0_2 = arith.constant 0 : index
    %1 = vector.load %arg2[%c0_1, %c0_2] : memref<800x200xbf16, #tpu.memory_space<vmem>>, vector<800x200xbf16>
    %cst = arith.constant dense<0.000000e+00> : vector<16x200xf32>
    %2 = tpu.matmul %0, %1, %cst {dimension_numbers = #tpu.dot_dimension_numbers<[1], [0], [0], [1], [0, 0, 1, 1], [], []>} : vector<16x800xbf16>, vector<800x200xbf16>, vector<16x200xf32> -> vector<16x200xf32>
    %c0_3 = arith.constant 0 : index
    %c0_4 = arith.constant 0 : index
    %3 = vector.load %arg3[%c0_3, %c0_4] : memref<16x1xf32, #tpu.memory_space<vmem>>, vector<16x1xf32>
    %4 = vector.broadcast %3 : vector<16x1xf32> to vector<16x200xf32>
    %5 = arith.addf %2, %4 : vector<16x200xf32>
    %cst_5 = arith.constant 0.000000e+00 : f32
    %6 = vector.broadcast %cst_5 : f32 to vector<16x200xf32>
    %7 = arith.maximumf %5, %6 : vector<16x200xf32>
    %c0_6 = arith.constant 0 : index
    %c0_7 = arith.constant 0 : index
    %8 = vector.load %arg4[%c0_6, %c0_7] : memref<16x1xf32, #tpu.memory_space<vmem>>, vector<16x1xf32>
    %c0_8 = arith.constant 0 : index
    %c0_9 = arith.constant 0 : index
    %9 = vector.load %arg5[%c0_8, %c0_9] : memref<16x1xf32, #tpu.memory_space<vmem>>, vector<16x1xf32>
    %cst_10 = arith.constant dense<0.000000e+00> : vector<16xf32>
    %10 = vector.multi_reduction <add>, %7, %cst_10 [1] : vector<16x200xf32> to vector<16xf32>
    %11 = vector.shape_cast %10 : vector<16xf32> to vector<16x1xf32>
    %cst_11 = arith.constant 2.000000e+02 : f32
    %12 = vector.broadcast %cst_11 : f32 to vector<16x1xf32>
    %13 = arith.divf %11, %12 : vector<16x1xf32>
    %14 = vector.broadcast %13 : vector<16x1xf32> to vector<16x200xf32>
    %15 = arith.subf %7, %14 : vector<16x200xf32>
    %16 = arith.mulf %15, %15 : vector<16x200xf32>
    %cst_12 = arith.constant dense<0.000000e+00> : vector<16xf32>
    %17 = vector.multi_reduction <add>, %16, %cst_12 [1] : vector<16x200xf32> to vector<16xf32>
    %18 = vector.shape_cast %17 : vector<16xf32> to vector<16x1xf32>
    %cst_13 = arith.constant 2.000000e+02 : f32
    %19 = vector.broadcast %cst_13 : f32 to vector<16x1xf32>
    %20 = arith.divf %18, %19 : vector<16x1xf32>
    %21 = vector.broadcast %13 : vector<16x1xf32> to vector<16x200xf32>
    %22 = arith.subf %7, %21 : vector<16x200xf32>
    %cst_14 = arith.constant 9.99999974E-6 : f32
    %23 = vector.broadcast %cst_14 : f32 to vector<16x1xf32>
    %24 = arith.addf %20, %23 : vector<16x1xf32>
    %25 = math.rsqrt %24 : vector<16x1xf32>
    %26 = vector.broadcast %25 : vector<16x1xf32> to vector<16x200xf32>
    %27 = arith.mulf %22, %26 : vector<16x200xf32>
    %28 = vector.broadcast %8 : vector<16x1xf32> to vector<16x200xf32>
    %29 = arith.mulf %27, %28 : vector<16x200xf32>
    %30 = vector.broadcast %9 : vector<16x1xf32> to vector<16x200xf32>
    %31 = arith.addf %29, %30 : vector<16x200xf32>
    %32 = arith.truncf %31 : vector<16x200xf32> to vector<16x200xbf16>
    %c0_15 = arith.constant 0 : index
    %c0_16 = arith.constant 0 : index
    %33 = vector.load %arg6[%c0_15, %c0_16] : memref<200x1152xbf16, #tpu.memory_space<vmem>>, vector<200x1152xbf16>
    %cst_17 = arith.constant dense<0.000000e+00> : vector<16x1152xf32>
    %34 = tpu.matmul %32, %33, %cst_17 {dimension_numbers = #tpu.dot_dimension_numbers<[1], [0], [0], [1], [0, 0, 1, 1], [], []>} : vector<16x200xbf16>, vector<200x1152xbf16>, vector<16x1152xf32> -> vector<16x1152xf32>
    %c0_18 = arith.constant 0 : index
    %c0_19 = arith.constant 0 : index
    %35 = vector.load %arg7[%c0_18, %c0_19] : memref<16x1152xf32, #tpu.memory_space<vmem>>, vector<16x1152xf32>
    tpu.vector_store %arg7[%c0_18, %c0_19], %34 {strides = array<i32>} : memref<16x1152xf32, #tpu.memory_space<vmem>>, vector<16x1152xf32>,
    return
  }
  func.func @transform_0(%arg0: i32) -> (i32, i32) {
    %c0_i32 = arith.constant 0 : i32
    %c0_i32_0 = arith.constant 0 : i32
    %c0_i32_1 = arith.constant 0 : i32
    return %c0_i32, %c0_i32_0 : i32, i32
  }
  func.func @transform_1(%arg0: i32) -> (i32, i32) {
    %c0_i32 = arith.constant 0 : i32
    %c0_i32_0 = arith.constant 0 : i32
    %c0_i32_1 = arith.constant 0 : i32
    return %c0_i32, %c0_i32_0 : i32, i32
  }
  func.func @transform_2(%arg0: i32) -> (i32, i32) {
    %c0_i32 = arith.constant 0 : i32
    %c0_i32_0 = arith.constant 0 : i32
    %c0_i32_1 = arith.constant 0 : i32
    return %c0_i32, %c0_i32_0 : i32, i32
  }
  func.func @transform_3(%arg0: i32) -> (i32, i32) {
    %c0_i32 = arith.constant 0 : i32
    %c0_i32_0 = arith.constant 0 : i32
    %c0_i32_1 = arith.constant 0 : i32
    return %c0_i32, %c0_i32_0 : i32, i32
  }
  func.func @transform_4(%arg0: i32) -> (i32, i32) {
    %c0_i32 = arith.constant 0 : i32
    %c0_i32_0 = arith.constant 0 : i32
    %c0_i32_1 = arith.constant 0 : i32
    return %c0_i32, %c0_i32_0 : i32, i32
  }
  func.func @transform_5(%arg0: i32) -> (i32, i32) {
    %c0_i32 = arith.constant 0 : i32
    %c0_i32_0 = arith.constant 0 : i32
    %c0_i32_1 = arith.constant 0 : i32
    return %c0_i32, %c0_i32_0 : i32, i32
  }
  func.func @transform_6(%arg0: i32) -> (i32, i32) {
    %c0_i32 = arith.constant 0 : i32
    %c0_i32_0 = arith.constant 0 : i32
    %c0_i32_1 = arith.constant 0 : i32
    return %c0_i32, %c0_i32_0 : i32, i32
  }
}

module attributes {stable_mosaic.version = 11 : i64} {
  func.func @_conv_kernel(%arg0: i32, %arg1: memref<32x400xbf16, #tpu.memory_space<vmem>>, %arg2: memref<400x200xbf16, #tpu.memory_space<vmem>>, %arg3: memref<32x1xf32, #tpu.memory_space<vmem>>, %arg4: memref<32x200xf32, #tpu.memory_space<vmem>>) attributes {dimension_semantics = [#tpu.dimension_semantics<arbitrary>], iteration_bounds = array<i64: 1>, scalar_prefetch = 0 : i64, scratch_operands = 0 : i64, tpu.core_type = #tpu.core_type<tc>, window_params = [{pipeline_mode = #tpu.pipeline_mode<synchronous>, transform_indices = @transform_0, window_bounds = array<i64: 32, 400>}, {pipeline_mode = #tpu.pipeline_mode<synchronous>, transform_indices = @transform_1, window_bounds = array<i64: 400, 200>}, {pipeline_mode = #tpu.pipeline_mode<synchronous>, transform_indices = @transform_2, window_bounds = array<i64: 32, 1>}, {pipeline_mode = #tpu.pipeline_mode<synchronous>, transform_indices = @transform_3, window_bounds = array<i64: 32, 200>}]} {
    %c0 = arith.constant 0 : index
    %c0_0 = arith.constant 0 : index
    %0 = vector.load %arg1[%c0, %c0_0] : memref<32x400xbf16, #tpu.memory_space<vmem>>, vector<32x400xbf16>
    %c0_1 = arith.constant 0 : index
    %c0_2 = arith.constant 0 : index
    %1 = vector.load %arg2[%c0_1, %c0_2] : memref<400x200xbf16, #tpu.memory_space<vmem>>, vector<400x200xbf16>
    %cst = arith.constant dense<0.000000e+00> : vector<32x200xf32>
    %2 = tpu.matmul %0, %1, %cst {dimension_numbers = #tpu.dot_dimension_numbers<[1], [0], [0], [1], [0, 0, 1, 1], [], []>} : vector<32x400xbf16>, vector<400x200xbf16>, vector<32x200xf32> -> vector<32x200xf32>
    %c0_3 = arith.constant 0 : index
    %c0_4 = arith.constant 0 : index
    %3 = vector.load %arg3[%c0_3, %c0_4] : memref<32x1xf32, #tpu.memory_space<vmem>>, vector<32x1xf32>
    %4 = vector.broadcast %3 : vector<32x1xf32> to vector<32x200xf32>
    %5 = arith.addf %2, %4 : vector<32x200xf32>
    %cst_5 = arith.constant 0.000000e+00 : f32
    %6 = vector.broadcast %cst_5 : f32 to vector<32x200xf32>
    %7 = arith.maximumf %5, %6 : vector<32x200xf32>
    %c0_6 = arith.constant 0 : index
    %c0_7 = arith.constant 0 : index
    %8 = vector.load %arg4[%c0_6, %c0_7] : memref<32x200xf32, #tpu.memory_space<vmem>>, vector<32x200xf32>
    tpu.vector_store %arg4[%c0_6, %c0_7], %7 {strides = array<i32>} : memref<32x200xf32, #tpu.memory_space<vmem>>, vector<32x200xf32>,
    return
  }
  func.func @transform_0(%arg0: i32) -> (i32, i32) {
    %c0_i32 = arith.constant 0 : i32
    %c0_i32_0 = arith.constant 0 : i32
    %c0_i32_1 = arith.constant 0 : i32
    return %c0_i32, %c0_i32_0 : i32, i32
  }
  func.func @transform_1(%arg0: i32) -> (i32, i32) {
    %c0_i32 = arith.constant 0 : i32
    %c0_i32_0 = arith.constant 0 : i32
    %c0_i32_1 = arith.constant 0 : i32
    return %c0_i32, %c0_i32_0 : i32, i32
  }
  func.func @transform_2(%arg0: i32) -> (i32, i32) {
    %c0_i32 = arith.constant 0 : i32
    %c0_i32_0 = arith.constant 0 : i32
    %c0_i32_1 = arith.constant 0 : i32
    return %c0_i32, %c0_i32_0 : i32, i32
  }
  func.func @transform_3(%arg0: i32) -> (i32, i32) {
    %c0_i32 = arith.constant 0 : i32
    %c0_i32_0 = arith.constant 0 : i32
    %c0_i32_1 = arith.constant 0 : i32
    return %c0_i32, %c0_i32_0 : i32, i32
  }
}

module attributes {stable_mosaic.version = 11 : i64} {
  func.func @_conv_kernel(%arg0: i32, %arg1: memref<64x288xbf16, #tpu.memory_space<vmem>>, %arg2: memref<288x288xbf16, #tpu.memory_space<vmem>>, %arg3: memref<64x1xf32, #tpu.memory_space<vmem>>, %arg4: memref<64x288xf32, #tpu.memory_space<vmem>>) attributes {dimension_semantics = [#tpu.dimension_semantics<arbitrary>], iteration_bounds = array<i64: 1>, scalar_prefetch = 0 : i64, scratch_operands = 0 : i64, tpu.core_type = #tpu.core_type<tc>, window_params = [{pipeline_mode = #tpu.pipeline_mode<synchronous>, transform_indices = @transform_0, window_bounds = array<i64: 64, 288>}, {pipeline_mode = #tpu.pipeline_mode<synchronous>, transform_indices = @transform_1, window_bounds = array<i64: 288, 288>}, {pipeline_mode = #tpu.pipeline_mode<synchronous>, transform_indices = @transform_2, window_bounds = array<i64: 64, 1>}, {pipeline_mode = #tpu.pipeline_mode<synchronous>, transform_indices = @transform_3, window_bounds = array<i64: 64, 288>}]} {
    %c0 = arith.constant 0 : index
    %c0_0 = arith.constant 0 : index
    %0 = vector.load %arg1[%c0, %c0_0] : memref<64x288xbf16, #tpu.memory_space<vmem>>, vector<64x288xbf16>
    %c0_1 = arith.constant 0 : index
    %c0_2 = arith.constant 0 : index
    %1 = vector.load %arg2[%c0_1, %c0_2] : memref<288x288xbf16, #tpu.memory_space<vmem>>, vector<288x288xbf16>
    %cst = arith.constant dense<0.000000e+00> : vector<64x288xf32>
    %2 = tpu.matmul %0, %1, %cst {dimension_numbers = #tpu.dot_dimension_numbers<[1], [0], [0], [1], [0, 0, 1, 1], [], []>} : vector<64x288xbf16>, vector<288x288xbf16>, vector<64x288xf32> -> vector<64x288xf32>
    %c0_3 = arith.constant 0 : index
    %c0_4 = arith.constant 0 : index
    %3 = vector.load %arg3[%c0_3, %c0_4] : memref<64x1xf32, #tpu.memory_space<vmem>>, vector<64x1xf32>
    %4 = vector.broadcast %3 : vector<64x1xf32> to vector<64x288xf32>
    %5 = arith.addf %2, %4 : vector<64x288xf32>
    %cst_5 = arith.constant 0.000000e+00 : f32
    %6 = vector.broadcast %cst_5 : f32 to vector<64x288xf32>
    %7 = arith.maximumf %5, %6 : vector<64x288xf32>
    %c0_6 = arith.constant 0 : index
    %c0_7 = arith.constant 0 : index
    %8 = vector.load %arg4[%c0_6, %c0_7] : memref<64x288xf32, #tpu.memory_space<vmem>>, vector<64x288xf32>
    tpu.vector_store %arg4[%c0_6, %c0_7], %7 {strides = array<i32>} : memref<64x288xf32, #tpu.memory_space<vmem>>, vector<64x288xf32>,
    return
  }
  func.func @transform_0(%arg0: i32) -> (i32, i32) {
    %c0_i32 = arith.constant 0 : i32
    %c0_i32_0 = arith.constant 0 : i32
    %c0_i32_1 = arith.constant 0 : i32
    return %c0_i32, %c0_i32_0 : i32, i32
  }
  func.func @transform_1(%arg0: i32) -> (i32, i32) {
    %c0_i32 = arith.constant 0 : i32
    %c0_i32_0 = arith.constant 0 : i32
    %c0_i32_1 = arith.constant 0 : i32
    return %c0_i32, %c0_i32_0 : i32, i32
  }
  func.func @transform_2(%arg0: i32) -> (i32, i32) {
    %c0_i32 = arith.constant 0 : i32
    %c0_i32_0 = arith.constant 0 : i32
    %c0_i32_1 = arith.constant 0 : i32
    return %c0_i32, %c0_i32_0 : i32, i32
  }
  func.func @transform_3(%arg0: i32) -> (i32, i32) {
    %c0_i32 = arith.constant 0 : i32
    %c0_i32_0 = arith.constant 0 : i32
    %c0_i32_1 = arith.constant 0 : i32
    return %c0_i32, %c0_i32_0 : i32, i32
  }
}

module attributes {stable_mosaic.version = 11 : i64} {
  func.func @_bn_kernel(%arg0: i32, %arg1: memref<16x1058xf32, #tpu.memory_space<vmem>>, %arg2: memref<16x1xf32, #tpu.memory_space<vmem>>, %arg3: memref<16x1xf32, #tpu.memory_space<vmem>>, %arg4: memref<16x1058xf32, #tpu.memory_space<vmem>>) attributes {dimension_semantics = [#tpu.dimension_semantics<arbitrary>], iteration_bounds = array<i64: 1>, scalar_prefetch = 0 : i64, scratch_operands = 0 : i64, tpu.core_type = #tpu.core_type<tc>, window_params = [{pipeline_mode = #tpu.pipeline_mode<synchronous>, transform_indices = @transform_0, window_bounds = array<i64: 16, 1058>}, {pipeline_mode = #tpu.pipeline_mode<synchronous>, transform_indices = @transform_1, window_bounds = array<i64: 16, 1>}, {pipeline_mode = #tpu.pipeline_mode<synchronous>, transform_indices = @transform_2, window_bounds = array<i64: 16, 1>}, {pipeline_mode = #tpu.pipeline_mode<synchronous>, transform_indices = @transform_3, window_bounds = array<i64: 16, 1058>}]} {
    %c0 = arith.constant 0 : index
    %c0_0 = arith.constant 0 : index
    %0 = vector.load %arg1[%c0, %c0_0] : memref<16x1058xf32, #tpu.memory_space<vmem>>, vector<16x1058xf32>
    %c0_1 = arith.constant 0 : index
    %c0_2 = arith.constant 0 : index
    %1 = vector.load %arg2[%c0_1, %c0_2] : memref<16x1xf32, #tpu.memory_space<vmem>>, vector<16x1xf32>
    %c0_3 = arith.constant 0 : index
    %c0_4 = arith.constant 0 : index
    %2 = vector.load %arg3[%c0_3, %c0_4] : memref<16x1xf32, #tpu.memory_space<vmem>>, vector<16x1xf32>
    %cst = arith.constant dense<0.000000e+00> : vector<16xf32>
    %3 = vector.multi_reduction <add>, %0, %cst [1] : vector<16x1058xf32> to vector<16xf32>
    %4 = vector.shape_cast %3 : vector<16xf32> to vector<16x1xf32>
    %cst_5 = arith.constant 1.058000e+03 : f32
    %5 = vector.broadcast %cst_5 : f32 to vector<16x1xf32>
    %6 = arith.divf %4, %5 : vector<16x1xf32>
    %7 = vector.broadcast %6 : vector<16x1xf32> to vector<16x1058xf32>
    %8 = arith.subf %0, %7 : vector<16x1058xf32>
    %9 = arith.mulf %8, %8 : vector<16x1058xf32>
    %cst_6 = arith.constant dense<0.000000e+00> : vector<16xf32>
    %10 = vector.multi_reduction <add>, %9, %cst_6 [1] : vector<16x1058xf32> to vector<16xf32>
    %11 = vector.shape_cast %10 : vector<16xf32> to vector<16x1xf32>
    %cst_7 = arith.constant 1.058000e+03 : f32
    %12 = vector.broadcast %cst_7 : f32 to vector<16x1xf32>
    %13 = arith.divf %11, %12 : vector<16x1xf32>
    %14 = vector.broadcast %6 : vector<16x1xf32> to vector<16x1058xf32>
    %15 = arith.subf %0, %14 : vector<16x1058xf32>
    %cst_8 = arith.constant 9.99999974E-6 : f32
    %16 = vector.broadcast %cst_8 : f32 to vector<16x1xf32>
    %17 = arith.addf %13, %16 : vector<16x1xf32>
    %18 = math.rsqrt %17 : vector<16x1xf32>
    %19 = vector.broadcast %18 : vector<16x1xf32> to vector<16x1058xf32>
    %20 = arith.mulf %15, %19 : vector<16x1058xf32>
    %21 = vector.broadcast %1 : vector<16x1xf32> to vector<16x1058xf32>
    %22 = arith.mulf %20, %21 : vector<16x1058xf32>
    %23 = vector.broadcast %2 : vector<16x1xf32> to vector<16x1058xf32>
    %24 = arith.addf %22, %23 : vector<16x1058xf32>
    %c0_9 = arith.constant 0 : index
    %c0_10 = arith.constant 0 : index
    %25 = vector.load %arg4[%c0_9, %c0_10] : memref<16x1058xf32, #tpu.memory_space<vmem>>, vector<16x1058xf32>
    tpu.vector_store %arg4[%c0_9, %c0_10], %24 {strides = array<i32>} : memref<16x1058xf32, #tpu.memory_space<vmem>>, vector<16x1058xf32>,
    return
  }
  func.func @transform_0(%arg0: i32) -> (i32, i32) {
    %c0_i32 = arith.constant 0 : i32
    %c0_i32_0 = arith.constant 0 : i32
    %c0_i32_1 = arith.constant 0 : i32
    return %c0_i32, %c0_i32_0 : i32, i32
  }
  func.func @transform_1(%arg0: i32) -> (i32, i32) {
    %c0_i32 = arith.constant 0 : i32
    %c0_i32_0 = arith.constant 0 : i32
    %c0_i32_1 = arith.constant 0 : i32
    return %c0_i32, %c0_i32_0 : i32, i32
  }
  func.func @transform_2(%arg0: i32) -> (i32, i32) {
    %c0_i32 = arith.constant 0 : i32
    %c0_i32_0 = arith.constant 0 : i32
    %c0_i32_1 = arith.constant 0 : i32
    return %c0_i32, %c0_i32_0 : i32, i32
  }
  func.func @transform_3(%arg0: i32) -> (i32, i32) {
    %c0_i32 = arith.constant 0 : i32
    %c0_i32_0 = arith.constant 0 : i32
    %c0_i32_1 = arith.constant 0 : i32
    return %c0_i32, %c0_i32_0 : i32, i32
  }
}

module attributes {stable_mosaic.version = 11 : i64} {
  func.func @_conv_kernel(%arg0: i32, %arg1: memref<8x144xbf16, #tpu.memory_space<vmem>>, %arg2: memref<144x1250xbf16, #tpu.memory_space<vmem>>, %arg3: memref<8x1xf32, #tpu.memory_space<vmem>>, %arg4: memref<8x1250xf32, #tpu.memory_space<vmem>>) attributes {dimension_semantics = [#tpu.dimension_semantics<arbitrary>], iteration_bounds = array<i64: 1>, scalar_prefetch = 0 : i64, scratch_operands = 0 : i64, tpu.core_type = #tpu.core_type<tc>, window_params = [{pipeline_mode = #tpu.pipeline_mode<synchronous>, transform_indices = @transform_0, window_bounds = array<i64: 8, 144>}, {pipeline_mode = #tpu.pipeline_mode<synchronous>, transform_indices = @transform_1, window_bounds = array<i64: 144, 1250>}, {pipeline_mode = #tpu.pipeline_mode<synchronous>, transform_indices = @transform_2, window_bounds = array<i64: 8, 1>}, {pipeline_mode = #tpu.pipeline_mode<synchronous>, transform_indices = @transform_3, window_bounds = array<i64: 8, 1250>}]} {
    %c0 = arith.constant 0 : index
    %c0_0 = arith.constant 0 : index
    %0 = vector.load %arg1[%c0, %c0_0] : memref<8x144xbf16, #tpu.memory_space<vmem>>, vector<8x144xbf16>
    %c0_1 = arith.constant 0 : index
    %c0_2 = arith.constant 0 : index
    %1 = vector.load %arg2[%c0_1, %c0_2] : memref<144x1250xbf16, #tpu.memory_space<vmem>>, vector<144x1250xbf16>
    %cst = arith.constant dense<0.000000e+00> : vector<8x1250xf32>
    %2 = tpu.matmul %0, %1, %cst {dimension_numbers = #tpu.dot_dimension_numbers<[1], [0], [0], [1], [0, 0, 1, 1], [], []>} : vector<8x144xbf16>, vector<144x1250xbf16>, vector<8x1250xf32> -> vector<8x1250xf32>
    %c0_3 = arith.constant 0 : index
    %c0_4 = arith.constant 0 : index
    %3 = vector.load %arg3[%c0_3, %c0_4] : memref<8x1xf32, #tpu.memory_space<vmem>>, vector<8x1xf32>
    %4 = vector.broadcast %3 : vector<8x1xf32> to vector<8x1250xf32>
    %5 = arith.addf %2, %4 : vector<8x1250xf32>
    %6 = math.tanh %5 : vector<8x1250xf32>
    %c0_5 = arith.constant 0 : index
    %c0_6 = arith.constant 0 : index
    %7 = vector.load %arg4[%c0_5, %c0_6] : memref<8x1250xf32, #tpu.memory_space<vmem>>, vector<8x1250xf32>
    tpu.vector_store %arg4[%c0_5, %c0_6], %6 {strides = array<i32>} : memref<8x1250xf32, #tpu.memory_space<vmem>>, vector<8x1250xf32>,
    return
  }
  func.func @transform_0(%arg0: i32) -> (i32, i32) {
    %c0_i32 = arith.constant 0 : i32
    %c0_i32_0 = arith.constant 0 : i32
    %c0_i32_1 = arith.constant 0 : i32
    return %c0_i32, %c0_i32_0 : i32, i32
  }
  func.func @transform_1(%arg0: i32) -> (i32, i32) {
    %c0_i32 = arith.constant 0 : i32
    %c0_i32_0 = arith.constant 0 : i32
    %c0_i32_1 = arith.constant 0 : i32
    return %c0_i32, %c0_i32_0 : i32, i32
  }
  func.func @transform_2(%arg0: i32) -> (i32, i32) {
    %c0_i32 = arith.constant 0 : i32
    %c0_i32_0 = arith.constant 0 : i32
    %c0_i32_1 = arith.constant 0 : i32
    return %c0_i32, %c0_i32_0 : i32, i32
  }
  func.func @transform_3(%arg0: i32) -> (i32, i32) {
    %c0_i32 = arith.constant 0 : i32
    %c0_i32_0 = arith.constant 0 : i32
    %c0_i32_1 = arith.constant 0 : i32
    return %c0_i32, %c0_i32_0 : i32, i32
  }
}

</mosaic_0001>

<bundles_post_ra>
// kernel: auto_enc_forward.6
= control target key start
LH: loop header
LB: loop body
LE: loop exit
PB: predicated region body
PF: predicated region fallthrough
CT: control target
= control target key end

     0   :  { %vm262_vm0 = vcmask 1040384   ;;  %v1093_v2 = vmov 0   ;;  %vm255_vm1 = vcmask 408576   ;;  %vm602_vm2 = vcmask 277504   ;;  %s1988_s1 = inlined_call_operand.vmem [shape: bf16[50,1058], index: 1, kind: input, shape index: {}]   ;;  %s1989_s0 = inlined_call_operand.vmem [shape: bf16[32,50], index: 0, kind: input, shape index: {}]   ;;  %s1990_s2 = inlined_call_operand.vmem [shape: f32[32,1], index: 2, kind: input, shape index: {}]   ;;  %s1991_s3 = inlined_call_operand.vmem [shape: f32[32,1], index: 3, kind: input, shape index: {}]   ;;  %s1992_s4 = inlined_call_operand.vmem [shape: f32[32,1], index: 4, kind: input, shape index: {}]   ;;  %s1993_s5 = inlined_call_operand.vmem [shape: f32[32,1058], index: 5, kind: output, shape index: {}]  }
   0x1   :  { %v55_v0 = vld [vmem:[%s1988_s1 + $0xd8] sm:$0x11]  ;;  %v56_v1 = vld [vmem:[%s1988_s1 + $0xe0] sm:$0x11]  ;;  %322 = vmatprep.mubr.bf16.mxu0 %v1093_v2  ;;  %375 = vmatprep.mubr.bf16.mxu1 %v1093_v2  ;;  %v1043_v11 = vld [vmem:[%s1988_s1 + $0x90] ss:$36 sps:$4 sm:$0xff]  }
   0x2   :  { %v991_v3 = vcombine.high %v55_v0, %v55_v0  ;;  %v993_v4 = vcombine.high %v56_v1, %v56_v1  ;;  %v990_v5 = vcombine.low %v55_v0, %v55_v0  ;;  %v992_v6 = vcombine.low %v56_v1, %v56_v1  ;;  %v1039_v7 = vld [vmem:[%s1988_s1 + $0x94] ss:$36 sps:$4 sm:$0xff]   ;;  %1033 = vset.pattern.permute.xlu0 %v1093_v2  ;;  %v1041_v8 = vld [vmem:[%s1988_s1 + $0x9c] ss:$36 sps:$4 sm:$0xff]   ;;  %v1045_v13 = vld [vmem:[%s1988_s1 + $0x4c] ss:$36 sps:$4 sm:$0xff]  }
   0x3   :  { %1034 = vset.pattern.permute.xlu1 %v1093_v2  ;;  %v1044_v12 = vld [vmem:[%s1988_s1 + $0x98] ss:$36 sps:$4 sm:$0xff]   ;;  %v1049_v15 = vld [vmem:[%s1988_s1 + $0x48] ss:$36 sps:$4 sm:$0xff]   ;;  %v1050_v16 = vld [vmem:[%s1988_s1 + $0x50] ss:$36 sps:$4 sm:$0xff]  }
   0x4   :  { %999 = vmatprep.subr.msk.bf16.mxu0 %vm262_vm0, %v991_v3  ;;  %1002 = vmatprep.subr.msk.bf16.mxu1 %vm262_vm0, %v993_v4  ;;  %v264_v9 = vsel %vm262_vm0, %v990_v5, 0  ;;  %v270_v10 = vsel %vm262_vm0, %v992_v6, 0  ;;  %v1047_v14 = vld [vmem:[%s1988_s1 + $0x54] ss:$36 sps:$4 sm:$0xff]   ;;  %v1051_v17 = vld [vmem:[%s1988_s1 + $0x4] ss:$36 sps:$4 sm:$0xff]  }
   0x5   :  { %299 = vmatpush1.bf16.msra.mxu0 %v264_v9  ;;  %352 = vmatpush1.bf16.msra.mxu1 %v270_v10  ;;  %v1053_v18 = vld [vmem:[%s1988_s1 + $0xc] ss:$36 sps:$4 sm:$0xff]   ;;  %v1055_v21 = vld [vmem:[%s1988_s1] ss:$36 sps:$4 sm:$0xff]   ;;  %v1069_v39 = vld [vmem:[%s1988_s1 + $0x58] ss:$36 sps:$4 sm:$0xff]  }
   0x6   :  { %300 = vmatprep.subr.bf16.mxu0 %v1039_v7  ;;  %353 = vmatprep.subr.bf16.mxu1 %v1041_v8  ;;  %v57_v19 = vld [vmem:[%s1988_s1 + $0xe8] sm:$0x11]  ;;  %v58_v20 = vld [vmem:[%s1988_s1 + $0xf0] sm:$0x11]  ;;  %v1183_v27 = vld [vmem:[%s1989_s0] sm:$0xff]  }
   0x7   :  { %v1056_v22 = vld [vmem:[%s1988_s1 + $0x8] ss:$36 sps:$4 sm:$0xff]   ;;  %v995_v23 = vcombine.high %v57_v19, %v57_v19  ;;  %v997_v24 = vcombine.high %v58_v20, %v58_v20  ;;  %v994_v25 = vcombine.low %v57_v19, %v57_v19  ;;  %v996_v26 = vcombine.low %v58_v20, %v58_v20  ;;  %v1062_v32 = vld [vmem:[%s1988_s1 + $0xa0] ss:$36 sps:$4 sm:$0xff]   ;;  %v62_v38 = vld [vmem:[%s1990_s2 + $0x10] sm:$0xff] }
   0x8   :  { %v1064_v28 = vld [vmem:[%s1988_s1 + $0xa4] ss:$36 sps:$4 sm:$0xff]   ;;  %v1067_v31 = vld [vmem:[%s1988_s1 + $0xac] ss:$36 sps:$4 sm:$0xff]   ;;  %v1071_v34 = vld [vmem:[%s1988_s1 + $0x5c] ss:$36 sps:$4 sm:$0xff]   ;;  %76 = vperm.xlu1 %1034, %v62_v38  }
   0x9   :  { %301 = vmatpush1.bf16.msra.mxu0 %v1043_v11  ;;  %354 = vmatpush1.bf16.msra.mxu1 %v1044_v12  ;;  %v276_v29 = vsel %vm262_vm0, %v994_v25, 0  ;;  %v282_v30 = vsel %vm262_vm0, %v996_v26, 0  ;;  %v1065_v33 = vld [vmem:[%s1988_s1 + $0xa8] ss:$36 sps:$4 sm:$0xff]   ;;  %v60_v35 = vld [vmem:[%s1990_s2] sm:$0xff]  ;;  %v63_v46 = vld [vmem:[%s1990_s2 + $0x18] sm:$0xff] }
   0xa   :  { %302 = vmatprep.subr.bf16.mxu0 %v1045_v13  ;;  %355 = vmatprep.subr.bf16.mxu1 %v1047_v14  ;;  %v1074_v36 = vld [vmem:[%s1988_s1 + $0x64] ss:$36 sps:$4 sm:$0xff]   ;;  %v1077_v41 = vld [vmem:[%s1988_s1 + $0x14] ss:$36 sps:$4 sm:$0xff]   ;;  %v1080_v42 = vld [vmem:[%s1988_s1 + $0x1c] ss:$36 sps:$4 sm:$0xff]  }
   0xb   :  { %v1068_v37 = vld [vmem:[%s1989_s0 + $0x8] sm:$0xff]   ;;  %66 = vperm.xlu0 %1033, %v60_v35   ;;  %v1072_v40 = vld [vmem:[%s1988_s1 + $0x60] ss:$36 sps:$4 sm:$0xff]   ;;  %v1075_v43 = vld [vmem:[%s1988_s1 + $0x10] ss:$36 sps:$4 sm:$0xff]  }
   0xc   :  { %v1078_v44 = vld [vmem:[%s1988_s1 + $0x18] ss:$36 sps:$4 sm:$0xff]   ;;  %v61_v45 = vld [vmem:[%s1990_s2 + $0x8] sm:$0xff]  ;;  %81 = vperm.xlu1 %1034, %v63_v46   ;;  %v1082_v49 = vld [vmem:[%s1988_s1 + $0xb0] ss:$36 sps:$4 sm:$0xff]  }
   0xd   :  { %303 = vmatpush1.bf16.msra.mxu0 %v1049_v15  ;;  %356 = vmatpush1.bf16.msra.mxu1 %v1050_v16  ;;  %v1081_v47 = vld [vmem:[%s1988_s1 + $0xf8] ss:$0 sps:$4 sm:$0x11]   ;;  %v1083_v50 = vld [vmem:[%s1988_s1 + $0x68] ss:$36 sps:$4 sm:$0xff]  }
   0xe   :  { %304 = vmatprep.subr.bf16.mxu0 %v1051_v17  ;;  %357 = vmatprep.subr.bf16.mxu1 %v1053_v18  ;;  %v288_v48 = vsel %vm262_vm0, %v1081_v47, 0  ;;  %v1084_v51 = vld [vmem:[%s1988_s1 + $0x20] ss:$36 sps:$4 sm:$0xff]  }
   0xf   :  { %71 = vperm.xlu0 %1033, %v61_v45  }
  0x11   :  { %305 = vmatpush1.bf16.msra.mxu0 %v1055_v21  ;;  %358 = vmatpush1.bf16.msra.mxu1 %v1056_v22 }
  0x12   :  { %1005 = vmatprep.subr.msk.bf16.mxu0 %vm262_vm0, %v995_v23  ;;  %1008 = vmatprep.subr.msk.bf16.mxu1 %vm262_vm0, %v997_v24 }
  0x14   :  { %1000 = vmatmul.mubr.msk.bf16.vlgmr.msra.gmra.mxu0 %vm255_vm1, %v1183_v27  ;;  %1003 = vmatmul.mubr.msk.bf16.vlgmr.msra.gmra.mxu1 %vm255_vm1, %v1183_v27 }
  0x15   :  { %405 = vmatpush1.bf16.msra.mxu0 %v276_v29  ;;  %458 = vmatpush1.bf16.msra.mxu1 %v282_v30 }
  0x16   :  { %406 = vmatprep.subr.bf16.mxu0 %v1064_v28  ;;  %459 = vmatprep.subr.bf16.mxu1 %v1067_v31 }
  0x17   :  { %332 = vmatprep.mubr.bf16.mxu0 %v1093_v2  ;;  %385 = vmatprep.mubr.bf16.mxu1 %v1093_v2 }
  0x19   :  { %407 = vmatpush1.bf16.msra.mxu0 %v1062_v32  ;;  %460 = vmatpush1.bf16.msra.mxu1 %v1065_v33 }
  0x1a   :  { %408 = vmatprep.subr.bf16.mxu0 %v1071_v34  ;;  %461 = vmatprep.subr.bf16.mxu1 %v1074_v36 }
  0x1c   :  { %1001 = vmatmul.mubr.msk.bf16.gmra.mxu0 %vm255_vm1, %v1068_v37  ;;  %1004 = vmatmul.mubr.msk.bf16.gmra.mxu1 %vm255_vm1, %v1068_v37 }
  0x1d   :  { %409 = vmatpush1.bf16.msra.mxu0 %v1069_v39  ;;  %462 = vmatpush1.bf16.msra.mxu1 %v1072_v40 }
  0x1e   :  { %410 = vmatprep.subr.bf16.mxu0 %v1077_v41  ;;  %463 = vmatprep.subr.bf16.mxu1 %v1080_v42 }
  0x1f   :  { %428 = vmatprep.mubr.bf16.mxu0 %v1093_v2  ;;  %481 = vmatprep.mubr.bf16.mxu1 %v1093_v2 }
  0x21   :  { %411 = vmatpush1.bf16.msra.mxu0 %v1075_v43  ;;  %464 = vmatpush1.bf16.msra.mxu1 %v1078_v44 }
  0x22   :  { %1031 = vmatprep.subr.msk.bf16.mxu0 %vm262_vm0, %v1081_v47 }
  0x24   :  { %1006 = vmatmul.mubr.msk.bf16.vlgmr.msra.gmra.mxu0 %vm255_vm1, %v1183_v27  ;;  %1009 = vmatmul.mubr.msk.bf16.vlgmr.msra.gmra.mxu1 %vm255_vm1, %v1183_v27 }
  0x25   :  { %1020 = vmatpush3.bf16.msra.mxu0 %v288_v48  ;;  %438 = vmatprep.mubr.bf16.mxu0 %v1093_v2 }
  0x26   :  { %1021 = vmatprep.subr.bf16.mxu0 %v1082_v49  ;;  %491 = vmatprep.mubr.bf16.mxu1 %v1093_v2 }
  0x29   :  { %1022 = vmatpush3.bf16.msra.mxu0 %v1082_v49 }
  0x2a   :  { %1023 = vmatprep.subr.bf16.mxu0 %v1083_v50 }
  0x2c   :  { %1007 = vmatmul.mubr.msk.bf16.gmra.mxu0 %vm255_vm1, %v1068_v37  ;;  %1010 = vmatmul.mubr.msk.bf16.gmra.mxu1 %vm255_vm1, %v1068_v37 }
  0x2d   :  { %1024 = vmatpush3.bf16.msra.mxu0 %v1083_v50  ;;  %1027 = vmatprep.mubr.msk.bf16.mxu0 %vm255_vm1, %v1183_v27 }
  0x2e   :  { %1025 = vmatprep.subr.bf16.mxu0 %v1084_v51 }
  0x31   :  { %1026 = vmatpush3.bf16.msra.mxu0 %v1084_v51 }
  0x34   :  { %1028 = vmatmul.mubr.msk.bf16.vlgmr.msra.gmra.mxu0 %vm255_vm1, %v1068_v37 }
  0x83   :  { %v1280_v62 = vpop.permute.xlu1 %76 }
  0x86   :  { %v1275_v58 = vpop.permute.xlu0 %66 }
  0x87   :  { %v1302_v14 = vpop.permute.xlu1 %81 }
  0x8a   :  { %v1289_v6 = vpop.permute.xlu0 %71 }
  0xd4   :  { %v324_v52 = vpop.f32.mrf.mxu0  ;;  %v377_v53 = vpop.f32.mrf.mxu1 }
  0xd5   :  { %v1283_v63 = vadd.f32 %v324_v52, %v1275_v58  ;;  %v1286_v2 = vadd.f32 %v377_v53, %v1275_v58 }
  0xd6   :  { %v326_v54 = vpop.f32.mrf.mxu0  ;;  %v379_v55 = vpop.f32.mrf.mxu1 }
  0xd7   :  { %v1278_v59 = vadd.f32 %v326_v54, %v1275_v58  ;;  %v551_v7 = vmax.f32 %v1283_v63, 0.0  ;;  %v553_v12 = vmax.f32 %v1286_v2, 0.0  ;;  %v1309_v16 = vadd.f32 %v379_v55, %v1275_v58 }
  0xd8   :  { %v328_v56 = vpop.f32.mrf.mxu0  ;;  %v381_v57 = vpop.f32.mrf.mxu1 }
  0xd9   :  { %v552_v3 = vmax.f32 %v1278_v59, 0.0  ;;  %v1312_v17 = vadd.f32 %v328_v56, %v1289_v6  ;;  %v1322_v23 = vadd.f32 %v381_v57, %v1289_v6  ;;  %v554_v30 = vmax.f32 %v1309_v16, 0.0 }
  0xda   :  { %v330_v60 = vpop.f32.mrf.mxu0  ;;  %v383_v61 = vpop.f32.mrf.mxu1 }
  0xdb   :  { %v1293_v8 = vadd.f32 %v330_v60, %v1289_v6  ;;  %v595_v15 = vadd.f32 %v552_v3, %v551_v7  ;;  %v1997_v32 = vmax.f32 %v1312_v17, 0.0  ;;  %v1995_v40 = vmax.f32 %v1322_v23, 0.0 }
  0xdc   :  { %v334_v0 = vpop.f32.mrf.mxu0  ;;  %v387_v1 = vpop.f32.mrf.mxu1  ;;  %v1354_v42 = vadd.f32 %v383_v61, %v1289_v6 }
  0xdd   :  { %v1300_v13 = vadd.f32 %v334_v0, %v1280_v62  ;;  %v1315_v18 = vadd.f32 %v387_v1, %v1280_v62  ;;  %v1996_v24 = vmax.f32 %v1293_v8, 0.0  ;;  %v596_v31 = vadd.f32 %v595_v15, %v553_v12 }
  0xde   :  { %v336_v4 = vpop.f32.mrf.mxu0  ;;  %v389_v5 = vpop.f32.mrf.mxu1  ;;  %v1994_v57 = vmax.f32 %v1354_v42, 0.0 }
  0xdf   :  { %v1296_v9 = vadd.f32 %v336_v4, %v1280_v62  ;;  %v569_v27 = vmax.f32 %v1300_v13, 0.0  ;;  %v571_v33 = vmax.f32 %v1315_v18, 0.0  ;;  %v1342_v37 = vadd.f32 %v389_v5, %v1280_v62 }
  0xe0   :  { %v338_v10 = vpop.f32.mrf.mxu0  ;;  %v391_v11 = vpop.f32.mrf.mxu1  ;;  %v607_v41 = vadd.f32 %v1996_v24, %v1997_v32  ;;  %v597_v48 = vadd.f32 %v596_v31, %v554_v30 }
  0xe1   :  { %v570_v21 = vmax.f32 %v1296_v9, 0.0  ;;  %v1327_v28 = vadd.f32 %v338_v10, %v1302_v14  ;;  %v1345_v38 = vadd.f32 %v391_v11, %v1302_v14  ;;  %v572_v53 = vmax.f32 %v1342_v37, 0.0 }
  0xe2   :  { %v340_v19 = vpop.f32.mrf.mxu0  ;;  %v393_v20 = vpop.f32.mrf.mxu1  ;;  %v608_v60 = vadd.f32 %v607_v41, %v1995_v40 }
  0xe3   :  { %v1319_v22 = vadd.f32 %v340_v19, %v1302_v14  ;;  %v618_v36 = vadd.f32 %v570_v21, %v569_v27  ;;  %v2002_v45 = vmax.f32 %v1327_v28, 0.0  ;;  %v1364_v49 = vadd.f32 %v393_v20, %v1302_v14 }
  0xe4   :  { %v430_v25 = vpop.f32.mrf.mxu0  ;;  %v483_v26 = vpop.f32.mrf.mxu1  ;;  %v1998_v55 = vmax.f32 %v1345_v38, 0.0  ;;  %v609_v41 = vadd.f32 %v608_v60, %v1994_v57 }
  0xe5   :  { %v1330_v29 = vadd.f32 %v430_v25, %v1275_v58  ;;  %v2001_v39 = vmax.f32 %v1319_v22, 0.0  ;;  %v619_v54 = vadd.f32 %v618_v36, %v571_v33  ;;  %v1381_v61 = vadd.f32 %v483_v26, %v1275_v58 }
  0xe6   :  { %v432_v34 = vpop.f32.mrf.mxu0  ;;  %v485_v35 = vpop.f32.mrf.mxu1  ;;  %v2000_v11 = vmax.f32 %v1364_v49, 0.0 }
  0xe7   :  { %v555_v46 = vmax.f32 %v1330_v29, 0.0  ;;  %v1359_v47 = vadd.f32 %v432_v34, %v1275_v58  ;;  %v629_v56 = vadd.f32 %v2001_v39, %v2002_v45  ;;  %v620_v25 = vadd.f32 %v619_v54, %v572_v53 }
  0xe8   :  { %v434_v43 = vpop.f32.mrf.mxu0  ;;  %v487_v44 = vpop.f32.mrf.mxu1 }
  0xe9   :  { %v1367_v50 = vadd.f32 %v434_v43, %v1289_v6  ;;  %v598_v4 = vadd.f32 %v597_v48, %v555_v46  ;;  %v556_v5 = vmax.f32 %v1359_v47, 0.0  ;;  %v630_v26 = vadd.f32 %v629_v56, %v1998_v55 }
  0xea   :  { %v436_v51 = vpop.f32.mrf.mxu0  ;;  %v489_v52 = vpop.f32.mrf.mxu1  ;;  %v557_v43 = vmax.f32 %v1381_v61, 0.0  ;;  %v1406_v48 = vadd.f32 %v485_v35, %v1275_v58  ;;  %v1430_v55 = vadd.f32 %v487_v44, %v1289_v6 }
  0xeb   :  { %v1999_v15 = vmax.f32 %v1367_v50, 0.0  ;;  %v1392_v19 = vadd.f32 %v436_v51, %v1289_v6  ;;  %v599_v54 = vadd.f32 %v598_v4, %v556_v5  ;;  %v631_v4 = vadd.f32 %v630_v26, %v2000_v11 }
  0xec   :  { %v440_v0 = vpop.f32.mrf.mxu0  ;;  %v493_v1 = vpop.f32.mrf.mxu1 }
  0xed   :  { %v1387_v10 = vadd.f32 %v440_v0, %v1280_v62  ;;  %v610_v60 = vadd.f32 %v609_v41, %v1999_v15  ;;  %v2005_v57 = vmax.f32 %v1392_v19, 0.0  ;;  %v1420_v35 = vadd.f32 %v493_v1, %v1280_v62 }
  0xee   :  { %v442_v20 = vpop.f32.mrf.mxu0  ;;  %v495_v36 = vpop.f32.mrf.mxu1  ;;  %v600_v15 = vadd.f32 %v599_v54, %v557_v43 }
  0xef   :  { %v2006_v31 = vmax.f32 %v1387_v10, 0.0  ;;  %v1400_v34 = vadd.f32 %v442_v20, %v1280_v62  ;;  %v611_v39 = vadd.f32 %v610_v60, %v2005_v57  ;;  %v2008_v44 = vmax.f32 %v1420_v35, 0.0 }
  0xf0   :  { %v444_v51 = vpop.f32.mrf.mxu0  ;;  %v1446_v45 = vadd.f32 %v495_v36, %v1280_v62  ;;  %v2017_v61 = vmax.f32 %v1420_v35, 0.0 }
  0xf1   :  { %v621_v56 = vadd.f32 %v620_v25, %v2006_v31  ;;  %v2003_v0 = vmax.f32 %v1400_v34, 0.0  ;;  %v1414_v20 = vadd.f32 %v444_v51, %v1302_v14  ;;  %v497_v25 = vpop.f32.mrf.mxu1  ;;  %v2010_v51 = vmax.f32 %v1406_v48, 0.0 }
  0xf2   :  { %v446_v40 = vpop.f32.mrf.mxu0  ;;  %v2013_v31 = vmax.f32 %v1446_v45, 0.0  ;;  %v2016_v47 = vmax.f32 %v1400_v34, 0.0  ;;  %v2018_v34 = vmax.f32 %v1327_v28, 0.0  ;;  %v2019_v35 = vmax.f32 %v1446_v45, 0.0 }
  0xf3   :  { %v2004_v24 = vmax.f32 %v1414_v20, 0.0  ;;  %v1426_v32 = vadd.f32 %v446_v40, %v1302_v14  ;;  %v622_v41 = vadd.f32 %v621_v56, %v2003_v0  ;;  %v1449_v56 = vadd.f32 %v497_v25, %v1302_v14  ;;  %v499_v0 = vpop.f32.mrf.mxu1 }
  0xf4   :  { %v1029_v1 = vpop.f32.mrf.mxu0  ;;  %v601_v25 = vadd.f32 %v600_v15, %v2010_v51 }
  0xf5   :  { %v632_v26 = vadd.f32 %v631_v4, %v2004_v24  ;;  %v2007_v11 = vmax.f32 %v1426_v32, 0.0  ;;  %v1440_v40 = vadd.f32 %v1029_v1, %v1280_v62  ;;  %v2009_v1 = vmax.f32 %v1430_v55, 0.0 }
  0xf6   :  { %v536_v54 = vpop.f32.mrf.mxu0  ;;  %v1456_v24 = vadd.f32 %v489_v52, %v1289_v6  ;;  %v623_v60 = vadd.f32 %v622_v41, %v2008_v44  ;;  %v2012_v41 = vmax.f32 %v1449_v56, 0.0 }
  0xf7   :  { %v1452_v4 = vadd.f32 %v536_v54, %v1275_v58  ;;  %v633_v62 = vadd.f32 %v632_v26, %v2007_v11  ;;  %v577_v57 = vmax.f32 %v1440_v40, 0.0  ;;  %v612_v52 = vadd.f32 %v611_v39, %v2009_v1 }
  0xf8   :  { %v1030_v36 = vpop.f32.mrf.mxu0  ;;  %v1474_v26 = vadd.f32 %v499_v0, %v1302_v14  ;;  %v624_v39 = vadd.f32 %v623_v60, %v2013_v31 }
  0xf9   :  { %v2011_v58 = vmax.f32 %v1452_v4, 0.0  ;;  %v1467_v54 = vadd.f32 %v1030_v36, %v1302_v14  ;;  %v567_v36 = vmax.f32 %v1456_v24, 0.0  ;;  %v634_v1 = vadd.f32 %v633_v62, %v2012_v41 }
  0xfa   :  { %v539_v11 = vpop.f32.mrf.mxu0 }
  0xfb   :  { %v1477_v15 = vadd.f32 %v539_v11, %v1289_v6  ;;  %v603_v44 = vsel %vm602_vm2, %v2011_v58, 0.0  ;;  %v586_v14 = vmax.f32 %v1467_v54, 0.0  ;;  %v625_v6 = vsel %vm602_vm2, %v577_v57, 0.0 }
  0xfc   :  { %v604_v51 = vadd.f32 %v603_v44, %v601_v25  ;;  %v613_v11 = vadd.f32 %v612_v52, %v567_v36  ;;  %v585_v58 = vmax.f32 %v1474_v26, 0.0  ;;  %v626_v25 = vadd.f32 %v625_v6, %v624_v39  ;;  %v589_v52 = vld [vmem:[%s1991_s3 + $0x10] sm:$0xff]  ;;  %v588_v39 = vld [vmem:[%s1991_s3 + $0x8] sm:$0xff] }
  0xfd   :  { %v568_v0 = vmax.f32 %v1477_v15, 0.0  ;;  %v636_v41 = vsel %vm602_vm2, %v586_v14, 0.0  ;;  %v2030_v54 = vmax.f32 %v1354_v42, 0.0 }
  0xfe   :  { %605 = vadd.xlane.f32.xlu0 %v604_v51  ;;  %v635_v44 = vadd.f32 %v634_v1, %v585_v58  ;;  %v587_v51 = vld [vmem:[%s1991_s3] sm:$0xff]  ;;  %v590_v1 = vld [vmem:[%s1991_s3 + $0x18] sm:$0xff] }
  0xff   :  { %v614_v60 = vsel %vm602_vm2, %v568_v0, 0.0 }
 0x100   :  { %v615_v62 = vadd.f32 %v614_v60, %v613_v11  ;;  %v637_v31 = vadd.f32 %v636_v41, %v635_v44  ;;  %v591_v41 = vld [vmem:[%s1992_s4] sm:$0xff] }
 0x102   :  { %616 = vadd.xlane.f32.xlu1 %v615_v62  ;;  %627 = vadd.xlane.f32.xlu0 %v626_v25 }
 0x106   :  { %638 = vadd.xlane.f32.xlu0 %v637_v31  ;;  %v592_v31 = vld [vmem:[%s1992_s4 + $0x8] sm:$0xff] }
 0x113   :  { %811 = vperm.xlu1 %1034, %v587_v51  }
 0x117   :  { %821 = vperm.xlu1 %1034, %v589_v52  }
 0x11b   :  { %826 = vperm.xlu1 %1034, %v590_v1  }
 0x11c   :  { %816 = vperm.xlu0 %1033, %v588_v39   ;;  %v2015_v39 = vmax.f32 %v1387_v10, 0.0 }
 0x11f   :  { %872 = vperm.xlu1 %1034, %v592_v31  }
 0x120   :  { %867 = vperm.xlu0 %1033, %v591_v41  }
 0x187   :  { %v606_v6 = vpop.xlane.xlu0 %605 }
 0x188   :  { %v641_v11 = vmul.f32 0.0009451796, %v606_v6 }
 0x18a   :  { %v1523_v44 = vsub.f32 %v551_v7, %v641_v11  ;;  %v1527_v62 = vsub.f32 %v552_v3, %v641_v11  ;;  %v1543_v59 = vsub.f32 %v553_v12, %v641_v11  ;;  %v1547_v3 = vsub.f32 %v554_v30, %v641_v11 }
 0x18b   :  { %v628_v60 = vpop.xlane.xlu0 %627  ;;  %v617_v63 = vpop.xlane.xlu1 %616  ;;  %v1565_v16 = vsub.f32 %v555_v46, %v641_v11  ;;  %v1573_v30 = vsub.f32 %v557_v43, %v641_v11 }
 0x18c   :  { %v643_v25 = vmul.f32 0.0009451796, %v628_v60  ;;  %v681_v13 = vmul.f32 %v1523_v44, %v1523_v44  ;;  %v682_v9 = vmul.f32 %v1527_v62, %v1527_v62  ;;  %v683_v10 = vmul.f32 %v1543_v59, %v1543_v59 }
 0x18d   :  { %v685_v45 = vmul.f32 %v1565_v16, %v1565_v16 }
 0x18e   :  { %v1531_v51 = vsub.f32 %v569_v27, %v643_v25  ;;  %v1535_v52 = vsub.f32 %v570_v21, %v643_v25  ;;  %v1539_v1 = vsub.f32 %v571_v33, %v643_v25  ;;  %v1557_v18 = vsub.f32 %v572_v53, %v643_v25 }
 0x18f   :  { %v639_v7 = vpop.xlane.xlu0 %638  ;;  %v1569_v27 = vsub.f32 %v556_v5, %v641_v11  ;;  %v2014_v33 = vmax.f32 %v1406_v48, 0.0  ;;  %v1579_v53 = vmul.f32 0.0009451796, %v617_v63  ;;  %v1583_v31 = vsub.f32 %v2015_v39, %v643_v25 }
 0x190   :  { %v1553_v21 = vmul.f32 0.0009451796, %v639_v7  ;;  %v699_v2 = vmul.f32 %v1531_v51, %v1531_v51  ;;  %v700_v12 = vmul.f32 %v1535_v52, %v1535_v52  ;;  %v701_v29 = vmul.f32 %v1539_v1, %v1539_v1 }
 0x191   :  { %v1577_v37 = vsub.f32 %v2014_v33, %v641_v11  ;;  %v1589_v5 = vsub.f32 %v2016_v47, %v643_v25  ;;  %v1593_v43 = vsub.f32 %v2017_v61, %v643_v25  ;;  %v1597_v48 = vsub.f32 %v577_v57, %v643_v25 }
 0x192   :  { %v739_v46 = vadd.f32 %v700_v12, %v699_v2  ;;  %v702_v41 = vmul.f32 %v1557_v18, %v1557_v18  ;;  %v717_v60 = vadd.f32 %v682_v9, %v681_v13  ;;  %v1606_v63 = vsub.f32 %v2018_v34, %v1553_v21 }
 0x193   :  { %v1610_v7 = vsub.f32 %v2019_v35, %v643_v25  ;;  %v2020_v57 = vmax.f32 %v1452_v4, 0.0  ;;  %v684_v2 = vmul.f32 %v1547_v3, %v1547_v3  ;;  %v2021_v12 = vmax.f32 %v1319_v22, 0.0 }
 0x194   :  { %v740_v6 = vadd.f32 %v739_v46, %v701_v29  ;;  %v703_v28 = vmul.f32 %v1583_v31, %v1583_v31  ;;  %v718_v25 = vadd.f32 %v717_v60, %v683_v10  ;;  %v704_v4 = vmul.f32 %v1589_v5, %v1589_v5 }
 0x195   :  { %v1614_v40 = vsub.f32 %v2020_v57, %v641_v11  ;;  %v1621_v13 = vsub.f32 %v2021_v12, %v1553_v21  ;;  %v705_v11 = vmul.f32 %v1593_v43, %v1593_v43  ;;  %v2022_v33 = vmax.f32 %v1345_v38, 0.0 }
 0x196   :  { %v741_v9 = vadd.f32 %v740_v6, %v702_v41  ;;  %v708_v39 = vmul.f32 %v1606_v63, %v1606_v63  ;;  %v707_v29 = vmul.f32 %v1597_v48, %v1597_v48  ;;  %v719_v47 = vadd.f32 %v718_v25, %v684_v2 }
 0x197   :  { %v1634_v22 = vsub.f32 %v2022_v33, %v1553_v21  ;;  %v709_v61 = vmul.f32 %v1621_v13, %v1621_v13  ;;  %v706_v10 = vmul.f32 %v1610_v7, %v1610_v7  ;;  %v686_v41 = vmul.f32 %v1569_v27, %v1569_v27 }
 0x198   :  { %v742_v46 = vadd.f32 %v741_v9, %v703_v28  ;;  %v687_v38 = vmul.f32 %v1573_v30, %v1573_v30  ;;  %v2023_v6 = vmax.f32 %v1364_v49, 0.0  ;;  %v688_v35 = vmul.f32 %v1577_v37, %v1577_v37 }
 0x199   :  { %v720_v57 = vadd.f32 %v719_v47, %v685_v45  ;;  %v2024_v2 = vmax.f32 %v1414_v20, 0.0  ;;  %v710_v28 = vmul.f32 %v1634_v22, %v1634_v22  ;;  %v750_v9 = vadd.f32 %v709_v61, %v708_v39 }
 0x19a   :  { %v1651_v60 = vsub.f32 %v2023_v6, %v1553_v21  ;;  %v743_v34 = vadd.f32 %v742_v46, %v704_v4  ;;  %v2025_v25 = vmax.f32 %v1312_v17, 0.0  ;;  %v2026_v4 = vmax.f32 %v1293_v8, 0.0 }
 0x19b   :  { %v1658_v12 = vsub.f32 %v2024_v2, %v1553_v21  ;;  %v746_v46 = vsel %vm602_vm2, %v707_v29, 0.0  ;;  %v689_v20 = vmul.f32 %v1614_v40, %v1614_v40  ;;  %v721_v47 = vadd.f32 %v720_v57, %v686_v41 }
 0x19c   :  { %v1665_v49 = vsub.f32 %v2025_v25, %v1579_v53  ;;  %v1670_v33 = vsub.f32 %v2026_v4, %v1579_v53  ;;  %v744_v45 = vadd.f32 %v743_v34, %v705_v11  ;;  %v2027_v39 = vmax.f32 %v1426_v32, 0.0 }
 0x19d   :  { %v2028_v17 = vmax.f32 %v1449_v56, 0.0  ;;  %v711_v8 = vmul.f32 %v1651_v60, %v1651_v60  ;;  %v751_v11 = vadd.f32 %v750_v9, %v710_v28  ;;  %v722_v29 = vadd.f32 %v721_v47, %v687_v38 }
 0x19e   :  { %v1678_v61 = vsub.f32 %v2027_v39, %v1553_v21  ;;  %v745_v34 = vadd.f32 %v744_v45, %v706_v10  ;;  %v1690_v41 = vsub.f32 %v586_v14, %v1553_v21  ;;  %v2029_v32 = vmax.f32 %v1322_v23, 0.0 }
 0x19f   :  { %v1683_v6 = vsub.f32 %v2028_v17, %v1553_v21  ;;  %v712_v56 = vmul.f32 %v1658_v12, %v1658_v12  ;;  %v752_v2 = vadd.f32 %v751_v11, %v711_v8  ;;  %v690_v25 = vmul.f32 %v1665_v49, %v1665_v49 }
 0x1a0   :  { %v1695_v57 = vsub.f32 %v2029_v32, %v1579_v53  ;;  %v691_v10 = vmul.f32 %v1670_v33, %v1670_v33  ;;  %v747_v38 = vadd.f32 %v746_v46, %v745_v34  ;;  %v723_v28 = vadd.f32 %v722_v29, %v688_v35 }
 0x1a1   :  { %v1706_v14 = vsub.f32 %v2030_v54, %v1579_v53  ;;  %v1711_v23 = vsub.f32 %v585_v58, %v1553_v21  ;;  %v713_v9 = vmul.f32 %v1678_v61, %v1678_v61  ;;  %v753_v4 = vadd.f32 %v752_v2, %v712_v56 }
 0x1a2   :  { %748 = vadd.xlane.f32.xlu1 %v747_v38  ;;  %v2031_v45 = vmax.f32 %v1367_v50, 0.0  ;;  %v692_v42 = vmul.f32 %v1695_v57, %v1695_v57  ;;  %v728_v35 = vadd.f32 %v691_v10, %v690_v25  ;;  %v724_v47 = vsel %vm602_vm2, %v689_v20, 0.0 }
 0x1a3   :  { %v714_v58 = vmul.f32 %v1683_v6, %v1683_v6  ;;  %v716_v26 = vmul.f32 %v1690_v41, %v1690_v41  ;;  %v754_v21 = vadd.f32 %v753_v4, %v713_v9  ;;  %v725_v39 = vadd.f32 %v724_v47, %v723_v28  ;;  %v812_v47 = vpop.permute.xlu1 %811 }
 0x1a4   :  { %v1718_v46 = vsub.f32 %v2031_v45, %v1579_v53  ;;  %v2032_v17 = vmax.f32 %v1392_v19, 0.0  ;;  %v693_v8 = vmul.f32 %v1706_v14, %v1706_v14  ;;  %v729_v11 = vadd.f32 %v728_v35, %v692_v42  ;;  %v594_v42 = vld [vmem:[%s1992_s4 + $0x18] sm:$0xff]  ;;  %v593_v35 = vld [vmem:[%s1992_s4 + $0x10] sm:$0xff] }
 0x1a5   :  { %v715_v20 = vmul.f32 %v1711_v23, %v1711_v23  ;;  %v755_v34 = vadd.f32 %v754_v21, %v714_v58  ;;  %v2033_v29 = vmax.f32 %v1430_v55, 0.0  ;;  %v1746_v25 = vsub.f32 %v568_v0, %v1579_v53 }
 0x1a6   :  { %v1730_v50 = vsub.f32 %v2032_v17, %v1579_v53  ;;  %726 = vadd.xlane.f32.xlu1 %v725_v39  ;;  %v694_v56 = vmul.f32 %v1718_v46, %v1718_v46  ;;  %v730_v19 = vadd.f32 %v729_v11, %v693_v8  ;;  %v757_v10 = vsel %vm602_vm2, %v716_v26, 0.0  ;;  %v1775_v39 = vpop.permute.xlu0 %816 }
 0x1a7   :  { %v1739_v32 = vsub.f32 %v2033_v29, %v1579_v53  ;;  %v756_v2 = vadd.f32 %v755_v34, %v715_v20  ;;  %v1752_v38 = vsub.f32 %v567_v36, %v1579_v53  ;;  %v698_v15 = vmul.f32 %v1746_v25, %v1746_v25  ;;  %v1769_v58 = vpop.permute.xlu1 %821 }
 0x1a8   :  { %v695_v55 = vmul.f32 %v1730_v50, %v1730_v50  ;;  %v731_v28 = vadd.f32 %v730_v19, %v694_v56 }
 0x1a9   :  { %v758_v54 = vadd.f32 %v757_v10, %v756_v2  ;;  %v696_v9 = vmul.f32 %v1739_v32, %v1739_v32  ;;  %v697_v0 = vmul.f32 %v1752_v38, %v1752_v38  ;;  %v735_v36 = vsel %vm602_vm2, %v698_v15, 0.0 }
 0x1aa   :  { %v732_v4 = vadd.f32 %v731_v28, %v695_v55  ;;  %v868_v34 = vpop.permute.xlu0 %867 }
 0x1ab   :  { %759 = vadd.xlane.f32.xlu0 %v758_v54  ;;  %v1771_v26 = vpop.permute.xlu1 %826 }
 0x1ac   :  { %v733_v45 = vadd.f32 %v732_v4, %v696_v9 }
 0x1ae   :  { %v734_v24 = vadd.f32 %v733_v45, %v697_v0 }
 0x1af   :  { %v1773_v21 = vpop.permute.xlu1 %872 }
 0x1b0   :  { %v736_v53 = vadd.f32 %v735_v36, %v734_v24 }
 0x1b2   :  { %737 = vadd.xlane.f32.xlu0 %v736_v53 }
 0x1b7   :  { %882 = vperm.xlu1 %1034, %v594_v42  }
 0x1c8   :  { %877 = vperm.xlu0 %1033, %v593_v35  }
 0x22b   :  { %v749_v17 = vpop.xlane.xlu1 %748 }
 0x22c   :  { %v763_v8 = vmul.f32 0.0009451796, %v749_v17 }
 0x22e   :  { %v767_v11 = vadd.f32 1e-05, %v763_v8 }
 0x22f   :  { %v727_v20 = vpop.xlane.xlu1 %726 }
 0x230   :  { %1085 = vrsqrt.f32 %v767_v11  ;;  %v761_v29 = vmul.f32 0.0009451796, %v727_v20 }
 0x232   :  { %v765_v56 = vadd.f32 1e-05, %v761_v29 }
 0x234   :  { %1087 = vrsqrt.f32 %v765_v56  ;;  %v760_v19 = vpop.xlane.xlu0 %759 }
 0x235   :  { %v764_v2 = vmul.f32 0.0009451796, %v760_v19 }
 0x237   :  { %v768_v10 = vadd.f32 1e-05, %v764_v2 }
 0x239   :  { %1089 = vrsqrt.f32 %v768_v10 }
 0x23b   :  { %v738_v55 = vpop.xlane.xlu0 %737 }
 0x23c   :  { %v762_v28 = vmul.f32 0.0009451796, %v738_v55 }
 0x23d   :  { %v1086_v54 = vpop.eup %1085 }
 0x23e   :  { %v766_v9 = vadd.f32 1e-05, %v762_v28  ;;  %v791_v4 = vmul.f32 %v1086_v54, %v1531_v51  ;;  %v792_v15 = vmul.f32 %v1086_v54, %v1535_v52  ;;  %v793_v0 = vmul.f32 %v1086_v54, %v1539_v1 }
 0x23f   :  { %v794_v45 = vmul.f32 %v1086_v54, %v1557_v18  ;;  %v795_v24 = vmul.f32 %v1086_v54, %v1583_v31  ;;  %v1783_v36 = vmul.f32 %v1086_v54, %v1589_v5  ;;  %v1786_v53 = vmul.f32 %v1086_v54, %v1593_v43 }
 0x240   :  { %1091 = vrsqrt.f32 %v766_v9  ;;  %v1789_v42 = vmul.f32 %v1086_v54, %v1610_v7  ;;  %v1792_v51 = vmul.f32 %v1086_v54, %v1597_v48  ;;  %v1795_v52 = vmul.f32 %v1769_v58, %v791_v4 }
 0x241   :  { %v1088_v1 = vpop.eup %1087  ;;  %v1798_v18 = vmul.f32 %v1769_v58, %v792_v15  ;;  %v1801_v31 = vmul.f32 %v1769_v58, %v793_v0  ;;  %v1804_v5 = vmul.f32 %v1769_v58, %v794_v45  ;;  %v1807_v43 = vmul.f32 %v1769_v58, %v795_v24 }
 0x242   :  { %v773_v7 = vmul.f32 %v1088_v1, %v1523_v44  ;;  %v774_v48 = vmul.f32 %v1088_v1, %v1527_v62  ;;  %v775_v35 = vmul.f32 %v1088_v1, %v1543_v59  ;;  %v776_v17 = vmul.f32 %v1088_v1, %v1547_v3 }
 0x243   :  { %v777_v8 = vmul.f32 %v1088_v1, %v1565_v16  ;;  %v778_v11 = vmul.f32 %v1088_v1, %v1569_v27  ;;  %v779_v20 = vmul.f32 %v1088_v1, %v1573_v30  ;;  %v780_v29 = vmul.f32 %v1088_v1, %v1577_v37 }
 0x244   :  { %v781_v56 = vmul.f32 %v1088_v1, %v1614_v40  ;;  %v829_v19 = vmul.f32 %v812_v47, %v773_v7  ;;  %v830_v2 = vmul.f32 %v812_v47, %v774_v48  ;;  %v831_v10 = vmul.f32 %v812_v47, %v775_v35 }
 0x245   :  { %v832_v44 = vmul.f32 %v812_v47, %v776_v17  ;;  %v833_v55 = vmul.f32 %v812_v47, %v777_v8  ;;  %v834_v62 = vmul.f32 %v812_v47, %v778_v11  ;;  %v835_v28 = vmul.f32 %v812_v47, %v779_v20  ;;  %v883_v17 = vpop.permute.xlu1 %882 }
 0x246   :  { %v1090_v59 = vpop.eup %1089  ;;  %v836_v54 = vmul.f32 %v812_v47, %v780_v29  ;;  %v837_v3 = vmul.f32 %v812_v47, %v781_v56  ;;  %v885_v9 = vadd.f32 %v868_v34, %v829_v19  ;;  %v886_v16 = vadd.f32 %v868_v34, %v830_v2 }
 0x247   :  { %v887_v4 = vadd.f32 %v868_v34, %v831_v10  ;;  %v888_v27 = vadd.f32 %v868_v34, %v832_v44  ;;  %v889_v15 = vadd.f32 %v868_v34, %v833_v55  ;;  %v890_v30 = vadd.f32 %v868_v34, %v834_v62 }
 0x248   :  { %v891_v0 = vadd.f32 %v868_v34, %v835_v28  ;;  %v892_v37 = vadd.f32 %v868_v34, %v836_v54  ;;  %v893_v45 = vadd.f32 %v868_v34, %v837_v3  ;;  %921 = vst [vmem:[%s1993_s5] sm:$0xff] %v885_v9  ;;  %922 = vst [vmem:[%s1993_s5 + $0x8] sm:$0xff] %v886_v16 }
 0x249   :  { %v800_v40 = vmul.f32 %v1090_v59, %v1606_v63  ;;  %923 = vst [vmem:[%s1993_s5 + $0x10] sm:$0xff] %v887_v4  ;;  %924 = vst [vmem:[%s1993_s5 + $0x18] sm:$0xff] %v888_v27  ;;  %v801_v47 = vmul.f32 %v1090_v59, %v1621_v13  ;;  %v802_v63 = vmul.f32 %v1090_v59, %v1634_v22 }
 0x24a   :  { %925 = vst [vmem:[%s1993_s5 + $0x20] sm:$0xff] %v889_v15  ;;  %926 = vst [vmem:[%s1993_s5 + $0x28] sm:$0xff] %v890_v30  ;;  %v803_v34 = vmul.f32 %v1090_v59, %v1651_v60  ;;  %v804_v24 = vmul.f32 %v1090_v59, %v1658_v12  ;;  %v805_v13 = vmul.f32 %v1090_v59, %v1678_v61 }
 0x24b   :  { %927 = vst [vmem:[%s1993_s5 + $0x30] sm:$0xff] %v891_v0  ;;  %928 = vst [vmem:[%s1993_s5 + $0x38] sm:$0xff] %v892_v37  ;;  %v806_v22 = vmul.f32 %v1090_v59, %v1683_v6  ;;  %v807_v60 = vmul.f32 %v1090_v59, %v1711_v23  ;;  %v808_v12 = vmul.f32 %v1090_v59, %v1690_v41 }
 0x24c   :  { %929 = vst.msk [vmem:[%s1993_s5 + $0x40] sm:$0xff] %vm602_vm2, %v893_v45  ;;  %v856_v1 = vmul.f32 %v1771_v26, %v800_v40  ;;  %v857_v7 = vmul.f32 %v1771_v26, %v801_v47  ;;  %v858_v48 = vmul.f32 %v1771_v26, %v802_v63  ;;  %v859_v35 = vmul.f32 %v1771_v26, %v803_v34 }
 0x24d   :  { %v860_v8 = vmul.f32 %v1771_v26, %v804_v24  ;;  %v861_v11 = vmul.f32 %v1771_v26, %v805_v13  ;;  %v862_v61 = vmul.f32 %v1771_v26, %v806_v22  ;;  %v863_v6 = vmul.f32 %v1771_v26, %v807_v60  ;;  %v1092_v23 = vpop.eup %1091  ;;  %v878_v13 = vpop.permute.xlu0 %877 }
 0x24e   :  { %v864_v41 = vmul.f32 %v1771_v26, %v808_v12  ;;  %v912_v20 = vadd.f32 %v883_v17, %v856_v1  ;;  %v913_v29 = vadd.f32 %v883_v17, %v857_v7  ;;  %v914_v56 = vadd.f32 %v883_v17, %v858_v48 }
 0x24f   :  { %v915_v19 = vadd.f32 %v883_v17, %v859_v35  ;;  %v916_v2 = vadd.f32 %v883_v17, %v860_v8  ;;  %v917_v10 = vadd.f32 %v883_v17, %v861_v11  ;;  %v918_v44 = vadd.f32 %v883_v17, %v862_v61 }
 0x250   :  { %v919_v55 = vadd.f32 %v883_v17, %v863_v6  ;;  %v920_v62 = vadd.f32 %v883_v17, %v864_v41  ;;  %948 = vst [vmem:[%s1993_s5 + $0xd8] sm:$0xff] %v912_v20  ;;  %949 = vst [vmem:[%s1993_s5 + $0xe0] sm:$0xff] %v913_v29  ;;  %v782_v26 = vmul.f32 %v1092_v23, %v1665_v49 }
 0x251   :  { %950 = vst [vmem:[%s1993_s5 + $0xe8] sm:$0xff] %v914_v56  ;;  %v783_v28 = vmul.f32 %v1092_v23, %v1670_v33  ;;  %951 = vst [vmem:[%s1993_s5 + $0xf0] sm:$0xff] %v915_v19  ;;  %v784_v49 = vmul.f32 %v1092_v23, %v1695_v57  ;;  %v785_v33 = vmul.f32 %v1092_v23, %v1706_v14 }
 0x252   :  { %952 = vst [vmem:[%s1993_s5 + $0xf8] sm:$0xff] %v916_v2  ;;  %953 = vst [vmem:[%s1993_s5 + $0x100] sm:$0xff] %v917_v10  ;;  %v786_v59 = vmul.f32 %v1092_v23, %v1718_v46  ;;  %v787_v54 = vmul.f32 %v1092_v23, %v1730_v50  ;;  %v788_v3 = vmul.f32 %v1092_v23, %v1739_v32 }
 0x253   :  { %954 = vst [vmem:[%s1993_s5 + $0x108] sm:$0xff] %v918_v44  ;;  %955 = vst [vmem:[%s1993_s5 + $0x110] sm:$0xff] %v919_v55  ;;  %v789_v9 = vmul.f32 %v1092_v23, %v1752_v38  ;;  %v790_v57 = vmul.f32 %v1092_v23, %v1746_v25  ;;  %v838_v14 = vmul.f32 %v1775_v39, %v782_v26 }
 0x254   :  { %956 = vst.msk [vmem:[%s1993_s5 + $0x118] sm:$0xff] %vm602_vm2, %v920_v62  ;;  %v839_v46 = vmul.f32 %v1775_v39, %v783_v28  ;;  %v840_v50 = vmul.f32 %v1775_v39, %v784_v49  ;;  %v841_v16 = vmul.f32 %v1775_v39, %v785_v33  ;;  %v842_v4 = vmul.f32 %v1775_v39, %v786_v59 }
 0x255   :  { %v843_v27 = vmul.f32 %v1775_v39, %v787_v54  ;;  %v844_v15 = vmul.f32 %v1775_v39, %v788_v3  ;;  %v845_v32 = vmul.f32 %v1775_v39, %v789_v9  ;;  %v846_v38 = vmul.f32 %v1775_v39, %v790_v57 }
 0x256   :  { %v894_v25 = vadd.f32 %v1773_v21, %v838_v14  ;;  %v895_v30 = vadd.f32 %v1773_v21, %v839_v46  ;;  %v896_v0 = vadd.f32 %v1773_v21, %v840_v50  ;;  %v897_v37 = vadd.f32 %v1773_v21, %v841_v16 }
 0x257   :  { %v898_v45 = vadd.f32 %v1773_v21, %v842_v4  ;;  %v899_v40 = vadd.f32 %v1773_v21, %v843_v27  ;;  %v900_v47 = vadd.f32 %v1773_v21, %v844_v15  ;;  %v901_v63 = vadd.f32 %v1773_v21, %v845_v32 }
 0x258   :  { %v902_v34 = vadd.f32 %v1773_v21, %v846_v38  ;;  %930 = vst [vmem:[%s1993_s5 + $0x48] sm:$0xff] %v894_v25  ;;  %931 = vst [vmem:[%s1993_s5 + $0x50] sm:$0xff] %v895_v30  ;;  %v852_v39 = vmul.f32 %v1769_v58, %v1783_v36  ;;  %v853_v21 = vmul.f32 %v1769_v58, %v1786_v53 }
 0x259   :  { %932 = vst [vmem:[%s1993_s5 + $0x58] sm:$0xff] %v896_v0  ;;  %933 = vst [vmem:[%s1993_s5 + $0x60] sm:$0xff] %v897_v37  ;;  %v854_v24 = vmul.f32 %v1769_v58, %v1789_v42  ;;  %v855_v36 = vmul.f32 %v1769_v58, %v1792_v51  ;;  %v903_v53 = vadd.f32 %v878_v13, %v1795_v52 }
 0x25a   :  { %934 = vst [vmem:[%s1993_s5 + $0x68] sm:$0xff] %v898_v45  ;;  %935 = vst [vmem:[%s1993_s5 + $0x70] sm:$0xff] %v899_v40  ;;  %v904_v42 = vadd.f32 %v878_v13, %v1798_v18  ;;  %v905_v22 = vadd.f32 %v878_v13, %v1801_v31  ;;  %v906_v60 = vadd.f32 %v878_v13, %v1804_v5 }
 0x25b   :  { %936 = vst [vmem:[%s1993_s5 + $0x78] sm:$0xff] %v900_v47  ;;  %937 = vst [vmem:[%s1993_s5 + $0x80] sm:$0xff] %v901_v63  ;;  %v907_v12 = vadd.f32 %v878_v13, %v1807_v43  ;;  %v908_v1 = vadd.f32 %v878_v13, %v852_v39  ;;  %v909_v7 = vadd.f32 %v878_v13, %v853_v21 }
 0x25c   :  { %938 = vst.msk [vmem:[%s1993_s5 + $0x88] sm:$0xff] %vm602_vm2, %v902_v34  ;;  %v910_v48 = vadd.f32 %v878_v13, %v854_v24  ;;  %v911_v35 = vadd.f32 %v878_v13, %v855_v36  ;;  %939 = vst [vmem:[%s1993_s5 + $0x90] sm:$0xff] %v903_v53 }
 0x25d   :  { %940 = vst [vmem:[%s1993_s5 + $0x98] sm:$0xff] %v904_v42  ;;  %941 = vst [vmem:[%s1993_s5 + $0xa0] sm:$0xff] %v905_v22 }
 0x25e   :  { %942 = vst [vmem:[%s1993_s5 + $0xa8] sm:$0xff] %v906_v60  ;;  %943 = vst [vmem:[%s1993_s5 + $0xb0] sm:$0xff] %v907_v12 }
 0x25f   :  { %944 = vst [vmem:[%s1993_s5 + $0xb8] sm:$0xff] %v908_v1  ;;  %945 = vst [vmem:[%s1993_s5 + $0xc0] sm:$0xff] %v909_v7 }
 0x260   :  { %946 = vst [vmem:[%s1993_s5 + $0xc8] sm:$0xff] %v910_v48  ;;  %947 = vst.msk [vmem:[%s1993_s5 + $0xd0] sm:$0xff] %vm602_vm2, %v911_v35 }

// kernel: auto_enc_forward.7
= control target key start
LH: loop header
LB: loop body
LE: loop exit
PB: predicated region body
PF: predicated region fallthrough
CT: control target
= control target key end

     0   :  { %v2463_v1 = vmov 0   ;;  %vm679_vm0 = vcmask 261120   ;;  %vm863_vm1 = vcmask 588800   ;;  %vm1634_vm2 = vcmask 1043456   ;;  %s3327_s1 = inlined_call_operand.vmem [shape: bf16[800,200], index: 1, kind: input, shape index: {}]   ;;  %s3328_s0 = inlined_call_operand.vmem [shape: bf16[16,800], index: 0, kind: input, shape index: {}]   ;;  %s3329_s2 = inlined_call_operand.vmem [shape: f32[16,1], index: 2, kind: input, shape index: {}]   ;;  %s3330_s3 = inlined_call_operand.vmem [shape: f32[16,1], index: 3, kind: input, shape index: {}]   ;;  %s3331_s4 = inlined_call_operand.vmem [shape: f32[16,1], index: 4, kind: input, shape index: {}]   ;;  %s3332_s5 = inlined_call_operand.vmem [shape: bf16[200,1152], index: 5, kind: input, shape index: {}]   ;;  %s3333_s6 = inlined_call_operand.vmem [shape: f32[16,1152], index: 6, kind: output, shape index: {}]  }
   0x1   :  { %v2134_v0 = vld [vmem:[%s3327_s1 + $0x74] ss:$8 sps:$4 sm:$0xff]   ;;  %2132 = vset.pattern.permute.xlu0 %v2463_v1  ;;  %2133 = vset.pattern.permute.xlu1 %v2463_v1  ;;  %v2136_v2 = vld [vmem:[%s3327_s1 + $0x70] ss:$8 sps:$4 sm:$0xff]   ;;  %v2140_v5 = vld [vmem:[%s3327_s1 + $0x64] ss:$8 sps:$4 sm:$0xff]  }
   0x2   :  { %683 = vmatprep.subr.bf16.mxu0 %v2134_v0  ;;  %v2137_v3 = vld [vmem:[%s3327_s1 + $0x174] ss:$8 sps:$4 sm:$0xff]   ;;  %v2139_v4 = vld [vmem:[%s3327_s1 + $0x170] ss:$8 sps:$4 sm:$0xff]   ;;  %v2142_v6 = vld [vmem:[%s3327_s1 + $0x60] ss:$8 sps:$4 sm:$0xff]  }
   0x3   :  { %684 = vmatpush1.bf16.msra.mxu0 %v2136_v2  ;;  %726 = vmatprep.subr.bf16.mxu1 %v2137_v3  ;;  %v2143_v7 = vld [vmem:[%s3327_s1 + $0x164] ss:$8 sps:$4 sm:$0xff]   ;;  %v2145_v8 = vld [vmem:[%s3327_s1 + $0x160] ss:$8 sps:$4 sm:$0xff]   ;;  %v2146_v9 = vld [vmem:[%s3327_s1 + $0x54] ss:$8 sps:$4 sm:$0xff]  }
   0x4   :  { %727 = vmatpush1.bf16.msra.mxu1 %v2139_v4  ;;  %685 = vmatprep.subr.bf16.mxu0 %v2140_v5  ;;  %v2148_v10 = vld [vmem:[%s3327_s1 + $0x50] ss:$8 sps:$4 sm:$0xff]   ;;  %v2149_v11 = vld [vmem:[%s3327_s1 + $0x154] ss:$8 sps:$4 sm:$0xff]   ;;  %v2152_v12 = vld [vmem:[%s3327_s1 + $0x44] ss:$8 sps:$4 sm:$0xff]  }
   0x5   :  { %728 = vmatprep.subr.bf16.mxu1 %v2143_v7  ;;  %v2151_v13 = vld [vmem:[%s3327_s1 + $0x150] ss:$8 sps:$4 sm:$0xff]   ;;  %v2155_v14 = vld [vmem:[%s3327_s1 + $0x144] ss:$8 sps:$4 sm:$0xff]   ;;  %v2154_v15 = vld [vmem:[%s3327_s1 + $0x40] ss:$8 sps:$4 sm:$0xff]  }
   0x6   :  { %v2158_v16 = vld [vmem:[%s3327_s1 + $0x34] ss:$8 sps:$4 sm:$0xff]   ;;  %v2157_v17 = vld [vmem:[%s3327_s1 + $0x140] ss:$8 sps:$4 sm:$0xff]   ;;  %v2160_v19 = vld [vmem:[%s3327_s1 + $0x30] ss:$8 sps:$4 sm:$0xff]  }
   0x7   :  { %686 = vmatpush1.bf16.msra.mxu0 %v2142_v6  ;;  %v2161_v18 = vld [vmem:[%s3327_s1 + $0x134] ss:$8 sps:$4 sm:$0xff]   ;;  %v2164_v20 = vld [vmem:[%s3327_s1 + $0x24] ss:$8 sps:$4 sm:$0xff]   ;;  %v2163_v21 = vld [vmem:[%s3327_s1 + $0x130] ss:$8 sps:$4 sm:$0xff]  }
   0x8   :  { %687 = vmatprep.subr.bf16.mxu0 %v2146_v9  ;;  %729 = vmatpush1.bf16.msra.mxu1 %v2145_v8  ;;  %v2167_v22 = vld [vmem:[%s3327_s1 + $0x124] ss:$8 sps:$4 sm:$0xff]   ;;  %v2166_v23 = vld [vmem:[%s3327_s1 + $0x20] ss:$8 sps:$4 sm:$0xff]   ;;  %v2170_v24 = vld [vmem:[%s3327_s1 + $0x14] ss:$8 sps:$4 sm:$0xff]  }
   0x9   :  { %730 = vmatprep.subr.bf16.mxu1 %v2149_v11  ;;  %v2169_v25 = vld [vmem:[%s3327_s1 + $0x120] ss:$8 sps:$4 sm:$0xff]   ;;  %v2173_v26 = vld [vmem:[%s3327_s1 + $0x114] ss:$8 sps:$4 sm:$0xff]   ;;  %v2172_v27 = vld [vmem:[%s3327_s1 + $0x10] ss:$8 sps:$4 sm:$0xff]  }
   0xa   :  { %v2176_v28 = vld [vmem:[%s3327_s1 + $0x4] ss:$8 sps:$4 sm:$0xff]   ;;  %v2175_v29 = vld [vmem:[%s3327_s1 + $0x110] ss:$8 sps:$4 sm:$0xff]   ;;  %v2178_v31 = vld [vmem:[%s3327_s1] ss:$8 sps:$4 sm:$0xff]  }
   0xb   :  { %688 = vmatpush1.bf16.msra.mxu0 %v2148_v10  ;;  %v2179_v30 = vld [vmem:[%s3327_s1 + $0x104] ss:$8 sps:$4 sm:$0xff]   ;;  %v2182_v32 = vld [vmem:[%s3327_s1 + $0xf4] ss:$8 sps:$4 sm:$0xff]   ;;  %v2181_v33 = vld [vmem:[%s3327_s1 + $0x100] ss:$8 sps:$4 sm:$0xff]  }
   0xc   :  { %689 = vmatprep.subr.bf16.mxu0 %v2152_v12  ;;  %731 = vmatpush1.bf16.msra.mxu1 %v2151_v13  ;;  %v2185_v34 = vld [vmem:[%s3327_s1 + $0x1f4] ss:$8 sps:$4 sm:$0xff]   ;;  %v2184_v35 = vld [vmem:[%s3327_s1 + $0xf0] ss:$8 sps:$4 sm:$0xff]   ;;  %v2188_v36 = vld [vmem:[%s3327_s1 + $0xe4] ss:$8 sps:$4 sm:$0xff]  }
   0xd   :  { %732 = vmatprep.subr.bf16.mxu1 %v2155_v14  ;;  %v2187_v37 = vld [vmem:[%s3327_s1 + $0x1f0] ss:$8 sps:$4 sm:$0xff]   ;;  %v2191_v38 = vld [vmem:[%s3327_s1 + $0x1e4] ss:$8 sps:$4 sm:$0xff]   ;;  %v2190_v39 = vld [vmem:[%s3327_s1 + $0xe0] ss:$8 sps:$4 sm:$0xff]  }
   0xe   :  { %v2194_v40 = vld [vmem:[%s3327_s1 + $0xd4] ss:$8 sps:$4 sm:$0xff]   ;;  %v2193_v41 = vld [vmem:[%s3327_s1 + $0x1e0] ss:$8 sps:$4 sm:$0xff]   ;;  %v2196_v43 = vld [vmem:[%s3327_s1 + $0xd0] ss:$8 sps:$4 sm:$0xff]  }
   0xf   :  { %690 = vmatpush1.bf16.msra.mxu0 %v2154_v15  ;;  %v2197_v42 = vld [vmem:[%s3327_s1 + $0x1d4] ss:$8 sps:$4 sm:$0xff]   ;;  %v2200_v44 = vld [vmem:[%s3327_s1 + $0xc4] ss:$8 sps:$4 sm:$0xff]   ;;  %v2199_v45 = vld [vmem:[%s3327_s1 + $0x1d0] ss:$8 sps:$4 sm:$0xff]  }
  0x10   :  { %691 = vmatprep.subr.bf16.mxu0 %v2158_v16  ;;  %733 = vmatpush1.bf16.msra.mxu1 %v2157_v17  ;;  %v2203_v46 = vld [vmem:[%s3327_s1 + $0x1c4] ss:$8 sps:$4 sm:$0xff]   ;;  %v2202_v47 = vld [vmem:[%s3327_s1 + $0xc0] ss:$8 sps:$4 sm:$0xff]   ;;  %v2206_v49 = vld [vmem:[%s3327_s1 + $0xb4] ss:$8 sps:$4 sm:$0xff]  }
  0x11   :  { %734 = vmatprep.subr.bf16.mxu1 %v2161_v18  ;;  %v2231_v48 = vld [vmem:[%s3328_s0 + $0x4] ss:$28 sps:$4 sm:$0xff]   ;;  %v2209_v51 = vld [vmem:[%s3327_s1 + $0x1b4] ss:$8 sps:$4 sm:$0xff]   ;;  %v2238_v52 = vld [vmem:[%s3328_s0 + $0xc] ss:$28 sps:$4 sm:$0xff]  }
  0x12   :  { %v2205_v50 = vld [vmem:[%s3327_s1 + $0x1c0] ss:$8 sps:$4 sm:$0xff]   ;;  %715 = vmatprep.mubr.bf16.mxu0 %v2231_v48  ;;  %v2208_v53 = vld [vmem:[%s3327_s1 + $0xb0] ss:$8 sps:$4 sm:$0xff]   ;;  %v2212_v54 = vld [vmem:[%s3327_s1 + $0xa4] ss:$8 sps:$4 sm:$0xff]   ;;  %758 = vmatprep.mubr.bf16.mxu1 %v2238_v52 }
  0x13   :  { %692 = vmatpush1.bf16.msra.mxu0 %v2160_v19  ;;  %v2211_v55 = vld [vmem:[%s3327_s1 + $0x1b0] ss:$8 sps:$4 sm:$0xff]   ;;  %v2215_v56 = vld [vmem:[%s3327_s1 + $0x1a4] ss:$8 sps:$4 sm:$0xff]   ;;  %v2214_v57 = vld [vmem:[%s3327_s1 + $0xa0] ss:$8 sps:$4 sm:$0xff]  }
  0x14   :  { %693 = vmatprep.subr.bf16.mxu0 %v2164_v20  ;;  %735 = vmatpush1.bf16.msra.mxu1 %v2163_v21  ;;  %v2218_v58 = vld [vmem:[%s3327_s1 + $0x94] ss:$8 sps:$4 sm:$0xff]   ;;  %v2217_v59 = vld [vmem:[%s3327_s1 + $0x1a0] ss:$8 sps:$4 sm:$0xff]   ;;  %v2220_v61 = vld [vmem:[%s3327_s1 + $0x90] ss:$8 sps:$4 sm:$0xff]  }
  0x15   :  { %736 = vmatprep.subr.bf16.mxu1 %v2167_v22  ;;  %v2221_v60 = vld [vmem:[%s3327_s1 + $0x194] ss:$8 sps:$4 sm:$0xff]   ;;  %v2224_v62 = vld [vmem:[%s3327_s1 + $0x84] ss:$8 sps:$4 sm:$0xff]   ;;  %v2223_v63 = vld [vmem:[%s3327_s1 + $0x190] ss:$8 sps:$4 sm:$0xff]  }
  0x16   :  { %v2227_v0 = vld [vmem:[%s3327_s1 + $0x184] ss:$8 sps:$4 sm:$0xff]   ;;  %v2226_v2 = vld [vmem:[%s3327_s1 + $0x80] ss:$8 sps:$4 sm:$0xff]   ;;  %v2235_v3 = vld [vmem:[%s3327_s1 + $0x274] ss:$8 sps:$4 sm:$0xff]  }
  0x17   :  { %694 = vmatpush1.bf16.msra.mxu0 %v2166_v23  ;;  %v2232_v4 = vld [vmem:[%s3327_s1 + $0x180] ss:$8 sps:$4 sm:$0xff]   ;;  %v2233_v6 = vld [vmem:[%s3327_s1 + $0x270] ss:$8 sps:$4 sm:$0xff]   ;;  %v2241_v8 = vld [vmem:[%s3327_s1 + $0x264] ss:$8 sps:$4 sm:$0xff]  }
  0x18   :  { %695 = vmatprep.subr.bf16.mxu0 %v2170_v24  ;;  %737 = vmatpush1.bf16.msra.mxu1 %v2169_v25  ;;  %v2229_v5 = vld [vmem:[%s3328_s0] ss:$28 sps:$4 sm:$0xff]   ;;  %v2236_v7 = vld [vmem:[%s3328_s0 + $0x8] ss:$28 sps:$4 sm:$0xff]   ;;  %v2278_v9 = vld [vmem:[%s3327_s1 + $0x310] ss:$8 sps:$4 sm:$0xff]  }
  0x19   :  { %738 = vmatprep.subr.bf16.mxu1 %v2173_v26  ;;  %v2280_v10 = vld [vmem:[%s3327_s1 + $0x314] ss:$8 sps:$4 sm:$0xff]   ;;  %v2239_v11 = vld [vmem:[%s3327_s1 + $0x260] ss:$8 sps:$4 sm:$0xff]   ;;  %v2286_v12 = vld [vmem:[%s3327_s1 + $0x304] ss:$8 sps:$4 sm:$0xff]  }
  0x1a   :  { %v2244_v13 = vld [vmem:[%s3327_s1 + $0x254] ss:$8 sps:$4 sm:$0xff]   ;;  %v2284_v14 = vld [vmem:[%s3327_s1 + $0x300] ss:$8 sps:$4 sm:$0xff]   ;;  %v2242_v15 = vld [vmem:[%s3327_s1 + $0x250] ss:$8 sps:$4 sm:$0xff]  }
  0x1b   :  { %696 = vmatpush1.bf16.msra.mxu0 %v2172_v27  ;;  %v2293_v16 = vld [vmem:[%s3328_s0 + $0x14] ss:$28 sps:$4 sm:$0xff]   ;;  %v132_v17 = vld [vmem:[%s3329_s2] sm:$0xff]  ;;  %v133_v20 = vld [vmem:[%s3329_s2 + $0x8] sm:$0xff] }
  0x1c   :  { %697 = vmatprep.subr.bf16.mxu0 %v2176_v28  ;;  %739 = vmatpush1.bf16.msra.mxu1 %v2175_v29  ;;  %v2247_v18 = vld [vmem:[%s3327_s1 + $0x244] ss:$8 sps:$4 sm:$0xff]   ;;  %v2290_v19 = vld [vmem:[%s3328_s0 + $0x18] ss:$28 sps:$4 sm:$0xff]   ;;  %v2245_v21 = vld [vmem:[%s3327_s1 + $0x240] ss:$8 sps:$4 sm:$0xff]  }
  0x1d   :  { %740 = vmatprep.subr.bf16.mxu1 %v2179_v30  ;;  %136 = vperm.xlu0 %2132, %v132_v17   ;;  %v2250_v22 = vld [vmem:[%s3327_s1 + $0x234] ss:$8 sps:$4 sm:$0xff]   ;;  %v2248_v23 = vld [vmem:[%s3327_s1 + $0x230] ss:$8 sps:$4 sm:$0xff]   ;;  %v2253_v24 = vld [vmem:[%s3327_s1 + $0x224] ss:$8 sps:$4 sm:$0xff]  }
  0x1e   :  { %v2251_v25 = vld [vmem:[%s3327_s1 + $0x220] ss:$8 sps:$4 sm:$0xff]   ;;  %v2256_v26 = vld [vmem:[%s3327_s1 + $0x214] ss:$8 sps:$4 sm:$0xff]   ;;  %v2254_v27 = vld [vmem:[%s3327_s1 + $0x210] ss:$8 sps:$4 sm:$0xff]  }
  0x1f   :  { %698 = vmatpush1.bf16.msra.mxu0 %v2178_v31  ;;  %v2259_v28 = vld [vmem:[%s3327_s1 + $0x204] ss:$8 sps:$4 sm:$0xff]   ;;  %v2257_v29 = vld [vmem:[%s3327_s1 + $0x200] ss:$8 sps:$4 sm:$0xff]   ;;  %v2262_v30 = vld [vmem:[%s3327_s1 + $0x2f4] ss:$8 sps:$4 sm:$0xff]  }
  0x20   :  { %699 = vmatprep.subr.bf16.mxu0 %v2182_v32  ;;  %741 = vmatpush1.bf16.msra.mxu1 %v2181_v33  ;;  %v2260_v31 = vld [vmem:[%s3327_s1 + $0x2f0] ss:$8 sps:$4 sm:$0xff]   ;;  %v2265_v32 = vld [vmem:[%s3327_s1 + $0x2e4] ss:$8 sps:$4 sm:$0xff]   ;;  %v2263_v33 = vld [vmem:[%s3327_s1 + $0x2e0] ss:$8 sps:$4 sm:$0xff]  }
  0x21   :  { %742 = vmatprep.subr.bf16.mxu1 %v2185_v34  ;;  %141 = vperm.xlu0 %2132, %v133_v20   ;;  %v2268_v34 = vld [vmem:[%s3327_s1 + $0x2d4] ss:$8 sps:$4 sm:$0xff]  }
  0x23   :  { %700 = vmatpush2.bf16.msra.mxu0 %v2184_v35  ;;  %v2266_v35 = vld [vmem:[%s3327_s1 + $0x2d0] ss:$8 sps:$4 sm:$0xff]  }
  0x24   :  { %701 = vmatprep.subr.bf16.mxu0 %v2188_v36  ;;  %743 = vmatpush2.bf16.msra.mxu1 %v2187_v37  ;;  %v2271_v36 = vld [vmem:[%s3327_s1 + $0x2c4] ss:$8 sps:$4 sm:$0xff]   ;;  %v2269_v37 = vld [vmem:[%s3327_s1 + $0x2c0] ss:$8 sps:$4 sm:$0xff]  }
  0x25   :  { %744 = vmatprep.subr.bf16.mxu1 %v2191_v38  ;;  %v2274_v38 = vld [vmem:[%s3327_s1 + $0x2b4] ss:$8 sps:$4 sm:$0xff]  }
  0x27   :  { %702 = vmatpush2.bf16.msra.mxu0 %v2190_v39  ;;  %v2272_v39 = vld [vmem:[%s3327_s1 + $0x2b0] ss:$8 sps:$4 sm:$0xff]  }
  0x28   :  { %703 = vmatprep.subr.bf16.mxu0 %v2194_v40  ;;  %745 = vmatpush2.bf16.msra.mxu1 %v2193_v41  ;;  %v2277_v40 = vld [vmem:[%s3327_s1 + $0x2a4] ss:$8 sps:$4 sm:$0xff]   ;;  %v2275_v41 = vld [vmem:[%s3327_s1 + $0x2a0] ss:$8 sps:$4 sm:$0xff]  }
  0x29   :  { %746 = vmatprep.subr.bf16.mxu1 %v2197_v42  ;;  %v2283_v42 = vld [vmem:[%s3327_s1 + $0x294] ss:$8 sps:$4 sm:$0xff]  }
  0x2b   :  { %704 = vmatpush2.bf16.msra.mxu0 %v2196_v43  ;;  %v2281_v43 = vld [vmem:[%s3327_s1 + $0x290] ss:$8 sps:$4 sm:$0xff]  }
  0x2c   :  { %705 = vmatprep.subr.bf16.mxu0 %v2200_v44  ;;  %747 = vmatpush2.bf16.msra.mxu1 %v2199_v45  ;;  %v2289_v44 = vld [vmem:[%s3327_s1 + $0x284] ss:$8 sps:$4 sm:$0xff]   ;;  %v2287_v45 = vld [vmem:[%s3327_s1 + $0x280] ss:$8 sps:$4 sm:$0xff]  }
  0x2d   :  { %748 = vmatprep.subr.bf16.mxu1 %v2203_v46  ;;  %v2291_v46 = vld [vmem:[%s3328_s0 + $0x10] ss:$28 sps:$4 sm:$0xff]  }
  0x2f   :  { %706 = vmatpush2.bf16.msra.mxu0 %v2202_v47 }
  0x30   :  { %707 = vmatprep.subr.bf16.mxu0 %v2206_v49  ;;  %749 = vmatpush2.bf16.msra.mxu1 %v2205_v50 }
  0x31   :  { %750 = vmatprep.subr.bf16.mxu1 %v2209_v51 }
  0x33   :  { %708 = vmatpush2.bf16.msra.mxu0 %v2208_v53 }
  0x34   :  { %709 = vmatprep.subr.bf16.mxu0 %v2212_v54  ;;  %751 = vmatpush2.bf16.msra.mxu1 %v2211_v55 }
  0x35   :  { %752 = vmatprep.subr.bf16.mxu1 %v2215_v56 }
  0x37   :  { %710 = vmatpush2.bf16.msra.mxu0 %v2214_v57 }
  0x38   :  { %711 = vmatprep.subr.bf16.mxu0 %v2218_v58  ;;  %753 = vmatpush2.bf16.msra.mxu1 %v2217_v59 }
  0x39   :  { %754 = vmatprep.subr.bf16.mxu1 %v2221_v60 }
  0x3b   :  { %712 = vmatpush2.bf16.msra.mxu0 %v2220_v61 }
  0x3c   :  { %713 = vmatprep.subr.bf16.mxu0 %v2224_v62  ;;  %755 = vmatpush2.bf16.msra.mxu1 %v2223_v63 }
  0x3d   :  { %756 = vmatprep.subr.bf16.mxu1 %v2227_v0 }
  0x3f   :  { %714 = vmatpush2.bf16.msra.mxu0 %v2226_v2 }
  0x40   :  { %769 = vmatprep.subr.bf16.mxu0 %v2235_v3  ;;  %757 = vmatpush2.bf16.msra.mxu1 %v2232_v4 }
  0x41   :  { %824 = vmatprep.subr.bf16.mxu1 %v2280_v10 }
  0x42   :  { %716 = vmatmul.mubr.bf16.vlgmr.msra.gmra.mxu0 %v2229_v5 }
  0x43   :  { %770 = vmatpush1.bf16.msra.mxu0 %v2233_v6  ;;  %759 = vmatmul.mubr.bf16.vlgmr.msra.gmra.mxu1 %v2236_v7 }
  0x44   :  { %771 = vmatprep.subr.bf16.mxu0 %v2241_v8  ;;  %825 = vmatpush1.bf16.msra.mxu1 %v2278_v9 }
  0x45   :  { %844 = vmatprep.mubr.bf16.mxu1 %v2463_v1  ;;  %826 = vmatprep.subr.bf16.mxu1 %v2286_v12 }
  0x46   :  { %801 = vmatprep.mubr.bf16.mxu0 %v2293_v16 }
  0x47   :  { %772 = vmatpush1.bf16.msra.mxu0 %v2239_v11 }
  0x48   :  { %773 = vmatprep.subr.bf16.mxu0 %v2244_v13  ;;  %827 = vmatpush1.bf16.msra.mxu1 %v2284_v14 }
  0x4b   :  { %774 = vmatpush1.bf16.msra.mxu0 %v2242_v15  ;;  %2004 = vmatmul.mubr.msk.bf16.vlgmr.msra.gmra.mxu1 %vm679_vm0, %v2290_v19 }
  0x4c   :  { %775 = vmatprep.subr.bf16.mxu0 %v2247_v18 }
  0x4f   :  { %776 = vmatpush1.bf16.msra.mxu0 %v2245_v21 }
  0x50   :  { %777 = vmatprep.subr.bf16.mxu0 %v2250_v22 }
  0x53   :  { %778 = vmatpush1.bf16.msra.mxu0 %v2248_v23 }
  0x54   :  { %779 = vmatprep.subr.bf16.mxu0 %v2253_v24 }
  0x57   :  { %780 = vmatpush1.bf16.msra.mxu0 %v2251_v25 }
  0x58   :  { %781 = vmatprep.subr.bf16.mxu0 %v2256_v26  ;;  %v859_v26 = vld [vmem:[%s3330_s3] sm:$0xff] }
  0x5b   :  { %782 = vmatpush1.bf16.msra.mxu0 %v2254_v27  ;;  %v860_v27 = vld [vmem:[%s3330_s3 + $0x8] sm:$0xff] }
  0x5c   :  { %783 = vmatprep.subr.bf16.mxu0 %v2259_v28  ;;  %v861_v28 = vld [vmem:[%s3331_s4] sm:$0xff] }
  0x5f   :  { %784 = vmatpush1.bf16.msra.mxu0 %v2257_v29  ;;  %v2294_v29 = vld [vmem:[%s3332_s5 + $0x1f8] ss:$36 sps:$4 sm:$0xff]  }
  0x60   :  { %785 = vmatprep.subr.bf16.mxu0 %v2262_v30  ;;  %v2296_v30 = vld [vmem:[%s3332_s5 + $0x1fc] ss:$36 sps:$4 sm:$0xff]  }
  0x61   :  { %1662 = vmatprep.subr.bf16.mxu1 %v2296_v30  ;;  %v2355_v30 = vld [vmem:[%s3332_s5 + $0x2e0] ss:$36 sps:$4 sm:$0xff]  }
  0x62   :  { %1663 = vmatpush1.bf16.msra.mxu1 %v2294_v29  ;;  %v2352_v29 = vld [vmem:[%s3332_s5 + $0x2d0] ss:$36 sps:$4 sm:$0xff]  }
  0x63   :  { %786 = vmatpush2.bf16.msra.mxu0 %v2260_v31  ;;  %v2297_v31 = vld [vmem:[%s3332_s5 + $0x208] ss:$36 sps:$4 sm:$0xff]  }
  0x64   :  { %787 = vmatprep.subr.bf16.mxu0 %v2265_v32  ;;  %v2299_v32 = vld [vmem:[%s3332_s5 + $0x20c] ss:$36 sps:$4 sm:$0xff]  }
  0x67   :  { %788 = vmatpush2.bf16.msra.mxu0 %v2263_v33  ;;  %v2300_v33 = vld [vmem:[%s3332_s5 + $0x1b0] ss:$36 sps:$4 sm:$0xff]  }
  0x68   :  { %789 = vmatprep.subr.bf16.mxu0 %v2268_v34  ;;  %v2302_v34 = vld [vmem:[%s3332_s5 + $0x1b4] ss:$36 sps:$4 sm:$0xff]  }
  0x69   :  { %1664 = vmatprep.subr.bf16.mxu1 %v2302_v34  ;;  %v2361_v34 = vld [vmem:[%s3332_s5 + $0x298] ss:$36 sps:$4 sm:$0xff]  }
  0x6a   :  { %1665 = vmatpush1.bf16.msra.mxu1 %v2300_v33  ;;  %v2358_v33 = vld [vmem:[%s3332_s5 + $0x288] ss:$36 sps:$4 sm:$0xff]  }
  0x6b   :  { %790 = vmatpush2.bf16.msra.mxu0 %v2266_v35  ;;  %v2303_v35 = vld [vmem:[%s3332_s5 + $0x1c0] ss:$36 sps:$4 sm:$0xff]  }
  0x6c   :  { %791 = vmatprep.subr.bf16.mxu0 %v2271_v36  ;;  %v2305_v36 = vld [vmem:[%s3332_s5 + $0x1c4] ss:$36 sps:$4 sm:$0xff]  }
  0x6f   :  { %792 = vmatpush2.bf16.msra.mxu0 %v2269_v37  ;;  %v2308_v37 = vld [vmem:[%s3332_s5 + $0x16c] ss:$36 sps:$4 sm:$0xff]  }
  0x70   :  { %793 = vmatprep.subr.bf16.mxu0 %v2274_v38  ;;  %v2306_v38 = vld [vmem:[%s3332_s5 + $0x168] ss:$36 sps:$4 sm:$0xff]   ;;  %1666 = vmatprep.subr.bf16.mxu1 %v2308_v37  ;;  %v2364_v37 = vld [vmem:[%s3332_s5 + $0x240] ss:$36 sps:$4 sm:$0xff]  }
  0x71   :  { %1667 = vmatpush1.bf16.msra.mxu1 %v2306_v38  ;;  %v2367_v38 = vld [vmem:[%s3332_s5 + $0x250] ss:$36 sps:$4 sm:$0xff]  }
  0x73   :  { %794 = vmatpush2.bf16.msra.mxu0 %v2272_v39  ;;  %v2311_v39 = vld [vmem:[%s3332_s5 + $0x17c] ss:$36 sps:$4 sm:$0xff]  }
  0x74   :  { %795 = vmatprep.subr.bf16.mxu0 %v2277_v40  ;;  %v2309_v40 = vld [vmem:[%s3332_s5 + $0x178] ss:$36 sps:$4 sm:$0xff]  }
  0x77   :  { %796 = vmatpush2.bf16.msra.mxu0 %v2275_v41  ;;  %v2314_v41 = vld [vmem:[%s3332_s5 + $0x124] ss:$36 sps:$4 sm:$0xff]  }
  0x78   :  { %797 = vmatprep.subr.bf16.mxu0 %v2283_v42  ;;  %v2317_v42 = vld [vmem:[%s3332_s5 + $0x134] ss:$36 sps:$4 sm:$0xff]   ;;  %1668 = vmatprep.subr.bf16.mxu1 %v2314_v41 }
  0x7b   :  { %798 = vmatpush2.bf16.msra.mxu0 %v2281_v43  ;;  %v2312_v43 = vld [vmem:[%s3332_s5 + $0x120] ss:$36 sps:$4 sm:$0xff]  }
  0x7c   :  { %799 = vmatprep.subr.bf16.mxu0 %v2289_v44  ;;  %v2315_v44 = vld [vmem:[%s3332_s5 + $0x130] ss:$36 sps:$4 sm:$0xff]   ;;  %1669 = vmatpush1.bf16.msra.mxu1 %v2312_v43 }
  0x7f   :  { %800 = vmatpush2.bf16.msra.mxu0 %v2287_v45  ;;  %v2320_v45 = vld [vmem:[%s3332_s5 + $0xdc] ss:$36 sps:$4 sm:$0xff]  }
  0x80   :  { %1748 = vmatprep.subr.bf16.mxu0 %v2299_v32  ;;  %1670 = vmatprep.subr.bf16.mxu1 %v2320_v45  ;;  %v2363_v32 = vld [vmem:[%s3332_s5 + $0x29c] ss:$36 sps:$4 sm:$0xff]  }
  0x82   :  { %802 = vmatmul.mubr.bf16.vlgmr.msra.gmra.mxu0 %v2291_v46  ;;  %v2318_v46 = vld [vmem:[%s3332_s5 + $0xd8] ss:$36 sps:$4 sm:$0xff]  }
  0x83   :  { %1749 = vmatpush1.bf16.msra.mxu0 %v2297_v31  ;;  %1671 = vmatpush1.bf16.msra.mxu1 %v2318_v46  ;;  %v2360_v31 = vld [vmem:[%s3332_s5 + $0x28c] ss:$36 sps:$4 sm:$0xff]  }
  0x84   :  { %1750 = vmatprep.subr.bf16.mxu0 %v2305_v36  ;;  %v2369_v36 = vld [vmem:[%s3332_s5 + $0x254] ss:$36 sps:$4 sm:$0xff]  }
  0x87   :  { %1751 = vmatpush1.bf16.msra.mxu0 %v2303_v35  ;;  %v2366_v35 = vld [vmem:[%s3332_s5 + $0x244] ss:$36 sps:$4 sm:$0xff]  }
  0x88   :  { %1752 = vmatprep.subr.bf16.mxu0 %v2311_v39  ;;  %v2372_v39 = vld [vmem:[%s3332_s5 + $0x204] ss:$36 sps:$4 sm:$0xff]  }
  0x8b   :  { %1753 = vmatpush1.bf16.msra.mxu0 %v2309_v40 }
  0x8c   :  { %1754 = vmatprep.subr.bf16.mxu0 %v2317_v42 }
  0x8f   :  { %1755 = vmatpush1.bf16.msra.mxu0 %v2315_v44 }
  0x98   :  { %v137_v50 = vpop.permute.xlu0 %136 }
  0x9c   :  { %v142_v56 = vpop.permute.xlu0 %141 }
 0x102   :  { %v717_v48 = vpop.f32.mrf.mxu0 }
 0x103   :  { %v760_v47 = vpop.f32.mrf.mxu1  ;;  %v718_v55 = vadd.f32 %v717_v48, %v137_v50  ;;  %v2321_v48 = vld [vmem:[%s3332_s5 + $0xe8] ss:$36 sps:$4 sm:$0xff]  }
 0x104   :  { %v719_v51 = vpop.f32.mrf.mxu0 }
 0x105   :  { %v762_v49 = vpop.f32.mrf.mxu1  ;;  %v720_v58 = vadd.f32 %v719_v51, %v137_v50  ;;  %v761_v60 = vadd.f32 %v760_v47, %v718_v55  ;;  %v2323_v47 = vld [vmem:[%s3332_s5 + $0xec] ss:$36 sps:$4 sm:$0xff]   ;;  %v2329_v50 = vld [vmem:[%s3332_s5 + $0xa4] ss:$36 sps:$4 sm:$0xff]  }
 0x106   :  { %v721_v53 = vpop.f32.mrf.mxu0  ;;  %1756 = vmatprep.subr.bf16.mxu0 %v2323_v47  ;;  %v2324_v51 = vld [vmem:[%s3332_s5 + $0x90] ss:$36 sps:$4 sm:$0xff]  }
 0x107   :  { %v764_v52 = vpop.f32.mrf.mxu1  ;;  %v722_v61 = vadd.f32 %v721_v53, %v142_v56  ;;  %v763_v0 = vadd.f32 %v762_v49, %v720_v58  ;;  %v2326_v49 = vld [vmem:[%s3332_s5 + $0x94] ss:$36 sps:$4 sm:$0xff]   ;;  %1757 = vmatpush1.bf16.msra.mxu0 %v2321_v48 }
 0x108   :  { %v723_v59 = vpop.f32.mrf.mxu0  ;;  %1672 = vmatprep.subr.bf16.mxu1 %v2326_v49  ;;  %1758 = vmatprep.subr.bf16.mxu0 %v2329_v50 }
 0x109   :  { %v766_v54 = vpop.f32.mrf.mxu1  ;;  %v724_v2 = vadd.f32 %v723_v59, %v142_v56  ;;  %v765_v5 = vadd.f32 %v764_v52, %v722_v61  ;;  %v2327_v52 = vld [vmem:[%s3332_s5 + $0xa0] ss:$36 sps:$4 sm:$0xff]   ;;  %1673 = vmatpush1.bf16.msra.mxu1 %v2324_v51 }
 0x10b   :  { %v846_v57 = vpop.f32.mrf.mxu1  ;;  %v767_v10 = vadd.f32 %v766_v54, %v724_v2  ;;  %1759 = vmatpush1.bf16.msra.mxu0 %v2327_v52 }
 0x10d   :  { %v848_v62 = vpop.f32.mrf.mxu1 }
 0x10f   :  { %v850_v7 = vpop.f32.mrf.mxu1 }
 0x111   :  { %v852_v16 = vpop.f32.mrf.mxu1 }
 0x142   :  { %v803_v63 = vpop.f32.mrf.mxu0 }
 0x143   :  { %v804_v3 = vadd.f32 %v803_v63, %v761_v60 }
 0x144   :  { %v805_v4 = vpop.f32.mrf.mxu0 }
 0x145   :  { %v806_v6 = vadd.f32 %v805_v4, %v763_v0  ;;  %v2829_v9 = vadd.f32 %v846_v57, %v804_v3 }
 0x146   :  { %v807_v8 = vpop.f32.mrf.mxu0 }
 0x147   :  { %v2831_v11 = vadd.f32 %v848_v62, %v806_v6  ;;  %v808_v12 = vadd.f32 %v807_v8, %v765_v5  ;;  %v855_v18 = vmax.f32 %v2829_v9, 0.0  ;;  %v2332_v6 = vld [vmem:[%s3332_s5 + $0x4c] ss:$36 sps:$4 sm:$0xff]   ;;  %v2333_v9 = vld [vmem:[%s3332_s5 + $0x58] ss:$36 sps:$4 sm:$0xff]  }
 0x148   :  { %v809_v13 = vpop.f32.mrf.mxu0  ;;  %v2330_v8 = vld [vmem:[%s3332_s5 + $0x48] ss:$36 sps:$4 sm:$0xff]   ;;  %1674 = vmatprep.subr.bf16.mxu1 %v2332_v6 }
 0x149   :  { %v810_v14 = vadd.f32 %v809_v13, %v767_v10  ;;  %v856_v15 = vmax.f32 %v2831_v11, 0.0  ;;  %v2834_v17 = vadd.f32 %v850_v7, %v808_v12  ;;  %v2335_v7 = vld [vmem:[%s3332_s5 + $0x5c] ss:$36 sps:$4 sm:$0xff]   ;;  %1675 = vmatpush1.bf16.msra.mxu1 %v2330_v8  ;;  %v2338_v10 = vld [vmem:[%s3332_s5 + $0x4] ss:$36 sps:$4 sm:$0xff]  }
 0x14a   :  { %1760 = vmatprep.subr.bf16.mxu0 %v2335_v7  ;;  %v2341_v11 = vld [vmem:[%s3332_s5 + $0x14] ss:$36 sps:$4 sm:$0xff]   ;;  %v2336_v12 = vld [vmem:[%s3332_s5] ss:$36 sps:$4 sm:$0xff]   ;;  %1676 = vmatprep.subr.bf16.mxu1 %v2338_v10  ;;  %v2381_v10 = vld [vmem:[%s3332_s5 + $0x188] ss:$36 sps:$4 sm:$0xff]  }
 0x14b   :  { %v2837_v19 = vadd.f32 %v852_v16, %v810_v14  ;;  %v864_v20 = vsel %vm863_vm1, %v856_v15, 0.0  ;;  %v857_v23 = vmax.f32 %v2834_v17, 0.0  ;;  %1761 = vmatpush1.bf16.msra.mxu0 %v2333_v9  ;;  %v2339_v13 = vld [vmem:[%s3332_s5 + $0x10] ss:$36 sps:$4 sm:$0xff]   ;;  %v1051_v14 = vld [vmem:[%s3332_s5 + $0x360] sm:$0xff]  ;;  %v862_v16 = vld [vmem:[%s3331_s4 + $0x8] sm:$0xff] }
 0x14c   :  { %v865_v21 = vadd.f32 %v864_v20, %v855_v18  ;;  %1762 = vmatprep.subr.bf16.mxu0 %v2341_v11  ;;  %v2114_v17 = vcombine.high %v1051_v14, %v1051_v14  ;;  %v2377_v7 = vld [vmem:[%s3332_s5 + $0x1d0] ss:$36 sps:$4 sm:$0xff]  }
 0x14d   :  { %v858_v22 = vmax.f32 %v2837_v19, 0.0  ;;  %1677 = vmatpush1.bf16.msra.mxu1 %v2336_v12  ;;  %v2113_v19 = vcombine.low %v1051_v14, %v1051_v14  ;;  %v2380_v8 = vld [vmem:[%s3332_s5 + $0x174] ss:$36 sps:$4 sm:$0xff]   ;;  %v2384_v11 = vld [vmem:[%s3332_s5 + $0x12c] ss:$36 sps:$4 sm:$0xff]  }
 0x14e   :  { %866 = vadd.xlane.f32.xlu1 %v865_v21  ;;  %2122 = vmatprep.subr.msk.bf16.mxu1 %vm1634_vm2, %v2114_v17  ;;  %v2378_v9 = vld [vmem:[%s3332_s5 + $0x170] ss:$36 sps:$4 sm:$0xff]   ;;  %v2382_v12 = vld [vmem:[%s3332_s5 + $0x128] ss:$36 sps:$4 sm:$0xff]   ;;  %v2392_v17 = vld [vmem:[%s3332_s5 + $0x9c] ss:$36 sps:$4 sm:$0xff]  }
 0x14f   :  { %v868_v24 = vsel %vm863_vm1, %v858_v22, 0.0  ;;  %1763 = vmatpush1.bf16.msra.mxu0 %v2339_v13  ;;  %v1636_v21 = vsel %vm1634_vm2, %v2113_v19, 0  ;;  %v2385_v13 = vld [vmem:[%s3332_s5 + $0x140] ss:$36 sps:$4 sm:$0xff]   ;;  %v2393_v19 = vld [vmem:[%s3332_s5 + $0xb0] ss:$36 sps:$4 sm:$0xff]  }
 0x150   :  { %v869_v25 = vadd.f32 %v868_v24, %v857_v23  ;;  %v2351_v24 = vld [vmem:[%s3332_s5 + $0x32c] ss:$36 sps:$4 sm:$0xff]   ;;  %v2388_v14 = vld [vmem:[%s3332_s5 + $0xe4] ss:$36 sps:$4 sm:$0xff]  }
 0x151   :  { %1685 = vmatpush2.bf16.msra.mxu1 %v1636_v21  ;;  %v2394_v21 = vld [vmem:[%s3332_s5 + $0x50] ss:$36 sps:$4 sm:$0xff]  }
 0x152   :  { %870 = vadd.xlane.f32.xlu1 %v869_v25  ;;  %v2346_v25 = vld [vmem:[%s3332_s5 + $0x318] ss:$36 sps:$4 sm:$0xff]  }
 0x163   :  { %903 = vperm.xlu1 %2133, %v859_v26   ;;  %v2349_v26 = vld [vmem:[%s3332_s5 + $0x328] ss:$36 sps:$4 sm:$0xff]  }
 0x167   :  { %908 = vperm.xlu1 %2133, %v860_v27   ;;  %v2354_v27 = vld [vmem:[%s3332_s5 + $0x2d4] ss:$36 sps:$4 sm:$0xff]  }
 0x16b   :  { %917 = vperm.xlu1 %2133, %v861_v28   ;;  %v2357_v28 = vld [vmem:[%s3332_s5 + $0x2e4] ss:$36 sps:$4 sm:$0xff]  }
 0x1d7   :  { %v867_v53 = vpop.xlane.xlu1 %866 }
 0x1d8   :  { %v873_v54 = vmul.f32 0.005, %v867_v53 }
 0x1da   :  { %v2934_v55 = vsub.f32 %v855_v18, %v873_v54  ;;  %v2938_v56 = vsub.f32 %v856_v15, %v873_v54  ;;  %v1053_v15 = vld [vmem:[%s3332_s5 + $0x370] sm:$0xff] }
 0x1db   :  { %v871_v57 = vpop.xlane.xlu1 %870  ;;  %v2118_v18 = vcombine.high %v1053_v15, %v1053_v15  ;;  %v2117_v20 = vcombine.low %v1053_v15, %v1053_v15  ;;  %v2386_v15 = vld [vmem:[%s3332_s5 + $0xe0] ss:$36 sps:$4 sm:$0xff]  }
 0x1dc   :  { %v874_v58 = vmul.f32 0.005, %v871_v57  ;;  %v879_v59 = vmul.f32 %v2934_v55, %v2934_v55  ;;  %v880_v60 = vmul.f32 %v2938_v56, %v2938_v56 }
 0x1dd   :  { %2126 = vmatprep.subr.msk.bf16.mxu0 %vm1634_vm2, %v2118_v18  ;;  %v2390_v18 = vld [vmem:[%s3332_s5 + $0x98] ss:$36 sps:$4 sm:$0xff]  }
 0x1de   :  { %v2946_v61 = vsub.f32 %v857_v23, %v874_v58  ;;  %v2950_v62 = vsub.f32 %v858_v22, %v874_v58  ;;  %v883_v63 = vsel %vm863_vm1, %v880_v60, 0.0  ;;  %v1648_v22 = vsel %vm1634_vm2, %v2117_v20, 0  ;;  %v2348_v23 = vld [vmem:[%s3332_s5 + $0x31c] ss:$36 sps:$4 sm:$0xff]   ;;  %v2396_v20 = vld [vmem:[%s3332_s5 + $0x54] ss:$36 sps:$4 sm:$0xff]  }
 0x1df   :  { %v884_v0 = vadd.f32 %v883_v63, %v879_v59  ;;  %1771 = vmatpush2.bf16.msra.mxu0 %v1648_v22  ;;  %1686 = vmatprep.subr.bf16.mxu1 %v2348_v23  ;;  %v904_v40 = vpop.permute.xlu1 %903  ;;  %v2397_v22 = vld [vmem:[%s3332_s5 + $0x68] ss:$36 sps:$4 sm:$0xff]  }
 0x1e0   :  { %v881_v2 = vmul.f32 %v2946_v61, %v2946_v61  ;;  %v882_v3 = vmul.f32 %v2950_v62, %v2950_v62  ;;  %1772 = vmatprep.subr.bf16.mxu0 %v2351_v24  ;;  %1687 = vmatpush2.bf16.msra.mxu1 %v2346_v25  ;;  %v2400_v23 = vld [vmem:[%s3332_s5 + $0xc] ss:$36 sps:$4 sm:$0xff]  }
 0x1e1   :  { %885 = vadd.xlane.f32.xlu0 %v884_v0  ;;  %1688 = vmatprep.subr.bf16.mxu1 %v2354_v27  ;;  %v1052_v24 = vld [vmem:[%s3332_s5 + $0x368] sm:$0xff] }
 0x1e2   :  { %v887_v4 = vsel %vm863_vm1, %v882_v3, 0.0  ;;  %v2398_v25 = vld [vmem:[%s3332_s5 + $0x8] ss:$36 sps:$4 sm:$0xff]   ;;  %v2116_v27 = vcombine.high %v1052_v24, %v1052_v24 }
 0x1e3   :  { %v888_v5 = vadd.f32 %v887_v4, %v881_v2  ;;  %1773 = vmatpush2.bf16.msra.mxu0 %v2349_v26  ;;  %v909_v41 = vpop.permute.xlu1 %908  ;;  %v2401_v26 = vld [vmem:[%s3332_s5 + $0x20] ss:$36 sps:$4 sm:$0xff]  }
 0x1e4   :  { %1774 = vmatprep.subr.bf16.mxu0 %v2357_v28  ;;  %1689 = vmatpush2.bf16.msra.mxu1 %v2352_v29  ;;  %v2115_v28 = vcombine.low %v1052_v24, %v1052_v24  ;;  %v2404_v29 = vld [vmem:[%s3332_s5 + $0x380] ss:$0 sps:$4 sm:$0xff]  }
 0x1e5   :  { %889 = vadd.xlane.f32.xlu1 %v888_v5  ;;  %1690 = vmatprep.subr.bf16.mxu1 %v2360_v31  ;;  %v1660_v31 = vsel %vm1634_vm2, %v2404_v29, 0 }
 0x1e7   :  { %1775 = vmatpush2.bf16.msra.mxu0 %v2355_v30  ;;  %v918_v42 = vpop.permute.xlu1 %917  ;;  %v1642_v30 = vsel %vm1634_vm2, %v2115_v28, 0 }
 0x1e8   :  { %1776 = vmatprep.subr.bf16.mxu0 %v2363_v32  ;;  %1691 = vmatpush2.bf16.msra.mxu1 %v2358_v33  ;;  %v2407_v32 = vld [vmem:[%s3332_s5 + $0x324] ss:$36 sps:$4 sm:$0xff]  }
 0x1e9   :  { %1692 = vmatprep.subr.bf16.mxu1 %v2366_v35  ;;  %v2405_v33 = vld [vmem:[%s3332_s5 + $0x320] ss:$36 sps:$4 sm:$0xff]  }
 0x1ea   :  { %v2411_v35 = vld [vmem:[%s3332_s5 + $0x2dc] ss:$36 sps:$4 sm:$0xff]  }
 0x1eb   :  { %1777 = vmatpush2.bf16.msra.mxu0 %v2361_v34  ;;  %v2408_v34 = vld [vmem:[%s3332_s5 + $0x338] ss:$36 sps:$4 sm:$0xff]  }
 0x1ec   :  { %1778 = vmatprep.subr.bf16.mxu0 %v2369_v36  ;;  %1693 = vmatpush2.bf16.msra.mxu1 %v2364_v37  ;;  %v2409_v36 = vld [vmem:[%s3332_s5 + $0x2d8] ss:$36 sps:$4 sm:$0xff]   ;;  %v2412_v37 = vld [vmem:[%s3332_s5 + $0x2f0] ss:$36 sps:$4 sm:$0xff]  }
 0x1ed   :  { %1705 = vmatprep.subr.bf16.mxu1 %v2372_v39  ;;  %v2413_v39 = vld [vmem:[%s3332_s5 + $0x290] ss:$36 sps:$4 sm:$0xff]  }
 0x1ef   :  { %1779 = vmatpush2.bf16.msra.mxu0 %v2367_v38  ;;  %v2415_v38 = vld [vmem:[%s3332_s5 + $0x294] ss:$36 sps:$4 sm:$0xff]  }
 0x1f0   :  { %1834 = vmatprep.subr.bf16.mxu0 %v2463_v1 }
 0x1f6   :  { %922 = vperm.xlu1 %2133, %v862_v16   ;;  %v2389_v16 = vld [vmem:[%s3332_s5 + $0xf8] ss:$36 sps:$4 sm:$0xff]  }
 0x26a   :  { %v886_v43 = vpop.xlane.xlu0 %885 }
 0x26b   :  { %v891_v44 = vmul.f32 0.005, %v886_v43  ;;  %v2420_v43 = vld [vmem:[%s3332_s5 + $0x260] ss:$36 sps:$4 sm:$0xff]  }
 0x26d   :  { %v893_v45 = vadd.f32 1e-05, %v891_v44  ;;  %v2423_v44 = vld [vmem:[%s3332_s5 + $0x214] ss:$36 sps:$4 sm:$0xff]  }
 0x26e   :  { %v890_v46 = vpop.xlane.xlu1 %889 }
 0x26f   :  { %2459 = vrsqrt.f32 %v893_v45  ;;  %v892_v47 = vmul.f32 0.005, %v890_v46  ;;  %v2421_v45 = vld [vmem:[%s3332_s5 + $0x210] ss:$36 sps:$4 sm:$0xff]  }
 0x270   :  { %v2426_v46 = vld [vmem:[%s3332_s5 + $0x1cc] ss:$36 sps:$4 sm:$0xff]  }
 0x271   :  { %v894_v48 = vadd.f32 1e-05, %v892_v47  ;;  %v2429_v47 = vld [vmem:[%s3332_s5 + $0x184] ss:$36 sps:$4 sm:$0xff]  }
 0x272   :  { %v923_v63 = vpop.permute.xlu1 %922 }
 0x273   :  { %2461 = vrsqrt.f32 %v894_v48  ;;  %v2427_v48 = vld [vmem:[%s3332_s5 + $0x180] ss:$36 sps:$4 sm:$0xff]  }
 0x27c   :  { %v2460_v49 = vpop.eup %2459 }
 0x27d   :  { %v897_v50 = vmul.f32 %v2460_v49, %v2934_v55  ;;  %v898_v51 = vmul.f32 %v2460_v49, %v2938_v56  ;;  %v2370_v55 = vld [vmem:[%s3332_s5 + $0x200] ss:$36 sps:$4 sm:$0xff]   ;;  %v2373_v56 = vld [vmem:[%s3332_s5 + $0x218] ss:$36 sps:$4 sm:$0xff]  }
 0x27e   :  { %v2432_v49 = vld [vmem:[%s3332_s5 + $0x13c] ss:$36 sps:$4 sm:$0xff]  }
 0x27f   :  { %v911_v57 = vmul.f32 %v904_v40, %v897_v50  ;;  %v912_v58 = vmul.f32 %v904_v40, %v898_v51  ;;  %v2416_v40 = vld [vmem:[%s3332_s5 + $0x2a8] ss:$36 sps:$4 sm:$0xff]   ;;  %v2430_v50 = vld [vmem:[%s3332_s5 + $0x138] ss:$36 sps:$4 sm:$0xff]  }
 0x280   :  { %v2462_v52 = vpop.eup %2461  ;;  %v2435_v51 = vld [vmem:[%s3332_s5 + $0xf4] ss:$36 sps:$4 sm:$0xff]  }
 0x281   :  { %v899_v53 = vmul.f32 %v2462_v52, %v2946_v61  ;;  %v900_v54 = vmul.f32 %v2462_v52, %v2950_v62  ;;  %v925_v0 = vadd.f32 %v918_v42, %v911_v57  ;;  %v926_v2 = vadd.f32 %v918_v42, %v912_v58  ;;  %v2376_v61 = vld [vmem:[%s3332_s5 + $0x1bc] ss:$36 sps:$4 sm:$0xff]   ;;  %v2417_v42 = vld [vmem:[%s3332_s5 + $0x248] ss:$36 sps:$4 sm:$0xff]   ;;  %v2433_v52 = vld [vmem:[%s3332_s5 + $0xf0] ss:$36 sps:$4 sm:$0xff]  }
 0x282   :  { %v2374_v62 = vld [vmem:[%s3332_s5 + $0x1b8] ss:$36 sps:$4 sm:$0xff]   ;;  %v2441_v57 = vld [vmem:[%s3332_s5 + $0x64] ss:$36 sps:$4 sm:$0xff]  }
 0x283   :  { %v913_v59 = vmul.f32 %v909_v41, %v899_v53  ;;  %v914_v60 = vmul.f32 %v909_v41, %v900_v54  ;;  %v2419_v41 = vld [vmem:[%s3332_s5 + $0x24c] ss:$36 sps:$4 sm:$0xff]   ;;  %v2439_v58 = vld [vmem:[%s3332_s5 + $0x60] ss:$36 sps:$4 sm:$0xff]  }
 0x284   :  { %v2438_v53 = vld [vmem:[%s3332_s5 + $0xac] ss:$36 sps:$4 sm:$0xff]  }
 0x285   :  { %v927_v3 = vadd.f32 %v923_v63, %v913_v59  ;;  %v928_v4 = vadd.f32 %v923_v63, %v914_v60  ;;  %v2436_v54 = vld [vmem:[%s3332_s5 + $0xa8] ss:$36 sps:$4 sm:$0xff]   ;;  %v2444_v59 = vld [vmem:[%s3332_s5 + $0x1c] ss:$36 sps:$4 sm:$0xff]  }
 0x286   :  { %v1054_v60 = vld [vmem:[%s3332_s5 + $0x378] sm:$0xff] }
 0x287   :  { %v3051_v5 = vpack.c.bf16 %v927_v3, %v925_v0  ;;  %v3053_v6 = vpack.c.bf16 %v928_v4, %v926_v2  ;;  %v2442_v63 = vld [vmem:[%s3332_s5 + $0x18] ss:$36 sps:$4 sm:$0xff]   ;;  %v2120_v0 = vcombine.high %v1054_v60, %v1054_v60  ;;  %v2119_v2 = vcombine.low %v1054_v60, %v1054_v60 }
 0x288   :  { %v2449_v4 = vld [vmem:[%s3332_s5 + $0x334] ss:$36 sps:$4 sm:$0xff]  }
 0x289   :  { %2123 = vmatprep.mubr.msk.bf16.mxu1 %vm863_vm1, %v3053_v6  ;;  %2127 = vmatprep.mubr.msk.bf16.mxu0 %vm863_vm1, %v3053_v6  ;;  %v1654_v3 = vsel %vm1634_vm2, %v2119_v2, 0 }
 0x28a   :  { %1695 = vmatmul.mubr.bf16.vlgmr.msra.gmra.mxu1 %v3051_v5  ;;  %1781 = vmatmul.mubr.bf16.vlgmr.msra.gmra.mxu0 %v3051_v5 }
 0x28b   :  { %1706 = vmatpush1.bf16.msra.mxu1 %v2370_v55  ;;  %1835 = vmatpush1.bf16.msra.mxu0 %v2373_v56  ;;  %v2452_v55 = vld [vmem:[%s3332_s5 + $0x2ec] ss:$36 sps:$4 sm:$0xff]  }
 0x28c   :  { %2125 = vmatprep.mubr.msk.bf16.mxu1 %vm863_vm1, %v3053_v6  ;;  %2130 = vmatprep.mubr.msk.bf16.mxu0 %vm863_vm1, %v3053_v6  ;;  %v2450_v56 = vld [vmem:[%s3332_s5 + $0x2e8] ss:$36 sps:$4 sm:$0xff]  }
 0x28d   :  { %1707 = vmatprep.subr.bf16.mxu1 %v2376_v61  ;;  %1836 = vmatprep.subr.bf16.mxu0 %v2463_v1  ;;  %v2455_v61 = vld [vmem:[%s3332_s5 + $0x2a4] ss:$36 sps:$4 sm:$0xff]  }
 0x28f   :  { %1708 = vmatpush1.bf16.msra.mxu1 %v2374_v62  ;;  %1837 = vmatpush1.bf16.msra.mxu0 %v2377_v7  ;;  %v2453_v62 = vld [vmem:[%s3332_s5 + $0x2a0] ss:$36 sps:$4 sm:$0xff]  }
 0x290   :  { %1709 = vmatprep.subr.bf16.mxu1 %v2380_v8  ;;  %1838 = vmatprep.subr.bf16.mxu0 %v2463_v1  ;;  %v2458_v7 = vld [vmem:[%s3332_s5 + $0x25c] ss:$36 sps:$4 sm:$0xff]  }
 0x291   :  { %v2456_v8 = vld [vmem:[%s3332_s5 + $0x258] ss:$36 sps:$4 sm:$0xff]  }
 0x293   :  { %1710 = vmatpush1.bf16.msra.mxu1 %v2378_v9  ;;  %1839 = vmatpush1.bf16.msra.mxu0 %v2381_v10 }
 0x294   :  { %1711 = vmatprep.subr.bf16.mxu1 %v2384_v11  ;;  %1840 = vmatprep.subr.bf16.mxu0 %v2463_v1 }
 0x297   :  { %1712 = vmatpush1.bf16.msra.mxu1 %v2382_v12  ;;  %1841 = vmatpush1.bf16.msra.mxu0 %v2385_v13 }
 0x298   :  { %1713 = vmatprep.subr.bf16.mxu1 %v2388_v14  ;;  %1842 = vmatprep.subr.bf16.mxu0 %v2463_v1 }
 0x29b   :  { %1714 = vmatpush1.bf16.msra.mxu1 %v2386_v15  ;;  %1843 = vmatpush1.bf16.msra.mxu0 %v2389_v16 }
 0x29c   :  { %1715 = vmatprep.subr.bf16.mxu1 %v2392_v17  ;;  %1844 = vmatprep.subr.bf16.mxu0 %v2463_v1 }
 0x29f   :  { %1716 = vmatpush1.bf16.msra.mxu1 %v2390_v18  ;;  %1845 = vmatpush1.bf16.msra.mxu0 %v2393_v19 }
 0x2a0   :  { %1717 = vmatprep.subr.bf16.mxu1 %v2396_v20  ;;  %1846 = vmatprep.subr.bf16.mxu0 %v2463_v1 }
 0x2a3   :  { %1718 = vmatpush1.bf16.msra.mxu1 %v2394_v21  ;;  %1847 = vmatpush1.bf16.msra.mxu0 %v2397_v22 }
 0x2a4   :  { %1719 = vmatprep.subr.bf16.mxu1 %v2400_v23  ;;  %1848 = vmatprep.subr.bf16.mxu0 %v2463_v1 }
 0x2a7   :  { %1720 = vmatpush1.bf16.msra.mxu1 %v2398_v25  ;;  %1849 = vmatpush1.bf16.msra.mxu0 %v2401_v26 }
 0x2a8   :  { %2124 = vmatprep.subr.msk.bf16.mxu1 %vm1634_vm2, %v2116_v27  ;;  %1856 = vmatprep.subr.bf16.mxu0 %v2463_v1 }
 0x2ab   :  { %1728 = vmatpush2.bf16.msra.mxu1 %v1642_v30  ;;  %1857 = vmatpush2.bf16.msra.mxu0 %v1660_v31 }
 0x2ac   :  { %1729 = vmatprep.subr.bf16.mxu1 %v2407_v32  ;;  %1858 = vmatprep.subr.bf16.mxu0 %v2463_v1 }
 0x2af   :  { %1730 = vmatpush2.bf16.msra.mxu1 %v2405_v33  ;;  %1859 = vmatpush2.bf16.msra.mxu0 %v2408_v34 }
 0x2b0   :  { %1731 = vmatprep.subr.bf16.mxu1 %v2411_v35  ;;  %1860 = vmatprep.subr.bf16.mxu0 %v2463_v1 }
 0x2b3   :  { %1732 = vmatpush2.bf16.msra.mxu1 %v2409_v36  ;;  %1861 = vmatpush2.bf16.msra.mxu0 %v2412_v37 }
 0x2b4   :  { %1733 = vmatprep.subr.bf16.mxu1 %v2415_v38  ;;  %1862 = vmatprep.subr.bf16.mxu0 %v2463_v1 }
 0x2b7   :  { %1734 = vmatpush2.bf16.msra.mxu1 %v2413_v39  ;;  %1863 = vmatpush2.bf16.msra.mxu0 %v2416_v40 }
 0x2b8   :  { %1735 = vmatprep.subr.bf16.mxu1 %v2419_v41  ;;  %1864 = vmatprep.subr.bf16.mxu0 %v2463_v1  ;;  %v2424_v1 = vld [vmem:[%s3332_s5 + $0x1c8] ss:$36 sps:$4 sm:$0xff]  }
 0x2bb   :  { %1736 = vmatpush2.bf16.msra.mxu1 %v2417_v42  ;;  %1865 = vmatpush2.bf16.msra.mxu0 %v2420_v43 }
 0x2bc   :  { %1791 = vmatprep.subr.bf16.mxu1 %v2423_v44 }
 0x2be   :  { %1738 = vmatmul.mubr.bf16.vlgmr.msra.gmra.mxu1 %v3051_v5  ;;  %1867 = vmatmul.mubr.bf16.vlgmr.msra.gmra.mxu0 %v3051_v5 }
 0x2bf   :  { %1792 = vmatpush1.bf16.msra.mxu1 %v2421_v45  ;;  %2129 = vmatprep.mubr.msk.bf16.mxu1 %vm863_vm1, %v3053_v6  ;;  %v2447_v6 = vld [vmem:[%s3332_s5 + $0x330] ss:$36 sps:$4 sm:$0xff]  }
 0x2c0   :  { %1793 = vmatprep.subr.bf16.mxu1 %v2426_v46 }
 0x2c3   :  { %1794 = vmatpush1.bf16.msra.mxu1 %v2424_v1 }
 0x2c4   :  { %1795 = vmatprep.subr.bf16.mxu1 %v2429_v47 }
 0x2c7   :  { %1796 = vmatpush1.bf16.msra.mxu1 %v2427_v48 }
 0x2c8   :  { %1797 = vmatprep.subr.bf16.mxu1 %v2432_v49 }
 0x2cb   :  { %1798 = vmatpush1.bf16.msra.mxu1 %v2430_v50 }
 0x2cc   :  { %1799 = vmatprep.subr.bf16.mxu1 %v2435_v51 }
 0x2cf   :  { %1800 = vmatpush1.bf16.msra.mxu1 %v2433_v52 }
 0x2d0   :  { %1801 = vmatprep.subr.bf16.mxu1 %v2438_v53 }
 0x2d3   :  { %1802 = vmatpush1.bf16.msra.mxu1 %v2436_v54 }
 0x2d4   :  { %1803 = vmatprep.subr.bf16.mxu1 %v2441_v57 }
 0x2d7   :  { %1804 = vmatpush1.bf16.msra.mxu1 %v2439_v58 }
 0x2d8   :  { %1805 = vmatprep.subr.bf16.mxu1 %v2444_v59 }
 0x2db   :  { %1806 = vmatpush1.bf16.msra.mxu1 %v2442_v63 }
 0x2dc   :  { %2128 = vmatprep.subr.msk.bf16.mxu1 %vm1634_vm2, %v2120_v0 }
 0x2df   :  { %1814 = vmatpush2.bf16.msra.mxu1 %v1654_v3 }
 0x2e0   :  { %1815 = vmatprep.subr.bf16.mxu1 %v2449_v4 }
 0x2e3   :  { %1816 = vmatpush2.bf16.msra.mxu1 %v2447_v6 }
 0x2e4   :  { %1817 = vmatprep.subr.bf16.mxu1 %v2452_v55 }
 0x2e7   :  { %1818 = vmatpush2.bf16.msra.mxu1 %v2450_v56 }
 0x2e8   :  { %1819 = vmatprep.subr.bf16.mxu1 %v2455_v61 }
 0x2eb   :  { %1820 = vmatpush2.bf16.msra.mxu1 %v2453_v62 }
 0x2ec   :  { %1821 = vmatprep.subr.bf16.mxu1 %v2458_v7 }
 0x2ef   :  { %1822 = vmatpush2.bf16.msra.mxu1 %v2456_v8 }
 0x2f2   :  { %1824 = vmatmul.mubr.bf16.vlgmr.msra.gmra.mxu1 %v3051_v5 }
 0x34a   :  { %v1696_v9 = vpop.f32.mrf.mxu1  ;;  %v1782_v10 = vpop.f32.mrf.mxu0 }
 0x34b   :  { %1875 = vst [vmem:[%s3333_s6] sm:$0xff] %v1696_v9  ;;  %1879 = vst [vmem:[%s3333_s6 + $0x20] sm:$0xff] %v1782_v10 }
 0x34c   :  { %v1698_v11 = vpop.f32.mrf.mxu1  ;;  %v1784_v12 = vpop.f32.mrf.mxu0 }
 0x34d   :  { %1876 = vst [vmem:[%s3333_s6 + $0x8] sm:$0xff] %v1698_v11  ;;  %1880 = vst [vmem:[%s3333_s6 + $0x28] sm:$0xff] %v1784_v12 }
 0x34e   :  { %v1700_v5 = vpop.f32.mrf.mxu1  ;;  %v1786_v13 = vpop.f32.mrf.mxu0 }
 0x34f   :  { %1884 = vst [vmem:[%s3333_s6 + $0x48] sm:$0xff] %v1700_v5  ;;  %1888 = vst [vmem:[%s3333_s6 + $0x68] sm:$0xff] %v1786_v13 }
 0x350   :  { %v1702_v14 = vpop.f32.mrf.mxu1  ;;  %v1788_v15 = vpop.f32.mrf.mxu0 }
 0x351   :  { %1885 = vst [vmem:[%s3333_s6 + $0x50] sm:$0xff] %v1702_v14  ;;  %1889 = vst [vmem:[%s3333_s6 + $0x70] sm:$0xff] %v1788_v15 }
 0x37e   :  { %v1739_v16 = vpop.f32.mrf.mxu1  ;;  %v1868_v17 = vpop.f32.mrf.mxu0 }
 0x37f   :  { %1877 = vst [vmem:[%s3333_s6 + $0x10] sm:$0xff] %v1739_v16  ;;  %1883 = vst [vmem:[%s3333_s6 + $0x40] sm:$0xff] %v1868_v17 }
 0x380   :  { %v1741_v18 = vpop.f32.mrf.mxu1  ;;  %v1870_v19 = vpop.f32.mrf.mxu0 }
 0x381   :  { %1878 = vst [vmem:[%s3333_s6 + $0x18] sm:$0xff] %v1741_v18 }
 0x382   :  { %v1743_v20 = vpop.f32.mrf.mxu1  ;;  %v1871_v21 = vpop.f32.mrf.mxu0 }
 0x383   :  { %1886 = vst [vmem:[%s3333_s6 + $0x58] sm:$0xff] %v1743_v20  ;;  %1892 = vst [vmem:[%s3333_s6 + $0x88] sm:$0xff] %v1871_v21 }
 0x384   :  { %v1745_v22 = vpop.f32.mrf.mxu1  ;;  %v1873_v23 = vpop.f32.mrf.mxu0 }
 0x385   :  { %1887 = vst [vmem:[%s3333_s6 + $0x60] sm:$0xff] %v1745_v22 }
 0x3b2   :  { %v1825_v24 = vpop.f32.mrf.mxu1 }
 0x3b3   :  { %1881 = vst [vmem:[%s3333_s6 + $0x30] sm:$0xff] %v1825_v24 }
 0x3b4   :  { %v1827_v25 = vpop.f32.mrf.mxu1 }
 0x3b5   :  { %1882 = vst [vmem:[%s3333_s6 + $0x38] sm:$0xff] %v1827_v25 }
 0x3b6   :  { %v1829_v26 = vpop.f32.mrf.mxu1 }
 0x3b7   :  { %1890 = vst [vmem:[%s3333_s6 + $0x78] sm:$0xff] %v1829_v26 }
 0x3b8   :  { %v1831_v27 = vpop.f32.mrf.mxu1 }
 0x3b9   :  { %1891 = vst [vmem:[%s3333_s6 + $0x80] sm:$0xff] %v1831_v27 }

// kernel: auto_enc_forward.8
= control target key start
LH: loop header
LB: loop body
LE: loop exit
PB: predicated region body
PF: predicated region fallthrough
CT: control target
= control target key end

     0   :  { %v669_v1 = vmov 0   ;;  %vm385_vm0 = vcmask 130048   ;;  %vm507_vm1 = vcmask 588800   ;;  %s906_s1 = inlined_call_operand.vmem [shape: bf16[400,200], index: 1, kind: input, shape index: {}]   ;;  %s907_s0 = inlined_call_operand.vmem [shape: bf16[32,400], index: 0, kind: input, shape index: {}]   ;;  %s908_s2 = inlined_call_operand.vmem [shape: f32[32,1], index: 2, kind: input, shape index: {}]   ;;  %s909_s3 = inlined_call_operand.vmem [shape: f32[32,200], index: 3, kind: output, shape index: {}]  }
   0x1   :  { %v582_v0 = vld [vmem:[%s906_s1 + $0x74] ss:$8 sps:$4 sm:$0xff]   ;;  %580 = vset.pattern.permute.xlu0 %v669_v1  ;;  %581 = vset.pattern.permute.xlu1 %v669_v1  ;;  %v584_v2 = vld [vmem:[%s906_s1 + $0x70] ss:$8 sps:$4 sm:$0xff]   ;;  %v585_v3 = vld [vmem:[%s906_s1 + $0x64] ss:$8 sps:$4 sm:$0xff]  }
   0x2   :  { %392 = vmatprep.subr.bf16.mxu0 %v582_v0  ;;  %v587_v4 = vld [vmem:[%s906_s1 + $0x60] ss:$8 sps:$4 sm:$0xff]   ;;  %v588_v5 = vld [vmem:[%s906_s1 + $0x54] ss:$8 sps:$4 sm:$0xff]   ;;  %v590_v6 = vld [vmem:[%s906_s1 + $0x50] ss:$8 sps:$4 sm:$0xff]  }
   0x3   :  { %393 = vmatpush1.bf16.msra.mxu0 %v584_v2  ;;  %v591_v7 = vld [vmem:[%s906_s1 + $0x44] ss:$8 sps:$4 sm:$0xff]   ;;  %v602_v8 = vld [vmem:[%s906_s1 + $0x174] ss:$8 sps:$4 sm:$0xff]   ;;  %v605_v9 = vld [vmem:[%s906_s1 + $0x170] ss:$8 sps:$4 sm:$0xff]  }
   0x4   :  { %394 = vmatprep.subr.bf16.mxu0 %v585_v3  ;;  %v593_v10 = vld [vmem:[%s906_s1 + $0x40] ss:$8 sps:$4 sm:$0xff]   ;;  %445 = vmatprep.subr.bf16.mxu1 %v602_v8  ;;  %v594_v11 = vld [vmem:[%s906_s1 + $0x34] ss:$8 sps:$4 sm:$0xff]   ;;  %v608_v12 = vld [vmem:[%s906_s1 + $0x164] ss:$8 sps:$4 sm:$0xff]  }
   0x5   :  { %446 = vmatpush1.bf16.msra.mxu1 %v605_v9  ;;  %v611_v13 = vld [vmem:[%s906_s1 + $0x160] ss:$8 sps:$4 sm:$0xff]   ;;  %v596_v14 = vld [vmem:[%s906_s1 + $0x30] ss:$8 sps:$4 sm:$0xff]   ;;  %v597_v15 = vld [vmem:[%s906_s1 + $0x24] ss:$8 sps:$4 sm:$0xff]  }
   0x6   :  { %447 = vmatprep.subr.bf16.mxu1 %v608_v12  ;;  %v614_v16 = vld [vmem:[%s906_s1 + $0x154] ss:$8 sps:$4 sm:$0xff]   ;;  %v617_v17 = vld [vmem:[%s906_s1 + $0x150] ss:$8 sps:$4 sm:$0xff]   ;;  %v620_v18 = vld [vmem:[%s906_s1 + $0x144] ss:$8 sps:$4 sm:$0xff]  }
   0x7   :  { %395 = vmatpush1.bf16.msra.mxu0 %v587_v4  ;;  %v599_v19 = vld [vmem:[%s906_s1 + $0x20] ss:$8 sps:$4 sm:$0xff]   ;;  %v600_v20 = vld [vmem:[%s906_s1 + $0x14] ss:$8 sps:$4 sm:$0xff]   ;;  %v604_v23 = vld [vmem:[%s906_s1 + $0x10] ss:$8 sps:$4 sm:$0xff]  }
   0x8   :  { %396 = vmatprep.subr.bf16.mxu0 %v588_v5  ;;  %v623_v21 = vld [vmem:[%s906_s1 + $0x140] ss:$8 sps:$4 sm:$0xff]   ;;  %v626_v22 = vld [vmem:[%s906_s1 + $0x134] ss:$8 sps:$4 sm:$0xff]   ;;  %v606_v24 = vld [vmem:[%s906_s1 + $0x4] ss:$8 sps:$4 sm:$0xff]  }
   0x9   :  { %448 = vmatpush1.bf16.msra.mxu1 %v611_v13  ;;  %v629_v25 = vld [vmem:[%s906_s1 + $0x130] ss:$8 sps:$4 sm:$0xff]   ;;  %v632_v26 = vld [vmem:[%s906_s1 + $0x124] ss:$8 sps:$4 sm:$0xff]   ;;  %v610_v27 = vld [vmem:[%s906_s1] ss:$8 sps:$4 sm:$0xff]  }
   0xa   :  { %449 = vmatprep.subr.bf16.mxu1 %v614_v16  ;;  %v612_v28 = vld [vmem:[%s906_s1 + $0xf4] ss:$8 sps:$4 sm:$0xff]   ;;  %v635_v29 = vld [vmem:[%s906_s1 + $0x120] ss:$8 sps:$4 sm:$0xff]   ;;  %v616_v31 = vld [vmem:[%s906_s1 + $0xf0] ss:$8 sps:$4 sm:$0xff]  }
   0xb   :  { %397 = vmatpush1.bf16.msra.mxu0 %v590_v6  ;;  %v638_v30 = vld [vmem:[%s906_s1 + $0x114] ss:$8 sps:$4 sm:$0xff]   ;;  %v618_v32 = vld [vmem:[%s906_s1 + $0xe4] ss:$8 sps:$4 sm:$0xff]   ;;  %v641_v33 = vld [vmem:[%s906_s1 + $0x110] ss:$8 sps:$4 sm:$0xff]  }
   0xc   :  { %398 = vmatprep.subr.bf16.mxu0 %v591_v7  ;;  %v644_v34 = vld [vmem:[%s906_s1 + $0x104] ss:$8 sps:$4 sm:$0xff]   ;;  %v622_v36 = vld [vmem:[%s906_s1 + $0xe0] ss:$8 sps:$4 sm:$0xff]   ;;  %v624_v37 = vld [vmem:[%s906_s1 + $0xd4] ss:$8 sps:$4 sm:$0xff]  }
   0xd   :  { %450 = vmatpush1.bf16.msra.mxu1 %v617_v17  ;;  %v656_v35 = vld [vmem:[%s907_s0 + $0xc] ss:$16 sps:$4 sm:$0xff]   ;;  %v662_v38 = vld [vmem:[%s907_s0 + $0x4] ss:$16 sps:$4 sm:$0xff]   ;;  %v647_v39 = vld [vmem:[%s906_s1 + $0x100] ss:$8 sps:$4 sm:$0xff]  }
   0xe   :  { %451 = vmatprep.subr.bf16.mxu1 %v620_v18  ;;  %577 = vmatprep.mubr.msk.bf16.mxu1 %vm385_vm0, %v656_v35  ;;  %v650_v40 = vld [vmem:[%s906_s1 + $0x184] ss:$8 sps:$4 sm:$0xff]   ;;  %v628_v42 = vld [vmem:[%s906_s1 + $0xd0] ss:$8 sps:$4 sm:$0xff]   ;;  %v653_v45 = vld [vmem:[%s906_s1 + $0x180] ss:$8 sps:$4 sm:$0xff]  }
   0xf   :  { %399 = vmatpush1.bf16.msra.mxu0 %v593_v10  ;;  %424 = vmatprep.mubr.bf16.mxu0 %v662_v38  ;;  %v73_v41 = vld [vmem:[%s908_s2] sm:$0xff]  ;;  %v75_v43 = vld [vmem:[%s908_s2 + $0x10] sm:$0xff]  ;;  %v74_v46 = vld [vmem:[%s908_s2 + $0x8] sm:$0xff] }
  0x10   :  { %400 = vmatprep.subr.bf16.mxu0 %v594_v11  ;;  %79 = vperm.xlu0 %580, %v73_v41   ;;  %v630_v44 = vld [vmem:[%s906_s1 + $0xc4] ss:$8 sps:$4 sm:$0xff]   ;;  %v76_v47 = vld [vmem:[%s908_s2 + $0x18] sm:$0xff]  ;;  %v634_v48 = vld [vmem:[%s906_s1 + $0xc0] ss:$8 sps:$4 sm:$0xff]  }
  0x11   :  { %452 = vmatpush1.bf16.msra.mxu1 %v623_v21  ;;  %89 = vperm.xlu1 %581, %v75_v43   ;;  %v654_v49 = vld [vmem:[%s907_s0 + $0x8] ss:$16 sps:$4 sm:$0xff]   ;;  %v636_v50 = vld [vmem:[%s906_s1 + $0xb4] ss:$8 sps:$4 sm:$0xff]   ;;  %v642_v53 = vld [vmem:[%s906_s1 + $0xa4] ss:$8 sps:$4 sm:$0xff]  }
  0x12   :  { %453 = vmatprep.subr.bf16.mxu1 %v626_v22  ;;  %v663_v51 = vld [vmem:[%s907_s0 + $0x2c] ss:$16 sps:$4 sm:$0xff]   ;;  %v640_v52 = vld [vmem:[%s906_s1 + $0xb0] ss:$8 sps:$4 sm:$0xff]   ;;  %v646_v54 = vld [vmem:[%s906_s1 + $0xa0] ss:$8 sps:$4 sm:$0xff]  }
  0x13   :  { %401 = vmatpush1.bf16.msra.mxu0 %v596_v14  ;;  %v665_v55 = vld [vmem:[%s907_s0 + $0x28] ss:$16 sps:$4 sm:$0xff]   ;;  %v648_v56 = vld [vmem:[%s906_s1 + $0x94] ss:$8 sps:$4 sm:$0xff]   ;;  %v657_v58 = vld [vmem:[%s906_s1 + $0x84] ss:$8 sps:$4 sm:$0xff]  }
  0x14   :  { %402 = vmatprep.subr.bf16.mxu0 %v597_v15  ;;  %84 = vperm.xlu0 %580, %v74_v46   ;;  %v652_v57 = vld [vmem:[%s906_s1 + $0x90] ss:$8 sps:$4 sm:$0xff]   ;;  %v659_v59 = vld [vmem:[%s906_s1 + $0x80] ss:$8 sps:$4 sm:$0xff]   ;;  %v666_v61 = vld [vmem:[%s907_s0 + $0x24] ss:$16 sps:$4 sm:$0xff]  }
  0x15   :  { %454 = vmatpush1.bf16.msra.mxu1 %v629_v25  ;;  %94 = vperm.xlu1 %581, %v76_v47   ;;  %v660_v60 = vld [vmem:[%s907_s0] ss:$16 sps:$4 sm:$0xff]  }
  0x16   :  { %455 = vmatprep.subr.bf16.mxu1 %v632_v26  ;;  %v668_v62 = vld [vmem:[%s907_s0 + $0x20] ss:$16 sps:$4 sm:$0xff]  }
  0x17   :  { %403 = vmatpush1.bf16.msra.mxu0 %v599_v19 }
  0x18   :  { %404 = vmatprep.subr.bf16.mxu0 %v600_v20 }
  0x19   :  { %456 = vmatpush1.bf16.msra.mxu1 %v635_v29 }
  0x1a   :  { %457 = vmatprep.subr.bf16.mxu1 %v638_v30 }
  0x1b   :  { %405 = vmatpush1.bf16.msra.mxu0 %v604_v23 }
  0x1c   :  { %406 = vmatprep.subr.bf16.mxu0 %v606_v24 }
  0x1d   :  { %458 = vmatpush1.bf16.msra.mxu1 %v641_v33 }
  0x1e   :  { %459 = vmatprep.subr.bf16.mxu1 %v644_v34 }
  0x1f   :  { %407 = vmatpush1.bf16.msra.mxu0 %v610_v27 }
  0x20   :  { %408 = vmatprep.subr.bf16.mxu0 %v612_v28 }
  0x21   :  { %460 = vmatpush1.bf16.msra.mxu1 %v647_v39 }
  0x22   :  { %475 = vmatprep.subr.bf16.mxu1 %v650_v40 }
  0x23   :  { %409 = vmatpush2.bf16.msra.mxu0 %v616_v31 }
  0x24   :  { %410 = vmatprep.subr.bf16.mxu0 %v618_v32 }
  0x25   :  { %476 = vmatpush2.bf16.msra.mxu1 %v653_v45 }
  0x27   :  { %411 = vmatpush2.bf16.msra.mxu0 %v622_v36 }
  0x28   :  { %412 = vmatprep.subr.bf16.mxu0 %v624_v37  ;;  %478 = vmatmul.mubr.bf16.vlgmr.msra.gmra.mxu1 %v654_v49 }
  0x29   :  { %578 = vmatprep.mubr.msk.bf16.mxu1 %vm385_vm0, %v663_v51 }
  0x2b   :  { %413 = vmatpush2.bf16.msra.mxu0 %v628_v42 }
  0x2c   :  { %414 = vmatprep.subr.bf16.mxu0 %v630_v44 }
  0x2f   :  { %415 = vmatpush2.bf16.msra.mxu0 %v634_v48 }
  0x30   :  { %416 = vmatprep.subr.bf16.mxu0 %v636_v50  ;;  %488 = vmatmul.mubr.bf16.gmra.mxu1 %v665_v55 }
  0x33   :  { %417 = vmatpush2.bf16.msra.mxu0 %v640_v52 }
  0x34   :  { %418 = vmatprep.subr.bf16.mxu0 %v642_v53 }
  0x37   :  { %419 = vmatpush2.bf16.msra.mxu0 %v646_v54 }
  0x38   :  { %420 = vmatprep.subr.bf16.mxu0 %v648_v56 }
  0x3b   :  { %421 = vmatpush2.bf16.msra.mxu0 %v652_v57 }
  0x3c   :  { %422 = vmatprep.subr.bf16.mxu0 %v657_v58 }
  0x3f   :  { %423 = vmatpush2.bf16.msra.mxu0 %v659_v59 }
  0x42   :  { %425 = vmatmul.mubr.bf16.vlgmr.msra.gmra.mxu0 %v660_v60 }
  0x43   :  { %434 = vmatprep.mubr.bf16.mxu0 %v666_v61 }
  0x4a   :  { %435 = vmatmul.mubr.bf16.gmra.mxu0 %v668_v62 }
  0x8b   :  { %v80_v1 = vpop.permute.xlu0 %79 }
  0x8c   :  { %v90_v15 = vpop.permute.xlu1 %89 }
  0x8f   :  { %v85_v7 = vpop.permute.xlu0 %84 }
  0x90   :  { %v95_v28 = vpop.permute.xlu1 %94 }
  0xe8   :  { %v479_v63 = vpop.f32.mrf.mxu1 }
  0xea   :  { %v481_v0 = vpop.f32.mrf.mxu1 }
  0xec   :  { %v483_v2 = vpop.f32.mrf.mxu1 }
  0xee   :  { %v485_v4 = vpop.f32.mrf.mxu1 }
  0xf0   :  { %v489_v11 = vpop.f32.mrf.mxu1 }
  0xf2   :  { %v491_v20 = vpop.f32.mrf.mxu1 }
  0xf4   :  { %v493_v30 = vpop.f32.mrf.mxu1 }
  0xf6   :  { %v495_v39 = vpop.f32.mrf.mxu1 }
 0x102   :  { %v426_v3 = vpop.f32.mrf.mxu0 }
 0x103   :  { %v427_v5 = vadd.f32 %v426_v3, %v80_v1 }
 0x104   :  { %v428_v6 = vpop.f32.mrf.mxu0 }
 0x105   :  { %v480_v8 = vadd.f32 %v479_v63, %v427_v5  ;;  %v429_v9 = vadd.f32 %v428_v6, %v80_v1 }
 0x106   :  { %v430_v10 = vpop.f32.mrf.mxu0 }
 0x107   :  { %v498_v12 = vmax.f32 %v480_v8, 0.0  ;;  %v482_v13 = vadd.f32 %v481_v0, %v429_v9  ;;  %v431_v14 = vadd.f32 %v430_v10, %v85_v7 }
 0x108   :  { %v432_v16 = vpop.f32.mrf.mxu0 }
 0x109   :  { %506 = vst [vmem:[%s909_s3] sm:$0xff] %v498_v12  ;;  %v499_v17 = vmax.f32 %v482_v13, 0.0  ;;  %v484_v18 = vadd.f32 %v483_v2, %v431_v14  ;;  %v433_v19 = vadd.f32 %v432_v16, %v85_v7 }
 0x10a   :  { %v436_v21 = vpop.f32.mrf.mxu0 }
 0x10b   :  { %508 = vst.msk [vmem:[%s909_s3 + $0x8] sm:$0xff] %vm507_vm1, %v499_v17  ;;  %v500_v22 = vmax.f32 %v484_v18, 0.0  ;;  %v486_v23 = vadd.f32 %v485_v4, %v433_v19  ;;  %v437_v24 = vadd.f32 %v436_v21, %v90_v15 }
 0x10c   :  { %v438_v25 = vpop.f32.mrf.mxu0 }
 0x10d   :  { %509 = vst [vmem:[%s909_s3 + $0x10] sm:$0xff] %v500_v22  ;;  %v501_v26 = vmax.f32 %v486_v23, 0.0  ;;  %v490_v27 = vadd.f32 %v489_v11, %v437_v24  ;;  %v439_v29 = vadd.f32 %v438_v25, %v90_v15 }
 0x10e   :  { %v440_v31 = vpop.f32.mrf.mxu0 }
 0x10f   :  { %510 = vst.msk [vmem:[%s909_s3 + $0x18] sm:$0xff] %vm507_vm1, %v501_v26  ;;  %v502_v32 = vmax.f32 %v490_v27, 0.0  ;;  %v492_v33 = vadd.f32 %v491_v20, %v439_v29  ;;  %v441_v34 = vadd.f32 %v440_v31, %v95_v28 }
 0x110   :  { %v442_v35 = vpop.f32.mrf.mxu0 }
 0x111   :  { %511 = vst [vmem:[%s909_s3 + $0x20] sm:$0xff] %v502_v32  ;;  %v503_v36 = vmax.f32 %v492_v33, 0.0  ;;  %v494_v37 = vadd.f32 %v493_v30, %v441_v34  ;;  %v443_v38 = vadd.f32 %v442_v35, %v95_v28 }
 0x113   :  { %512 = vst.msk [vmem:[%s909_s3 + $0x28] sm:$0xff] %vm507_vm1, %v503_v36  ;;  %v504_v40 = vmax.f32 %v494_v37, 0.0  ;;  %v496_v41 = vadd.f32 %v495_v39, %v443_v38 }
 0x115   :  { %513 = vst [vmem:[%s909_s3 + $0x30] sm:$0xff] %v504_v40  ;;  %v505_v42 = vmax.f32 %v496_v41, 0.0 }
 0x117   :  { %514 = vst.msk [vmem:[%s909_s3 + $0x38] sm:$0xff] %vm507_vm1, %v505_v42 }

// kernel: tile.13
= control target key start
LH: loop header
LB: loop body
LE: loop exit
PB: predicated region body
PF: predicated region fallthrough
CT: control target
= control target key end

     0   :  { %s22_s0 = inlined_call_operand.vmem [shape: f32[16], index: 0, kind: input, shape index: {}]   ;;  %s23_s1 = inlined_call_operand.vmem [shape: f32[4,16], index: 1, kind: output, shape index: {}]  }
   0x1   :  { %v4_v0 = vld [vmem:[%s22_s0] ss:$0 sm:$0xff] }
   0x2   :  { %5 = vst [vmem:[%s23_s1] sm:$0xf] %v4_v0 }

// kernel: tile.0
= control target key start
LH: loop header
LB: loop body
LE: loop exit
PB: predicated region body
PF: predicated region fallthrough
CT: control target
= control target key end

     0   :  { %s177_s8 = smov 125   ;;  %s178_s9 = smov 126   ;;  %vm8_vm0 = vcmask 7168   ;;  %s332_s0 = inlined_call_operand.vmem [shape: f32[4,16], index: 0, kind: input, shape index: {}]   ;;  %s333_s1 = inlined_call_operand.vmem [shape: f32[64,1], index: 1, kind: output, shape index: {}]  }
   0x1   :  { %v5_v0 = vld [vmem:[%s332_s0] sm:$0xf]  ;;  %s176_s0 = smov 127   ;;  %s179_s10 = smov 124  }
   0x2   :  { %6 = vst [vmem:[#allocation0] sm:$0xf] %v5_v0  ;;  %s180_s11 = smov 123   ;;  %s181_s12 = smov 122  }
   0x3   :  { %s182_s13 = smov 121   ;;  %s183_s14 = smov 120  }
   0x4   :  { %s184_s19 = smov 119   ;;  %s185_s20 = smov 118  }
   0x5   :  { %s186_s21 = smov 117   ;;  %s187_s22 = smov 116  }
   0x6   :  { %s188_s23 = smov 115   ;;  %s189_s24 = smov 114  }
   0x7   :  { %s190_s25 = smov 113  }
   0x9   :  { %v11_v1 = vld [vmem:[#allocation0] sm:$0xf]  }
   0xa   :  { %v27_v2 = vld [vmem:[#allocation0] sm:$0xf]   ;;  %12 = vrot.lane.b32.xlu0 %v11_v1, %s176_s0 }
   0xb   :  { %28 = vrot.lane.b32.xlu1 %v27_v2, %s177_s8  ;;  %v19_v3 = vld [vmem:[#allocation0] sm:$0xf]  }
   0xc   :  { %v35_v4 = vld [vmem:[#allocation0] sm:$0xf]  }
   0xd   :  { %v43_v5 = vld [vmem:[#allocation0] sm:$0xf]  }
   0xe   :  { %20 = vrot.lane.b32.xlu0 %v19_v3, %s178_s9  ;;  %v51_v6 = vld [vmem:[#allocation0] sm:$0xf]  }
   0xf   :  { %36 = vrot.lane.b32.xlu1 %v35_v4, %s179_s10  ;;  %v59_v7 = vld [vmem:[#allocation0] sm:$0xf]  }
  0x10   :  { %v67_v8 = vld [vmem:[#allocation0] sm:$0xf]  }
  0x11   :  { %v75_v9 = vld [vmem:[#allocation0] sm:$0xf]  }
  0x12   :  { %44 = vrot.lane.b32.xlu0 %v43_v5, %s180_s11  ;;  %v83_v10 = vld [vmem:[#allocation0] sm:$0xf]  }
  0x13   :  { %52 = vrot.lane.b32.xlu1 %v51_v6, %s181_s12  ;;  %v7_v11 = vld [vmem:[#allocation0] sm:$0xf]  }
  0x14   :  { %9 = vst.msk [vmem:[%s333_s1] ss:$16 sm:$0x3] %vm8_vm0, %v7_v11   ;;  %10 = vst.msk [vmem:[%s333_s1] ss:$16 sm:$0xc] %vm8_vm0, %v7_v11  }
  0x15   :  { %v91_v12 = vld [vmem:[#allocation0] sm:$0xf]  }
  0x16   :  { %60 = vrot.lane.b32.xlu0 %v59_v7, %s182_s13  ;;  %v99_v13 = vld [vmem:[#allocation0] sm:$0xf]  }
  0x17   :  { %68 = vrot.lane.b32.xlu1 %v67_v8, %s183_s14  ;;  %v107_v14 = vld [vmem:[#allocation0] sm:$0xf]  }
  0x18   :  { %v115_v15 = vld [vmem:[#allocation0] sm:$0xf]  }
  0x19   :  { %v123_v16 = vld [vmem:[#allocation0] sm:$0xf]  }
  0x1a   :  { %76 = vrot.lane.b32.xlu0 %v75_v9, %s184_s19 }
  0x1b   :  { %84 = vrot.lane.b32.xlu1 %v83_v10, %s185_s20 }
  0x1e   :  { %92 = vrot.lane.b32.xlu0 %v91_v12, %s186_s21 }
  0x1f   :  { %100 = vrot.lane.b32.xlu1 %v99_v13, %s187_s22 }
  0x22   :  { %108 = vrot.lane.b32.xlu0 %v107_v14, %s188_s23 }
  0x23   :  { %116 = vrot.lane.b32.xlu1 %v115_v15, %s189_s24 }
  0x26   :  { %124 = vrot.lane.b32.xlu0 %v123_v16, %s190_s25 }
  0x7c   :  { %v13_v17 = vpop.permute.xlu0 %12  }
  0x7d   :  { %v29_v18 = vpop.permute.xlu1 %28   ;;  %131 = vst.msk [vmem:[%s333_s1 + $0x1] ss:$16 sm:$0x3] %vm8_vm0, %v13_v17   ;;  %132 = vst.msk [vmem:[%s333_s1 + $0x1] ss:$16 sm:$0xc] %vm8_vm0, %v13_v17  }
  0x7e   :  { %135 = vst.msk [vmem:[%s333_s1 + $0x3] ss:$16 sm:$0x3] %vm8_vm0, %v29_v18   ;;  %136 = vst.msk [vmem:[%s333_s1 + $0x3] ss:$16 sm:$0xc] %vm8_vm0, %v29_v18  }
  0x80   :  { %v21_v19 = vpop.permute.xlu0 %20  }
  0x81   :  { %v37_v20 = vpop.permute.xlu1 %36   ;;  %133 = vst.msk [vmem:[%s333_s1 + $0x2] ss:$16 sm:$0x3] %vm8_vm0, %v21_v19   ;;  %134 = vst.msk [vmem:[%s333_s1 + $0x2] ss:$16 sm:$0xc] %vm8_vm0, %v21_v19  }
  0x82   :  { %137 = vst.msk [vmem:[%s333_s1 + $0x4] ss:$16 sm:$0x3] %vm8_vm0, %v37_v20   ;;  %138 = vst.msk [vmem:[%s333_s1 + $0x4] ss:$16 sm:$0xc] %vm8_vm0, %v37_v20  }
  0x84   :  { %v45_v21 = vpop.permute.xlu0 %44  }
  0x85   :  { %v53_v22 = vpop.permute.xlu1 %52   ;;  %139 = vst.msk [vmem:[%s333_s1 + $0x5] ss:$16 sm:$0x3] %vm8_vm0, %v45_v21   ;;  %140 = vst.msk [vmem:[%s333_s1 + $0x5] ss:$16 sm:$0xc] %vm8_vm0, %v45_v21  }
  0x86   :  { %141 = vst.msk [vmem:[%s333_s1 + $0x6] ss:$16 sm:$0x3] %vm8_vm0, %v53_v22   ;;  %142 = vst.msk [vmem:[%s333_s1 + $0x6] ss:$16 sm:$0xc] %vm8_vm0, %v53_v22  }
  0x88   :  { %v61_v23 = vpop.permute.xlu0 %60  }
  0x89   :  { %v69_v24 = vpop.permute.xlu1 %68   ;;  %143 = vst.msk [vmem:[%s333_s1 + $0x7] ss:$16 sm:$0x3] %vm8_vm0, %v61_v23   ;;  %144 = vst.msk [vmem:[%s333_s1 + $0x7] ss:$16 sm:$0xc] %vm8_vm0, %v61_v23  }
  0x8a   :  { %145 = vst.msk [vmem:[%s333_s1 + $0x8] ss:$16 sm:$0x3] %vm8_vm0, %v69_v24   ;;  %146 = vst.msk [vmem:[%s333_s1 + $0x8] ss:$16 sm:$0xc] %vm8_vm0, %v69_v24  }
  0x8c   :  { %v77_v25 = vpop.permute.xlu0 %76  }
  0x8d   :  { %v85_v26 = vpop.permute.xlu1 %84   ;;  %147 = vst.msk [vmem:[%s333_s1 + $0x9] ss:$16 sm:$0x3] %vm8_vm0, %v77_v25   ;;  %148 = vst.msk [vmem:[%s333_s1 + $0x9] ss:$16 sm:$0xc] %vm8_vm0, %v77_v25  }
  0x8e   :  { %149 = vst.msk [vmem:[%s333_s1 + $0xa] ss:$16 sm:$0x3] %vm8_vm0, %v85_v26   ;;  %150 = vst.msk [vmem:[%s333_s1 + $0xa] ss:$16 sm:$0xc] %vm8_vm0, %v85_v26  }
  0x90   :  { %v93_v27 = vpop.permute.xlu0 %92  }
  0x91   :  { %v101_v28 = vpop.permute.xlu1 %100   ;;  %151 = vst.msk [vmem:[%s333_s1 + $0xb] ss:$16 sm:$0x3] %vm8_vm0, %v93_v27   ;;  %152 = vst.msk [vmem:[%s333_s1 + $0xb] ss:$16 sm:$0xc] %vm8_vm0, %v93_v27  }
  0x92   :  { %153 = vst.msk [vmem:[%s333_s1 + $0xc] ss:$16 sm:$0x3] %vm8_vm0, %v101_v28   ;;  %154 = vst.msk [vmem:[%s333_s1 + $0xc] ss:$16 sm:$0xc] %vm8_vm0, %v101_v28  }
  0x94   :  { %v109_v29 = vpop.permute.xlu0 %108  }
  0x95   :  { %v117_v30 = vpop.permute.xlu1 %116   ;;  %155 = vst.msk [vmem:[%s333_s1 + $0xd] ss:$16 sm:$0x3] %vm8_vm0, %v109_v29   ;;  %156 = vst.msk [vmem:[%s333_s1 + $0xd] ss:$16 sm:$0xc] %vm8_vm0, %v109_v29  }
  0x96   :  { %157 = vst.msk [vmem:[%s333_s1 + $0xe] ss:$16 sm:$0x3] %vm8_vm0, %v117_v30   ;;  %158 = vst.msk [vmem:[%s333_s1 + $0xe] ss:$16 sm:$0xc] %vm8_vm0, %v117_v30  }
  0x98   :  { %v125_v31 = vpop.permute.xlu0 %124  }
  0x99   :  { %159 = vst.msk [vmem:[%s333_s1 + $0xf] ss:$16 sm:$0x3] %vm8_vm0, %v125_v31   ;;  %160 = vst.msk [vmem:[%s333_s1 + $0xf] ss:$16 sm:$0xc] %vm8_vm0, %v125_v31  }

// kernel: auto_enc_forward.9
= control target key start
LH: loop header
LB: loop body
LE: loop exit
PB: predicated region body
PF: predicated region fallthrough
CT: control target
= control target key end

     0   :  { %v1063_v1 = vmov 0   ;;  %vm499_vm0 = vcmask 261120   ;;  %s1478_s1 = inlined_call_operand.vmem [shape: bf16[288,288], index: 1, kind: input, shape index: {}]   ;;  %s1479_s0 = inlined_call_operand.vmem [shape: bf16[64,288], index: 0, kind: input, shape index: {}]   ;;  %s1480_s2 = inlined_call_operand.vmem [shape: f32[64,1], index: 2, kind: input, shape index: {}]   ;;  %s1481_s3 = inlined_call_operand.vmem [shape: f32[64,288], index: 3, kind: output, shape index: {}]  }
   0x1   :  { %v975_v0 = vld [vmem:[%s1478_s1 + $0xac] ss:$12 sps:$4 sm:$0xff]   ;;  %617 = vmatprep.mubr.bf16.mxu1 %v1063_v1  ;;  %973 = vset.pattern.permute.xlu0 %v1063_v1  ;;  %v977_v2 = vld [vmem:[%s1478_s1 + $0x19c] ss:$12 sps:$4 sm:$0xff]   ;;  %v981_v5 = vld [vmem:[%s1478_s1 + $0x94] ss:$12 sps:$4 sm:$0xff]  }
   0x2   :  { %974 = vset.pattern.permute.xlu1 %v1063_v1  ;;  %512 = vmatprep.subr.bf16.mxu0 %v975_v0  ;;  %v979_v3 = vld [vmem:[%s1478_s1 + $0xa8] ss:$12 sps:$4 sm:$0xff]   ;;  %v980_v4 = vld [vmem:[%s1478_s1 + $0x198] ss:$12 sps:$4 sm:$0xff]   ;;  %v985_v7 = vld [vmem:[%s1478_s1 + $0x90] ss:$12 sps:$4 sm:$0xff]  }
   0x3   :  { %597 = vmatprep.subr.bf16.mxu1 %v977_v2  ;;  %513 = vmatpush1.bf16.msra.mxu0 %v979_v3  ;;  %v983_v6 = vld [vmem:[%s1478_s1 + $0x184] ss:$12 sps:$4 sm:$0xff]   ;;  %v986_v8 = vld [vmem:[%s1478_s1 + $0x180] ss:$12 sps:$4 sm:$0xff]   ;;  %v987_v9 = vld [vmem:[%s1478_s1 + $0x7c] ss:$12 sps:$4 sm:$0xff]  }
   0x4   :  { %598 = vmatpush1.bf16.msra.mxu1 %v980_v4  ;;  %514 = vmatprep.subr.bf16.mxu0 %v981_v5  ;;  %v1117_v10 = vld [vmem:[%s1479_s0 + $0x8] ss:$12 sps:$4 sm:$0xff]   ;;  %v990_v11 = vld [vmem:[%s1478_s1 + $0x170] ss:$12 sps:$4 sm:$0xff]   ;;  %v991_v12 = vld [vmem:[%s1478_s1 + $0x78] ss:$12 sps:$4 sm:$0xff]  }
   0x5   :  { %599 = vmatprep.subr.bf16.mxu1 %v983_v6  ;;  %v992_v13 = vld [vmem:[%s1478_s1 + $0xb0] ss:$12 sps:$4 sm:$0xff]   ;;  %v995_v15 = vld [vmem:[%s1478_s1 + $0x158] ss:$12 sps:$4 sm:$0xff]   ;;  %v996_v16 = vld [vmem:[%s1478_s1 + $0x60] ss:$12 sps:$4 sm:$0xff]  }
   0x6   :  { %v993_v14 = vld [vmem:[%s1478_s1 + $0x64] ss:$12 sps:$4 sm:$0xff]   ;;  %v998_v18 = vld [vmem:[%s1478_s1 + $0x4c] ss:$12 sps:$4 sm:$0xff]   ;;  %v1002_v21 = vld [vmem:[%s1478_s1 + $0x48] ss:$12 sps:$4 sm:$0xff]  }
   0x7   :  { %515 = vmatpush1.bf16.msra.mxu0 %v985_v7  ;;  %v997_v17 = vld [vmem:[%s1478_s1 + $0x98] ss:$12 sps:$4 sm:$0xff]   ;;  %v1149_v19 = vld [vmem:[%s1479_s0 + $0x20] ss:$12 sps:$4 sm:$0xff]   ;;  %v1006_v24 = vld [vmem:[%s1478_s1 + $0x128] ss:$12 sps:$4 sm:$0xff]  }
   0x8   :  { %600 = vmatpush1.bf16.msra.mxu1 %v986_v8  ;;  %516 = vmatprep.subr.bf16.mxu0 %v987_v9  ;;  %v1001_v20 = vld [vmem:[%s1478_s1 + $0x140] ss:$12 sps:$4 sm:$0xff]   ;;  %v1007_v25 = vld [vmem:[%s1478_s1 + $0x30] ss:$12 sps:$4 sm:$0xff]   ;;  %v1008_v26 = vld [vmem:[%s1478_s1 + $0x68] ss:$12 sps:$4 sm:$0xff]  }
   0x9   :  { %914 = vmatprep.subr.bf16.mxu1 %v990_v11  ;;  %v1003_v22 = vld [vmem:[%s1478_s1 + $0x80] ss:$12 sps:$4 sm:$0xff]   ;;  %v1009_v27 = vld [vmem:[%s1478_s1 + $0x1c] ss:$12 sps:$4 sm:$0xff]   ;;  %v1181_v28 = vld [vmem:[%s1479_s0 + $0x38] ss:$12 sps:$4 sm:$0xff]  }
   0xa   :  { %v1004_v23 = vld [vmem:[%s1478_s1 + $0x34] ss:$12 sps:$4 sm:$0xff]   ;;  %v1012_v29 = vld [vmem:[%s1478_s1 + $0x110] ss:$12 sps:$4 sm:$0xff]   ;;  %v1013_v30 = vld [vmem:[%s1478_s1 + $0x18] ss:$12 sps:$4 sm:$0xff]  }
   0xb   :  { %906 = vmatmul.mubr.msk.bf16.vlgmr.msra.gmra.mxu1 %vm499_vm0, %v1117_v10  ;;  %517 = vmatpush1.bf16.msra.mxu0 %v991_v12  ;;  %v1014_v31 = vld [vmem:[%s1478_s1 + $0x50] ss:$12 sps:$4 sm:$0xff]   ;;  %v1017_v33 = vld [vmem:[%s1478_s1 + $0xf8] ss:$12 sps:$4 sm:$0xff]   ;;  %v1018_v34 = vld [vmem:[%s1478_s1] ss:$12 sps:$4 sm:$0xff]  }
   0xc   :  { %915 = vmatpush3.bf16.msra.mxu1 %v992_v13  ;;  %518 = vmatprep.subr.bf16.mxu0 %v993_v14  ;;  %v1015_v32 = vld [vmem:[%s1478_s1 + $0x4] ss:$12 sps:$4 sm:$0xff]   ;;  %v1020_v36 = vld [vmem:[%s1478_s1 + $0x16c] ss:$12 sps:$4 sm:$0xff]   ;;  %v1024_v39 = vld [vmem:[%s1478_s1 + $0x168] ss:$12 sps:$4 sm:$0xff]  }
   0xd   :  { %916 = vmatprep.subr.bf16.mxu1 %v995_v15  ;;  %627 = vmatprep.mubr.bf16.mxu1 %v1063_v1  ;;  %v1019_v35 = vld [vmem:[%s1478_s1 + $0x38] ss:$12 sps:$4 sm:$0xff]   ;;  %v1213_v37 = vld [vmem:[%s1479_s0 + $0x50] ss:$12 sps:$4 sm:$0xff]   ;;  %v1023_v38 = vld [vmem:[%s1478_s1 + $0xe0] ss:$12 sps:$4 sm:$0xff]  }
   0xe   :  { %v1025_v40 = vld [vmem:[%s1478_s1 + $0x20] ss:$12 sps:$4 sm:$0xff]   ;;  %v1028_v42 = vld [vmem:[%s1478_s1 + $0xc8] ss:$12 sps:$4 sm:$0xff]   ;;  %v1029_v43 = vld [vmem:[%s1478_s1 + $0x150] ss:$12 sps:$4 sm:$0xff]  }
   0xf   :  { %519 = vmatpush1.bf16.msra.mxu0 %v996_v16  ;;  %v1026_v41 = vld [vmem:[%s1478_s1 + $0x154] ss:$12 sps:$4 sm:$0xff]   ;;  %v1033_v45 = vld [vmem:[%s1479_s0 + $0x4] ss:$12 sps:$4 sm:$0xff]   ;;  %v1034_v46 = vld [vmem:[%s1478_s1 + $0x13c] ss:$12 sps:$4 sm:$0xff]  }
  0x10   :  { %917 = vmatpush3.bf16.msra.mxu1 %v997_v17  ;;  %520 = vmatprep.subr.bf16.mxu0 %v998_v18  ;;  %v1030_v44 = vld [vmem:[%s1478_s1 + $0x8] ss:$12 sps:$4 sm:$0xff]   ;;  %v1031_v47 = vld [vmem:[%s1479_s0] ss:$12 sps:$4 sm:$0xff]   ;;  %v1036_v48 = vld [vmem:[%s1478_s1 + $0x138] ss:$12 sps:$4 sm:$0xff]  }
  0x11   :  { %918 = vmatprep.subr.bf16.mxu1 %v1001_v20  ;;  %544 = vmatprep.mubr.bf16.mxu0 %v1033_v45  ;;  %v1040_v49 = vld [vmem:[%s1479_s0 + $0x1c] ss:$12 sps:$4 sm:$0xff]   ;;  %v1037_v50 = vld [vmem:[%s1478_s1 + $0x124] ss:$12 sps:$4 sm:$0xff]   ;;  %v1046_v51 = vld [vmem:[%s1478_s1 + $0x1a0] ss:$12 sps:$4 sm:$0xff]  }
  0x12   :  { %v1039_v52 = vld [vmem:[%s1478_s1 + $0x120] ss:$12 sps:$4 sm:$0xff]   ;;  %v1044_v54 = vld [vmem:[%s1479_s0 + $0x18] ss:$12 sps:$4 sm:$0xff]   ;;  %v1045_v55 = vld [vmem:[%s1478_s1 + $0x108] ss:$12 sps:$4 sm:$0xff]  }
  0x13   :  { %907 = vmatmul.mubr.msk.bf16.gmra.mxu1 %vm499_vm0, %v1149_v19  ;;  %521 = vmatpush1.bf16.msra.mxu0 %v1002_v21  ;;  %v1042_v53 = vld [vmem:[%s1478_s1 + $0x10c] ss:$12 sps:$4 sm:$0xff]   ;;  %v1050_v56 = vld [vmem:[%s1479_s0 + $0x34] ss:$12 sps:$4 sm:$0xff]   ;;  %v1049_v60 = vld [vmem:[%s1478_s1 + $0xf0] ss:$12 sps:$4 sm:$0xff]  }
  0x14   :  { %919 = vmatpush3.bf16.msra.mxu1 %v1003_v22  ;;  %522 = vmatprep.subr.bf16.mxu0 %v1004_v23  ;;  %v1047_v57 = vld [vmem:[%s1478_s1 + $0xf4] ss:$12 sps:$4 sm:$0xff]   ;;  %v1052_v62 = vld [vmem:[%s1478_s1 + $0xdc] ss:$12 sps:$4 sm:$0xff]   ;;  %v1059_v2 = vld [vmem:[%s1479_s0 + $0x4c] ss:$12 sps:$4 sm:$0xff]  }
  0x15   :  { %920 = vmatprep.subr.bf16.mxu1 %v1006_v24  ;;  %637 = vmatprep.mubr.bf16.mxu1 %v1063_v1  ;;  %v1062_v58 = vld [vmem:[%s1478_s1 + $0x188] ss:$12 sps:$4 sm:$0xff]   ;;  %v103_v59 = vld [vmem:[%s1480_s2] sm:$0xff]  ;;  %v1054_v63 = vld [vmem:[%s1479_s0 + $0x30] ss:$12 sps:$4 sm:$0xff]  }
  0x16   :  { %v105_v61 = vld [vmem:[%s1480_s2 + $0x10] sm:$0xff]  ;;  %113 = vperm.xlu0 %973, %v103_v59   ;;  %v104_v0 = vld [vmem:[%s1480_s2 + $0x8] sm:$0xff]  ;;  %v106_v3 = vld [vmem:[%s1480_s2 + $0x18] sm:$0xff] }
  0x17   :  { %523 = vmatpush1.bf16.msra.mxu0 %v1007_v25  ;;  %123 = vperm.xlu1 %974, %v105_v61   ;;  %v1056_v4 = vld [vmem:[%s1478_s1 + $0xc4] ss:$12 sps:$4 sm:$0xff]   ;;  %v1058_v6 = vld [vmem:[%s1478_s1 + $0xc0] ss:$12 sps:$4 sm:$0xff]   ;;  %v1061_v8 = vld [vmem:[%s1479_s0 + $0x48] ss:$12 sps:$4 sm:$0xff]  }
  0x18   :  { %921 = vmatpush3.bf16.msra.mxu1 %v1008_v26  ;;  %524 = vmatprep.subr.bf16.mxu0 %v1009_v27  ;;  %v107_v5 = vld [vmem:[%s1480_s2 + $0x20] sm:$0xff]  ;;  %v108_v7 = vld [vmem:[%s1480_s2 + $0x28] sm:$0xff]  ;;  %v109_v9 = vld [vmem:[%s1480_s2 + $0x30] sm:$0xff] }
  0x19   :  { %922 = vmatprep.subr.bf16.mxu1 %v1012_v29  ;;  %v110_v11 = vld [vmem:[%s1480_s2 + $0x38] sm:$0xff] }
  0x1a   :  { %118 = vperm.xlu0 %973, %v104_v0  }
  0x1b   :  { %908 = vmatmul.mubr.msk.bf16.gmra.mxu1 %vm499_vm0, %v1181_v28  ;;  %525 = vmatpush1.bf16.msra.mxu0 %v1013_v30 }
  0x1c   :  { %923 = vmatpush3.bf16.msra.mxu1 %v1014_v31  ;;  %526 = vmatprep.subr.bf16.mxu0 %v1015_v32 }
  0x1d   :  { %924 = vmatprep.subr.bf16.mxu1 %v1017_v33  ;;  %647 = vmatprep.mubr.bf16.mxu1 %v1063_v1  ;;  %v1055_v1 = vld [vmem:[%s1478_s1 + $0xd8] ss:$12 sps:$4 sm:$0xff]  }
  0x1e   :  { %128 = vperm.xlu1 %974, %v106_v3   ;;  %133 = vperm.xlu0 %973, %v107_v5  }
  0x1f   :  { %527 = vmatpush1.bf16.msra.mxu0 %v1018_v34 }
  0x20   :  { %925 = vmatpush3.bf16.msra.mxu1 %v1019_v35  ;;  %528 = vmatprep.subr.bf16.mxu0 %v1020_v36 }
  0x21   :  { %926 = vmatprep.subr.bf16.mxu1 %v1023_v38 }
  0x22   :  { %138 = vperm.xlu1 %974, %v108_v7   ;;  %143 = vperm.xlu0 %973, %v109_v9  }
  0x23   :  { %909 = vmatmul.mubr.msk.bf16.gmra.mxu1 %vm499_vm0, %v1213_v37  ;;  %529 = vmatpush2.bf16.msra.mxu0 %v1024_v39 }
  0x24   :  { %927 = vmatpush3.bf16.msra.mxu1 %v1025_v40  ;;  %530 = vmatprep.subr.bf16.mxu0 %v1026_v41 }
  0x25   :  { %928 = vmatprep.subr.bf16.mxu1 %v1028_v42  ;;  %690 = vmatprep.mubr.bf16.mxu1 %v1033_v45 }
  0x26   :  { %148 = vperm.xlu1 %974, %v110_v11  }
  0x27   :  { %531 = vmatpush2.bf16.msra.mxu0 %v1029_v43 }
  0x28   :  { %929 = vmatpush3.bf16.msra.mxu1 %v1030_v44  ;;  %532 = vmatprep.subr.bf16.mxu0 %v1034_v46 }
  0x29   :  { %960 = vmatprep.subr.bf16.mxu1 %v1046_v51 }
  0x2b   :  { %691 = vmatmul.mubr.bf16.vlgmr.msra.gmra.mxu1 %v1031_v47  ;;  %533 = vmatpush2.bf16.msra.mxu0 %v1036_v48 }
  0x2c   :  { %698 = vmatprep.mubr.bf16.mxu1 %v1040_v49  ;;  %534 = vmatprep.subr.bf16.mxu0 %v1037_v50 }
  0x2d   :  { %961 = vmatpush3.bf16.msra.mxu1 %v1046_v51 }
  0x2e   :  { %962 = vmatprep.subr.bf16.mxu1 %v1062_v58 }
  0x2f   :  { %535 = vmatpush2.bf16.msra.mxu0 %v1039_v52 }
  0x30   :  { %536 = vmatprep.subr.bf16.mxu0 %v1042_v53 }
  0x31   :  { %963 = vmatpush3.bf16.msra.mxu1 %v1062_v58 }
  0x33   :  { %699 = vmatmul.mubr.bf16.gmra.mxu1 %v1044_v54  ;;  %537 = vmatpush2.bf16.msra.mxu0 %v1045_v55 }
  0x34   :  { %706 = vmatprep.mubr.bf16.mxu1 %v1050_v56  ;;  %538 = vmatprep.subr.bf16.mxu0 %v1047_v57 }
  0x37   :  { %539 = vmatpush2.bf16.msra.mxu0 %v1049_v60 }
  0x38   :  { %540 = vmatprep.subr.bf16.mxu0 %v1052_v62 }
  0x3b   :  { %707 = vmatmul.mubr.bf16.gmra.mxu1 %v1054_v63  ;;  %541 = vmatpush2.bf16.msra.mxu0 %v1055_v1 }
  0x3c   :  { %714 = vmatprep.mubr.bf16.mxu1 %v1059_v2  ;;  %542 = vmatprep.subr.bf16.mxu0 %v1056_v4 }
  0x3f   :  { %543 = vmatpush2.bf16.msra.mxu0 %v1058_v6 }
  0x42   :  { %545 = vmatmul.mubr.bf16.vlgmr.msra.gmra.mxu0 %v1031_v47 }
  0x43   :  { %715 = vmatmul.mubr.bf16.gmra.mxu1 %v1061_v8  ;;  %554 = vmatprep.mubr.bf16.mxu0 %v1040_v49 }
  0x44   :  { %964 = vmatprep.mubr.msk.bf16.mxu1 %vm499_vm0, %v1117_v10 }
  0x4a   :  { %555 = vmatmul.mubr.bf16.gmra.mxu0 %v1044_v54 }
  0x4b   :  { %965 = vmatmul.mubr.msk.bf16.vlgmr.msra.gmra.mxu1 %vm499_vm0, %v1149_v19  ;;  %564 = vmatprep.mubr.bf16.mxu0 %v1050_v56 }
  0x4c   :  { %968 = vmatprep.mubr.msk.bf16.mxu1 %vm499_vm0, %v1181_v28 }
  0x52   :  { %565 = vmatmul.mubr.bf16.gmra.mxu0 %v1054_v63 }
  0x53   :  { %969 = vmatmul.mubr.msk.bf16.gmra.mxu1 %vm499_vm0, %v1213_v37  ;;  %574 = vmatprep.mubr.bf16.mxu0 %v1059_v2 }
  0x5a   :  { %575 = vmatmul.mubr.bf16.gmra.mxu0 %v1061_v8 }
  0x91   :  { %v114_v38 = vpop.permute.xlu0 %113 }
  0x92   :  { %v124_v42 = vpop.permute.xlu1 %123 }
  0x95   :  { %v119_v47 = vpop.permute.xlu0 %118 }
  0x99   :  { %v129_v59 = vpop.permute.xlu1 %128  ;;  %v1367_v61 = vpop.permute.xlu0 %133 }
  0xcb   :  { %v619_v12 = vpop.f32.mrf.mxu1 }
  0xcd   :  { %v621_v13 = vpop.f32.mrf.mxu1 }
  0xcf   :  { %v623_v14 = vpop.f32.mrf.mxu1 }
  0xd1   :  { %v625_v15 = vpop.f32.mrf.mxu1 }
  0xd3   :  { %v1336_v10 = vpop.f32.mrf.mxu1 }
  0xd5   :  { %v1338_v16 = vpop.f32.mrf.mxu1 }
  0xd7   :  { %v1340_v17 = vpop.f32.mrf.mxu1 }
  0xd9   :  { %v1342_v18 = vpop.f32.mrf.mxu1 }
  0xdb   :  { %v1344_v19 = vpop.f32.mrf.mxu1 }
  0xdd   :  { %v1346_v20 = vpop.f32.mrf.mxu1 }
  0xdf   :  { %v1348_v21 = vpop.f32.mrf.mxu1 }
  0xe1   :  { %v1350_v22 = vpop.f32.mrf.mxu1 }
  0xe3   :  { %v1352_v23 = vpop.f32.mrf.mxu1 }
  0xe5   :  { %v1354_v24 = vpop.f32.mrf.mxu1 }
  0xe7   :  { %v1356_v25 = vpop.f32.mrf.mxu1 }
  0xe9   :  { %v1358_v26 = vpop.f32.mrf.mxu1 }
  0xeb   :  { %v930_v27 = vpop.f32.mrf.mxu1 }
  0xed   :  { %v931_v28 = vpop.f32.mrf.mxu1 }
  0xee   :  { %v932_v55 = vadd.f32 %v931_v28, %v930_v27  ;;  %v1372_v27 = vpop.permute.xlu1 %138 }
  0xef   :  { %v933_v29 = vpop.f32.mrf.mxu1 }
  0xf0   :  { %v693_v11 = vadd.f32 %v932_v55, %v114_v38 }
  0xf1   :  { %v934_v30 = vpop.f32.mrf.mxu1 }
  0xf2   :  { %v935_v1 = vadd.f32 %v934_v30, %v933_v29 }
  0xf3   :  { %v936_v31 = vpop.f32.mrf.mxu1 }
  0xf5   :  { %v937_v32 = vpop.f32.mrf.mxu1 }
  0xf6   :  { %v938_v46 = vadd.f32 %v937_v32, %v936_v31  ;;  %v1378_v31 = vpop.permute.xlu0 %143 }
  0xf7   :  { %v939_v33 = vpop.f32.mrf.mxu1 }
  0xf8   :  { %v701_v0 = vadd.f32 %v938_v46, %v124_v42 }
  0xf9   :  { %v940_v34 = vpop.f32.mrf.mxu1 }
  0xfa   :  { %v941_v56 = vadd.f32 %v940_v34, %v939_v33  ;;  %v696_v34 = vadd.f32 %v935_v1, %v119_v47 }
  0xfb   :  { %v942_v35 = vpop.f32.mrf.mxu1 }
  0xfd   :  { %v943_v36 = vpop.f32.mrf.mxu1 }
  0xff   :  { %v1360_v37 = vpop.f32.mrf.mxu1 }
 0x101   :  { %v1362_v39 = vpop.f32.mrf.mxu1 }
 0x102   :  { %v546_v40 = vpop.f32.mrf.mxu0 }
 0x103   :  { %v948_v41 = vpop.f32.mrf.mxu1  ;;  %v547_v43 = vadd.f32 %v546_v40, %v114_v38 }
 0x104   :  { %v548_v44 = vpop.f32.mrf.mxu0 }
 0x105   :  { %v949_v45 = vpop.f32.mrf.mxu1  ;;  %v620_v48 = vadd.f32 %v619_v12, %v547_v43  ;;  %v549_v49 = vadd.f32 %v548_v44, %v114_v38 }
 0x106   :  { %v550_v50 = vpop.f32.mrf.mxu0  ;;  %v950_v8 = vadd.f32 %v949_v45, %v948_v41 }
 0x107   :  { %v951_v51 = vpop.f32.mrf.mxu1  ;;  %v788_v52 = vmax.f32 %v620_v48, 0.0  ;;  %v622_v53 = vadd.f32 %v621_v13, %v549_v49  ;;  %v551_v54 = vadd.f32 %v550_v50, %v119_v47  ;;  %v704_v13 = vadd.f32 %v941_v56, %v129_v59  ;;  %v1392_v49 = vpop.permute.xlu1 %148 }
 0x108   :  { %v552_v57 = vpop.f32.mrf.mxu0  ;;  %v717_v45 = vadd.f32 %v950_v8, %v1378_v31  ;;  %v947_v56 = vadd.f32 %v1362_v39, %v1360_v37 }
 0x109   :  { %v952_v58 = vpop.f32.mrf.mxu1  ;;  %812 = vst [vmem:[%s1481_s3] sm:$0xff] %v788_v52  ;;  %v789_v60 = vmax.f32 %v622_v53, 0.0  ;;  %v624_v62 = vadd.f32 %v623_v14, %v551_v54  ;;  %v553_v63 = vadd.f32 %v552_v57, %v119_v47 }
 0x10a   :  { %v556_v2 = vpop.f32.mrf.mxu0  ;;  %v953_v43 = vadd.f32 %v952_v58, %v951_v51 }
 0x10b   :  { %v966_v3 = vpop.f32.mrf.mxu1  ;;  %813 = vst [vmem:[%s1481_s3 + $0x8] sm:$0xff] %v789_v60  ;;  %v791_v4 = vmax.f32 %v624_v62, 0.0  ;;  %v626_v5 = vadd.f32 %v625_v15, %v553_v63  ;;  %v557_v6 = vadd.f32 %v556_v2, %v124_v42 }
 0x10c   :  { %v766_v7 = vadd.f32 %v966_v3, %v701_v0  ;;  %v558_v9 = vpop.f32.mrf.mxu0  ;;  %v720_v57 = vadd.f32 %v953_v43, %v1392_v49 }
 0x10d   :  { %v757_v12 = vpop.f32.mrf.mxu1  ;;  %815 = vst [vmem:[%s1481_s3 + $0x18] sm:$0xff] %v791_v4  ;;  %v792_v14 = vmax.f32 %v626_v5, 0.0  ;;  %v630_v28 = vadd.f32 %v1336_v10, %v557_v6  ;;  %v559_v30 = vadd.f32 %v558_v9, %v124_v42  ;;  %v944_v42 = vadd.f32 %v943_v36, %v942_v35 }
 0x10e   :  { %v796_v29 = vmax.f32 %v766_v7, 0.0  ;;  %v758_v15 = vadd.f32 %v757_v12, %v693_v11  ;;  %v560_v32 = vpop.f32.mrf.mxu0  ;;  %v712_v7 = vadd.f32 %v947_v56, %v1372_v27 }
 0x10f   :  { %v967_v33 = vpop.f32.mrf.mxu1  ;;  %816 = vst [vmem:[%s1481_s3 + $0x20] sm:$0xff] %v792_v14  ;;  %v794_v38 = vmax.f32 %v630_v28, 0.0  ;;  %v632_v10 = vadd.f32 %v1338_v16, %v559_v30  ;;  %v561_v40 = vadd.f32 %v560_v32, %v129_v59  ;;  %v709_v60 = vadd.f32 %v944_v42, %v1367_v61 }
 0x110   :  { %820 = vst.msk [vmem:[%s1481_s3 + $0x40] sm:$0xff] %vm499_vm0, %v796_v29  ;;  %v769_v41 = vadd.f32 %v967_v33, %v704_v13  ;;  %v790_v44 = vmax.f32 %v758_v15, 0.0  ;;  %v562_v46 = vpop.f32.mrf.mxu0 }
 0x111   :  { %v760_v47 = vpop.f32.mrf.mxu1  ;;  %818 = vst [vmem:[%s1481_s3 + $0x30] sm:$0xff] %v794_v38  ;;  %v795_v48 = vmax.f32 %v632_v10, 0.0  ;;  %v634_v50 = vadd.f32 %v1340_v17, %v561_v40  ;;  %v563_v16 = vadd.f32 %v562_v46, %v129_v59 }
 0x112   :  { %v799_v52 = vmax.f32 %v769_v41, 0.0  ;;  %814 = vst.msk [vmem:[%s1481_s3 + $0x10] sm:$0xff] %vm499_vm0, %v790_v44  ;;  %v761_v35 = vadd.f32 %v760_v47, %v696_v34  ;;  %v566_v36 = vpop.f32.mrf.mxu0 }
 0x113   :  { %v970_v51 = vpop.f32.mrf.mxu1  ;;  %819 = vst [vmem:[%s1481_s3 + $0x38] sm:$0xff] %v795_v48  ;;  %v797_v53 = vmax.f32 %v634_v50, 0.0  ;;  %v636_v17 = vadd.f32 %v1342_v18, %v563_v16  ;;  %v567_v54 = vadd.f32 %v566_v36, %v1367_v61 }
 0x114   :  { %823 = vst.msk [vmem:[%s1481_s3 + $0x58] sm:$0xff] %vm499_vm0, %v799_v52  ;;  %v782_v55 = vadd.f32 %v970_v51, %v717_v45  ;;  %v793_v58 = vmax.f32 %v761_v35, 0.0  ;;  %v568_v59 = vpop.f32.mrf.mxu0 }
 0x115   :  { %v773_v62 = vpop.f32.mrf.mxu1  ;;  %821 = vst [vmem:[%s1481_s3 + $0x48] sm:$0xff] %v797_v53  ;;  %v798_v63 = vmax.f32 %v636_v17, 0.0  ;;  %v640_v18 = vadd.f32 %v1344_v19, %v567_v54  ;;  %v569_v1 = vadd.f32 %v568_v59, %v1367_v61 }
 0x116   :  { %v808_v0 = vmax.f32 %v782_v55, 0.0  ;;  %817 = vst.msk [vmem:[%s1481_s3 + $0x28] sm:$0xff] %vm499_vm0, %v793_v58  ;;  %v774_v37 = vadd.f32 %v773_v62, %v709_v60  ;;  %v570_v39 = vpop.f32.mrf.mxu0 }
 0x117   :  { %v971_v2 = vpop.f32.mrf.mxu1  ;;  %822 = vst [vmem:[%s1481_s3 + $0x50] sm:$0xff] %v798_v63  ;;  %v800_v3 = vmax.f32 %v640_v18, 0.0  ;;  %v642_v19 = vadd.f32 %v1346_v20, %v569_v1  ;;  %v571_v61 = vadd.f32 %v570_v39, %v1372_v27 }
 0x118   :  { %832 = vst.msk [vmem:[%s1481_s3 + $0xa0] sm:$0xff] %vm499_vm0, %v808_v0  ;;  %v785_v4 = vadd.f32 %v971_v2, %v720_v57  ;;  %v802_v5 = vmax.f32 %v774_v37, 0.0  ;;  %v572_v6 = vpop.f32.mrf.mxu0 }
 0x119   :  { %v776_v8 = vpop.f32.mrf.mxu1  ;;  %824 = vst [vmem:[%s1481_s3 + $0x60] sm:$0xff] %v800_v3  ;;  %v801_v9 = vmax.f32 %v642_v19, 0.0  ;;  %v644_v11 = vadd.f32 %v1348_v21, %v571_v61  ;;  %v573_v13 = vadd.f32 %v572_v6, %v1372_v27 }
 0x11a   :  { %v811_v12 = vmax.f32 %v785_v4, 0.0  ;;  %826 = vst.msk [vmem:[%s1481_s3 + $0x70] sm:$0xff] %vm499_vm0, %v802_v5  ;;  %v777_v20 = vadd.f32 %v776_v8, %v712_v7  ;;  %v576_v14 = vpop.f32.mrf.mxu0 }
 0x11b   :  { %825 = vst [vmem:[%s1481_s3 + $0x68] sm:$0xff] %v801_v9  ;;  %v803_v28 = vmax.f32 %v644_v11, 0.0  ;;  %v646_v21 = vadd.f32 %v1350_v22, %v573_v13  ;;  %v577_v27 = vadd.f32 %v576_v14, %v1378_v31 }
 0x11c   :  { %835 = vst.msk [vmem:[%s1481_s3 + $0xb8] sm:$0xff] %vm499_vm0, %v811_v12  ;;  %v805_v29 = vmax.f32 %v777_v20, 0.0  ;;  %v578_v30 = vpop.f32.mrf.mxu0 }
 0x11d   :  { %827 = vst [vmem:[%s1481_s3 + $0x78] sm:$0xff] %v803_v28  ;;  %v804_v15 = vmax.f32 %v646_v21, 0.0  ;;  %v650_v32 = vadd.f32 %v1352_v23, %v577_v27  ;;  %v579_v33 = vadd.f32 %v578_v30, %v1378_v31 }
 0x11e   :  { %829 = vst.msk [vmem:[%s1481_s3 + $0x88] sm:$0xff] %vm499_vm0, %v805_v29  ;;  %v580_v34 = vpop.f32.mrf.mxu0 }
 0x11f   :  { %828 = vst [vmem:[%s1481_s3 + $0x80] sm:$0xff] %v804_v15  ;;  %v806_v22 = vmax.f32 %v650_v32, 0.0  ;;  %v652_v38 = vadd.f32 %v1354_v24, %v579_v33  ;;  %v581_v10 = vadd.f32 %v580_v34, %v1392_v49 }
 0x120   :  { %v582_v40 = vpop.f32.mrf.mxu0 }
 0x121   :  { %830 = vst [vmem:[%s1481_s3 + $0x90] sm:$0xff] %v806_v22  ;;  %v807_v23 = vmax.f32 %v652_v38, 0.0  ;;  %v654_v31 = vadd.f32 %v1356_v25, %v581_v10  ;;  %v583_v41 = vadd.f32 %v582_v40, %v1392_v49 }
 0x123   :  { %831 = vst [vmem:[%s1481_s3 + $0x98] sm:$0xff] %v807_v23  ;;  %v809_v42 = vmax.f32 %v654_v31, 0.0  ;;  %v656_v43 = vadd.f32 %v1358_v26, %v583_v41 }
 0x125   :  { %833 = vst [vmem:[%s1481_s3 + $0xa8] sm:$0xff] %v809_v42  ;;  %v810_v24 = vmax.f32 %v656_v43, 0.0 }
 0x127   :  { %834 = vst [vmem:[%s1481_s3 + $0xb0] sm:$0xff] %v810_v24 }

// kernel: auto_enc_forward.10
= control target key start
LH: loop header
LB: loop body
LE: loop exit
PB: predicated region body
PF: predicated region fallthrough
CT: control target
= control target key end

     0   :  { %v229_v3 = vmov 0   ;;  %vm43_vm0 = vcmask 277504   ;;  %s462_s0 = inlined_call_operand.vmem [shape: f32[16,1058], index: 0, kind: input, shape index: {}]   ;;  %s463_s1 = inlined_call_operand.vmem [shape: f32[16,1], index: 1, kind: input, shape index: {}]   ;;  %s464_s2 = inlined_call_operand.vmem [shape: f32[16,1], index: 2, kind: input, shape index: {}]   ;;  %s465_s3 = inlined_call_operand.vmem [shape: f32[16,1058], index: 3, kind: output, shape index: {}]  }
   0x1   :  { %v14_v0 = vld [vmem:[%s462_s0] sm:$0xff]  ;;  %v15_v1 = vld [vmem:[%s462_s0 + $0x8] sm:$0xff]  ;;  %v16_v2 = vld [vmem:[%s462_s0 + $0x10] sm:$0xff]  ;;  %224 = vset.pattern.permute.xlu1 %v229_v3  ;;  %223 = vset.pattern.permute.xlu0 %v229_v3 }
   0x2   :  { %v36_v4 = vadd.f32 %v15_v1, %v14_v0  ;;  %v17_v5 = vld [vmem:[%s462_s0 + $0x18] sm:$0xff]  ;;  %v23_v7 = vld [vmem:[%s462_s0 + $0x48] sm:$0xff]  ;;  %v24_v8 = vld [vmem:[%s462_s0 + $0x50] sm:$0xff] }
   0x3   :  { %v25_v9 = vld [vmem:[%s462_s0 + $0x58] sm:$0xff]  ;;  %v18_v10 = vld [vmem:[%s462_s0 + $0x20] sm:$0xff]  ;;  %v48_v11 = vadd.f32 %v24_v8, %v23_v7  ;;  %v19_v14 = vld [vmem:[%s462_s0 + $0x28] sm:$0xff] }
   0x4   :  { %v37_v6 = vadd.f32 %v36_v4, %v16_v2  ;;  %v26_v13 = vld [vmem:[%s462_s0 + $0x60] sm:$0xff]  ;;  %v33_v16 = vld [vmem:[%s463_s1 + $0x8] sm:$0xff]  ;;  %v20_v19 = vld [vmem:[%s462_s0 + $0x30] sm:$0xff] }
   0x5   :  { %v49_v15 = vadd.f32 %v48_v11, %v25_v9  ;;  %v27_v18 = vld [vmem:[%s462_s0 + $0x68] sm:$0xff]  ;;  %151 = vperm.xlu1 %224, %v33_v16   ;;  %v34_v21 = vld [vmem:[%s464_s2] sm:$0xff]  ;;  %v28_v24 = vld [vmem:[%s462_s0 + $0x70] sm:$0xff] }
   0x6   :  { %v38_v12 = vadd.f32 %v37_v6, %v17_v5  ;;  %v22_v22 = vld [vmem:[%s462_s0 + $0x40] sm:$0xff]  ;;  %v21_v25 = vld [vmem:[%s462_s0 + $0x38] sm:$0xff]  ;;  %v31_v30 = vld [vmem:[%s462_s0 + $0x88] sm:$0xff] }
   0x7   :  { %v50_v20 = vadd.f32 %v49_v15, %v26_v13  ;;  %v29_v28 = vld [vmem:[%s462_s0 + $0x78] sm:$0xff]  ;;  %v44_v29 = vsel %vm43_vm0, %v22_v22, 0.0  ;;  %v30_v33 = vld [vmem:[%s462_s0 + $0x80] sm:$0xff]  ;;  %v55_v36 = vsel %vm43_vm0, %v31_v30, 0.0 }
   0x8   :  { %v39_v17 = vadd.f32 %v38_v12, %v18_v10  ;;  %v32_v39 = vld [vmem:[%s463_s1] sm:$0xff] }
   0x9   :  { %v51_v26 = vadd.f32 %v50_v20, %v27_v18  ;;  %174 = vperm.xlu1 %224, %v34_v21  }
   0xa   :  { %v40_v23 = vadd.f32 %v39_v17, %v19_v14 }
   0xb   :  { %v52_v31 = vadd.f32 %v51_v26, %v28_v24 }
   0xc   :  { %v41_v27 = vadd.f32 %v40_v23, %v20_v19 }
   0xd   :  { %v53_v34 = vadd.f32 %v52_v31, %v29_v28 }
   0xe   :  { %v42_v32 = vadd.f32 %v41_v27, %v21_v25 }
   0xf   :  { %v54_v37 = vadd.f32 %v53_v34, %v30_v33  ;;  %v35_v34 = vld [vmem:[%s464_s2 + $0x8] sm:$0xff] }
  0x10   :  { %v45_v35 = vadd.f32 %v44_v29, %v42_v32 }
  0x11   :  { %v56_v38 = vadd.f32 %v55_v36, %v54_v37 }
  0x12   :  { %46 = vadd.xlane.f32.xlu0 %v45_v35 }
  0x16   :  { %57 = vadd.xlane.f32.xlu0 %v56_v38 }
  0x2c   :  { %146 = vperm.xlu0 %223, %v32_v39  }
  0x80   :  { %v152_v35 = vpop.permute.xlu1 %151 }
  0x84   :  { %v380_v36 = vpop.permute.xlu1 %174 }
  0x9b   :  { %v47_v40 = vpop.xlane.xlu0 %46 }
  0x9c   :  { %v60_v41 = vmul.f32 0.0009451796, %v47_v40 }
  0x9e   :  { %v315_v42 = vsub.f32 %v14_v0, %v60_v41  ;;  %v317_v43 = vsub.f32 %v15_v1, %v60_v41  ;;  %v319_v44 = vsub.f32 %v16_v2, %v60_v41  ;;  %v321_v47 = vsub.f32 %v17_v5, %v60_v41 }
  0x9f   :  { %v58_v45 = vpop.xlane.xlu0 %57  ;;  %v327_v50 = vsub.f32 %v18_v10, %v60_v41  ;;  %v331_v53 = vsub.f32 %v19_v14, %v60_v41  ;;  %v68_v59 = vsub.f32 %v20_v19, %v60_v41  ;;  %v69_v1 = vsub.f32 %v21_v25, %v60_v41 }
  0xa0   :  { %v61_v46 = vmul.f32 0.0009451796, %v58_v45  ;;  %v80_v48 = vmul.f32 %v315_v42, %v315_v42  ;;  %v81_v49 = vmul.f32 %v317_v43, %v317_v43  ;;  %v82_v51 = vmul.f32 %v319_v44, %v319_v44 }
  0xa1   :  { %v83_v56 = vmul.f32 %v321_v47, %v321_v47  ;;  %v84_v61 = vmul.f32 %v327_v50, %v327_v50  ;;  %v70_v2 = vsub.f32 %v22_v22, %v60_v41  ;;  %v85_v3 = vmul.f32 %v331_v53, %v331_v53 }
  0xa2   :  { %v98_v52 = vadd.f32 %v81_v49, %v80_v48  ;;  %v333_v54 = vsub.f32 %v23_v7, %v61_v46  ;;  %v335_v55 = vsub.f32 %v24_v8, %v61_v46  ;;  %v339_v58 = vsub.f32 %v25_v9, %v61_v46 }
  0xa3   :  { %v345_v63 = vsub.f32 %v26_v13, %v61_v46  ;;  %v351_v5 = vsub.f32 %v27_v18, %v61_v46  ;;  %v86_v8 = vmul.f32 %v68_v59, %v68_v59  ;;  %v355_v10 = vsub.f32 %v28_v24, %v61_v46 }
  0xa4   :  { %v99_v57 = vadd.f32 %v98_v52, %v82_v51  ;;  %v89_v60 = vmul.f32 %v333_v54, %v333_v54  ;;  %v90_v0 = vmul.f32 %v335_v55, %v335_v55  ;;  %v91_v6 = vmul.f32 %v339_v58, %v339_v58 }
  0xa5   :  { %v92_v11 = vmul.f32 %v345_v63, %v345_v63  ;;  %v87_v13 = vmul.f32 %v69_v1, %v69_v1  ;;  %v88_v14 = vmul.f32 %v70_v2, %v70_v2  ;;  %v359_v16 = vsub.f32 %v29_v28, %v61_v46 }
  0xa6   :  { %v100_v62 = vadd.f32 %v99_v57, %v83_v56  ;;  %v109_v7 = vadd.f32 %v90_v0, %v89_v60  ;;  %v93_v17 = vmul.f32 %v351_v5, %v351_v5  ;;  %v363_v19 = vsub.f32 %v31_v30, %v61_v46 }
  0xa7   :  { %v365_v21 = vsub.f32 %v30_v33, %v61_v46  ;;  %v94_v22 = vmul.f32 %v355_v10, %v355_v10  ;;  %v105_v24 = vsel %vm43_vm0, %v88_v14, 0.0  ;;  %v95_v26 = vmul.f32 %v359_v16, %v359_v16  ;;  %v147_v48 = vpop.permute.xlu0 %146 }
  0xa8   :  { %v101_v4 = vadd.f32 %v100_v62, %v84_v61  ;;  %v110_v12 = vadd.f32 %v109_v7, %v91_v6  ;;  %v97_v28 = vmul.f32 %v363_v19, %v363_v19 }
  0xa9   :  { %v96_v29 = vmul.f32 %v365_v21, %v365_v21 }
  0xaa   :  { %v102_v9 = vadd.f32 %v101_v4, %v85_v3  ;;  %v111_v18 = vadd.f32 %v110_v12, %v92_v11  ;;  %v116_v32 = vsel %vm43_vm0, %v97_v28, 0.0 }
  0xac   :  { %v103_v15 = vadd.f32 %v102_v9, %v86_v8  ;;  %v112_v23 = vadd.f32 %v111_v18, %v93_v17 }
  0xae   :  { %v104_v20 = vadd.f32 %v103_v15, %v87_v13  ;;  %v113_v27 = vadd.f32 %v112_v23, %v94_v22 }
  0xb0   :  { %v106_v25 = vadd.f32 %v105_v24, %v104_v20  ;;  %v114_v30 = vadd.f32 %v113_v27, %v95_v26 }
  0xb2   :  { %107 = vadd.xlane.f32.xlu1 %v106_v25  ;;  %v115_v31 = vadd.f32 %v114_v30, %v96_v29 }
  0xb4   :  { %v117_v33 = vadd.f32 %v116_v32, %v115_v31 }
  0xb6   :  { %118 = vadd.xlane.f32.xlu1 %v117_v33 }
  0xc7   :  { %179 = vperm.xlu1 %224, %v35_v34  }
 0x13b   :  { %v108_v37 = vpop.xlane.xlu1 %107 }
 0x13c   :  { %v120_v38 = vmul.f32 0.0009451796, %v108_v37 }
 0x13e   :  { %v122_v39 = vadd.f32 1e-05, %v120_v38 }
 0x13f   :  { %v119_v40 = vpop.xlane.xlu1 %118 }
 0x140   :  { %225 = vrsqrt.f32 %v122_v39  ;;  %v121_v41 = vmul.f32 0.0009451796, %v119_v40 }
 0x142   :  { %v123_v45 = vadd.f32 1e-05, %v121_v41 }
 0x143   :  { %v180_v23 = vpop.permute.xlu1 %179 }
 0x144   :  { %227 = vrsqrt.f32 %v123_v45 }
 0x14d   :  { %v226_v46 = vpop.eup %225 }
 0x14e   :  { %v126_v49 = vmul.f32 %v226_v46, %v315_v42  ;;  %v127_v51 = vmul.f32 %v226_v46, %v317_v43  ;;  %v128_v52 = vmul.f32 %v226_v46, %v319_v44  ;;  %v129_v56 = vmul.f32 %v226_v46, %v321_v47 }
 0x14f   :  { %v130_v57 = vmul.f32 %v226_v46, %v327_v50  ;;  %v131_v60 = vmul.f32 %v226_v46, %v331_v53  ;;  %v132_v61 = vmul.f32 %v226_v46, %v68_v59  ;;  %v133_v62 = vmul.f32 %v226_v46, %v69_v1 }
 0x150   :  { %v134_v0 = vmul.f32 %v226_v46, %v70_v2  ;;  %v154_v3 = vmul.f32 %v147_v48, %v126_v49  ;;  %v155_v4 = vmul.f32 %v147_v48, %v127_v51  ;;  %v156_v6 = vmul.f32 %v147_v48, %v128_v52 }
 0x151   :  { %v157_v7 = vmul.f32 %v147_v48, %v129_v56  ;;  %v158_v8 = vmul.f32 %v147_v48, %v130_v57  ;;  %v159_v9 = vmul.f32 %v147_v48, %v131_v60  ;;  %v160_v42 = vmul.f32 %v147_v48, %v132_v61  ;;  %v228_v12 = vpop.eup %227 }
 0x152   :  { %v161_v11 = vmul.f32 %v147_v48, %v133_v62  ;;  %v162_v43 = vmul.f32 %v147_v48, %v134_v0  ;;  %v182_v44 = vadd.f32 %v380_v36, %v154_v3  ;;  %v183_v47 = vadd.f32 %v380_v36, %v155_v4 }
 0x153   :  { %v184_v50 = vadd.f32 %v380_v36, %v156_v6  ;;  %v185_v53 = vadd.f32 %v380_v36, %v157_v7  ;;  %v186_v59 = vadd.f32 %v380_v36, %v158_v8  ;;  %v187_v1 = vadd.f32 %v380_v36, %v159_v9 }
 0x154   :  { %v135_v2 = vmul.f32 %v228_v12, %v333_v54  ;;  %v136_v13 = vmul.f32 %v228_v12, %v335_v55  ;;  %v137_v14 = vmul.f32 %v228_v12, %v339_v58  ;;  %v138_v15 = vmul.f32 %v228_v12, %v345_v63  ;;  %200 = vst [vmem:[%s465_s3] sm:$0xff] %v182_v44 }
 0x155   :  { %201 = vst [vmem:[%s465_s3 + $0x8] sm:$0xff] %v183_v47  ;;  %v139_v17 = vmul.f32 %v228_v12, %v351_v5  ;;  %v140_v18 = vmul.f32 %v228_v12, %v355_v10  ;;  %v141_v54 = vmul.f32 %v228_v12, %v359_v16  ;;  %v142_v55 = vmul.f32 %v228_v12, %v365_v21 }
 0x156   :  { %202 = vst [vmem:[%s465_s3 + $0x10] sm:$0xff] %v184_v50  ;;  %203 = vst [vmem:[%s465_s3 + $0x18] sm:$0xff] %v185_v53  ;;  %v143_v58 = vmul.f32 %v228_v12, %v363_v19  ;;  %v163_v63 = vmul.f32 %v152_v35, %v135_v2  ;;  %v164_v5 = vmul.f32 %v152_v35, %v136_v13 }
 0x157   :  { %204 = vst [vmem:[%s465_s3 + $0x20] sm:$0xff] %v186_v59  ;;  %205 = vst [vmem:[%s465_s3 + $0x28] sm:$0xff] %v187_v1  ;;  %v165_v10 = vmul.f32 %v152_v35, %v137_v14  ;;  %v166_v16 = vmul.f32 %v152_v35, %v138_v15  ;;  %v167_v20 = vmul.f32 %v152_v35, %v139_v17 }
 0x158   :  { %v168_v21 = vmul.f32 %v152_v35, %v140_v18  ;;  %v169_v22 = vmul.f32 %v152_v35, %v141_v54  ;;  %v170_v24 = vmul.f32 %v152_v35, %v142_v55  ;;  %v171_v25 = vmul.f32 %v152_v35, %v143_v58 }
 0x159   :  { %v191_v26 = vadd.f32 %v180_v23, %v163_v63  ;;  %v192_v27 = vadd.f32 %v180_v23, %v164_v5  ;;  %v193_v28 = vadd.f32 %v180_v23, %v165_v10  ;;  %v194_v29 = vadd.f32 %v180_v23, %v166_v16 }
 0x15a   :  { %v195_v30 = vadd.f32 %v180_v23, %v167_v20  ;;  %v196_v31 = vadd.f32 %v180_v23, %v168_v21  ;;  %v197_v32 = vadd.f32 %v180_v23, %v169_v22  ;;  %v198_v33 = vadd.f32 %v180_v23, %v170_v24 }
 0x15b   :  { %v199_v34 = vadd.f32 %v180_v23, %v171_v25  ;;  %209 = vst [vmem:[%s465_s3 + $0x48] sm:$0xff] %v191_v26  ;;  %210 = vst [vmem:[%s465_s3 + $0x50] sm:$0xff] %v192_v27  ;;  %v188_v19 = vadd.f32 %v380_v36, %v160_v42  ;;  %v189_v35 = vadd.f32 %v380_v36, %v161_v11 }
 0x15c   :  { %211 = vst [vmem:[%s465_s3 + $0x58] sm:$0xff] %v193_v28  ;;  %212 = vst [vmem:[%s465_s3 + $0x60] sm:$0xff] %v194_v29  ;;  %v190_v37 = vadd.f32 %v380_v36, %v162_v43 }
 0x15d   :  { %213 = vst [vmem:[%s465_s3 + $0x68] sm:$0xff] %v195_v30  ;;  %214 = vst [vmem:[%s465_s3 + $0x70] sm:$0xff] %v196_v31 }
 0x15e   :  { %215 = vst [vmem:[%s465_s3 + $0x78] sm:$0xff] %v197_v32  ;;  %216 = vst [vmem:[%s465_s3 + $0x80] sm:$0xff] %v198_v33 }
 0x15f   :  { %217 = vst.msk [vmem:[%s465_s3 + $0x88] sm:$0xff] %vm43_vm0, %v199_v34  ;;  %206 = vst [vmem:[%s465_s3 + $0x30] sm:$0xff] %v188_v19 }
 0x160   :  { %207 = vst [vmem:[%s465_s3 + $0x38] sm:$0xff] %v189_v35  ;;  %208 = vst.msk [vmem:[%s465_s3 + $0x40] sm:$0xff] %vm43_vm0, %v190_v37 }

// kernel: tile.18
= control target key start
LH: loop header
LB: loop body
LE: loop exit
PB: predicated region body
PF: predicated region fallthrough
CT: control target
= control target key end

     0   :  { %s22_s0 = inlined_call_operand.vmem [shape: f32[2], index: 0, kind: input, shape index: {}]   ;;  %s23_s1 = inlined_call_operand.vmem [shape: f32[4,2], index: 1, kind: output, shape index: {}]  }
   0x1   :  { %v4_v0 = vld [vmem:[%s22_s0] ss:$0 sm:$0xff] }
   0x2   :  { %5 = vst [vmem:[%s23_s1] sm:$0xf] %v4_v0 }

// kernel: tile.1
= control target key start
LH: loop header
LB: loop body
LE: loop exit
PB: predicated region body
PF: predicated region fallthrough
CT: control target
= control target key end

     0   :  { %vm8_vm0 = vcmask 7168   ;;  %s38_s0 = inlined_call_operand.vmem [shape: f32[4,2], index: 0, kind: input, shape index: {}]   ;;  %s39_s1 = inlined_call_operand.vmem [shape: f32[8,1], index: 1, kind: output, shape index: {}]  }
   0x1   :  { %v5_v0 = vld [vmem:[%s38_s0] sm:$0xf]  ;;  %s18_s0 = smov 127  }
   0x2   :  { %6 = vst [vmem:[#allocation0] sm:$0xf] %v5_v0 }
   0x9   :  { %v10_v1 = vld [vmem:[#allocation0] sm:$0xf]  }
   0xa   :  { %v7_v2 = vld [vmem:[#allocation0] sm:$0xf]   ;;  %11 = vrot.lane.b32.xlu0 %v10_v1, %s18_s0 }
   0xb   :  { %9 = vst.msk [vmem:[%s39_s1] ss:$2 sm:$0xf] %vm8_vm0, %v7_v2  }
  0x7c   :  { %v12_v3 = vpop.permute.xlu0 %11  }
  0x7d   :  { %16 = vst.msk [vmem:[%s39_s1 + $0x1] ss:$2 sm:$0xf] %vm8_vm0, %v12_v3  }

// kernel: auto_enc_forward.11
= control target key start
LH: loop header
LB: loop body
LE: loop exit
PB: predicated region body
PF: predicated region fallthrough
CT: control target
= control target key end

     0   :  { %v1058_v1 = vmov 0   ;;  %vm568_vm0 = vcmask 130048   ;;  %vm796_vm1 = vcmask 801792   ;;  %s1404_s1 = inlined_call_operand.vmem [shape: bf16[144,1250], index: 1, kind: input, shape index: {}]   ;;  %s1405_s0 = inlined_call_operand.vmem [shape: bf16[8,144], index: 0, kind: input, shape index: {}]   ;;  %s1406_s2 = inlined_call_operand.vmem [shape: f32[8,1], index: 2, kind: input, shape index: {}]   ;;  %s1407_s3 = inlined_call_operand.vmem [shape: f32[8,1250], index: 3, kind: output, shape index: {}]  }
   0x1   :  { %v901_v0 = vld [vmem:[%s1404_s1 + $0x234] ss:$40 sps:$4 sm:$0xff]   ;;  %900 = vset.pattern.permute.xlu0 %v1058_v1  ;;  %v903_v2 = vld [vmem:[%s1404_s1 + $0x230] ss:$40 sps:$4 sm:$0xff]   ;;  %v904_v3 = vld [vmem:[%s1404_s1 + $0x1e4] ss:$40 sps:$4 sm:$0xff]  }
   0x2   :  { %572 = vmatprep.subr.bf16.mxu0 %v901_v0  ;;  %v906_v4 = vld [vmem:[%s1404_s1 + $0x1e0] ss:$40 sps:$4 sm:$0xff]   ;;  %v907_v5 = vld [vmem:[%s1404_s1 + $0x194] ss:$40 sps:$4 sm:$0xff]   ;;  %v909_v6 = vld [vmem:[%s1404_s1 + $0x190] ss:$40 sps:$4 sm:$0xff]  }
   0x3   :  { %573 = vmatpush1.bf16.msra.mxu0 %v903_v2  ;;  %v910_v7 = vld [vmem:[%s1404_s1 + $0x144] ss:$40 sps:$4 sm:$0xff]   ;;  %v912_v8 = vld [vmem:[%s1404_s1 + $0x140] ss:$40 sps:$4 sm:$0xff]   ;;  %v913_v11 = vld [vmem:[%s1404_s1 + $0xf4] ss:$40 sps:$4 sm:$0xff]  }
   0x4   :  { %574 = vmatprep.subr.bf16.mxu0 %v904_v3  ;;  %v925_v9 = vld [vmem:[%s1404_s1 + $0x23c] ss:$40 sps:$4 sm:$0xff]   ;;  %v927_v10 = vld [vmem:[%s1404_s1 + $0x238] ss:$40 sps:$4 sm:$0xff]   ;;  %v931_v12 = vld [vmem:[%s1404_s1 + $0x1ec] ss:$40 sps:$4 sm:$0xff]  }
   0x5   :  { %613 = vmatprep.subr.bf16.mxu1 %v925_v9  ;;  %v15_v13 = vld [vmem:[%s1405_s0] sm:$0xff]  ;;  %v934_v14 = vld [vmem:[%s1404_s1 + $0x1e8] ss:$40 sps:$4 sm:$0xff]   ;;  %v945_v21 = vld [vmem:[%s1404_s1 + $0x14c] ss:$40 sps:$4 sm:$0xff]  }
   0x6   :  { %614 = vmatpush1.bf16.msra.mxu1 %v927_v10  ;;  %v915_v15 = vld [vmem:[%s1404_s1 + $0xf0] ss:$40 sps:$4 sm:$0xff]   ;;  %v1124_v16 = vcombine.high %v15_v13, %v15_v13  ;;  %v916_v17 = vld [vmem:[%s1404_s1 + $0xa4] ss:$40 sps:$4 sm:$0xff]   ;;  %v918_v19 = vld [vmem:[%s1404_s1 + $0xa0] ss:$40 sps:$4 sm:$0xff]   ;;  %v1184_v35 = vcombine.low %v15_v13, %v15_v13 }
   0x7   :  { %575 = vmatpush1.bf16.msra.mxu0 %v906_v4  ;;  %615 = vmatprep.subr.bf16.mxu1 %v931_v12  ;;  %v939_v18 = vld [vmem:[%s1404_s1 + $0x19c] ss:$40 sps:$4 sm:$0xff]   ;;  %v941_v20 = vld [vmem:[%s1404_s1 + $0x198] ss:$40 sps:$4 sm:$0xff]   ;;  %v947_v24 = vld [vmem:[%s1404_s1 + $0x148] ss:$40 sps:$4 sm:$0xff]  }
   0x8   :  { %576 = vmatprep.subr.bf16.mxu0 %v907_v5  ;;  %894 = vmatprep.mubr.msk.bf16.mxu0 %vm568_vm0, %v1124_v16  ;;  %v919_v22 = vld [vmem:[%s1404_s1 + $0x54] ss:$40 sps:$4 sm:$0xff]   ;;  %v921_v23 = vld [vmem:[%s1404_s1 + $0x50] ss:$40 sps:$4 sm:$0xff]   ;;  %v922_v26 = vld [vmem:[%s1404_s1 + $0x4] ss:$40 sps:$4 sm:$0xff]  }
   0x9   :  { %895 = vmatprep.mubr.msk.bf16.mxu1 %vm568_vm0, %v1124_v16  ;;  %v951_v25 = vld [vmem:[%s1404_s1 + $0xfc] ss:$40 sps:$4 sm:$0xff]   ;;  %v924_v27 = vld [vmem:[%s1404_s1] ss:$40 sps:$4 sm:$0xff]   ;;  %v957_v29 = vld [vmem:[%s1404_s1 + $0xac] ss:$40 sps:$4 sm:$0xff]  }
   0xa   :  { %616 = vmatpush1.bf16.msra.mxu1 %v934_v14  ;;  %v953_v28 = vld [vmem:[%s1404_s1 + $0xf8] ss:$40 sps:$4 sm:$0xff]   ;;  %v928_v30 = vld [vmem:[%s1404_s1 + $0x284] ss:$40 sps:$4 sm:$0xff]   ;;  %v959_v32 = vld [vmem:[%s1404_s1 + $0xa8] ss:$40 sps:$4 sm:$0xff]  }
   0xb   :  { %577 = vmatpush1.bf16.msra.mxu0 %v909_v6  ;;  %617 = vmatprep.subr.bf16.mxu1 %v939_v18  ;;  %v930_v31 = vld [vmem:[%s1404_s1 + $0x280] ss:$40 sps:$4 sm:$0xff]   ;;  %v963_v33 = vld [vmem:[%s1404_s1 + $0x5c] ss:$40 sps:$4 sm:$0xff]   ;;  %v969_v38 = vld [vmem:[%s1404_s1 + $0xc] ss:$40 sps:$4 sm:$0xff]  }
   0xc   :  { %578 = vmatprep.subr.bf16.mxu0 %v910_v7  ;;  %v938_v34 = vld [vmem:[%s1404_s1 + $0x244] ss:$40 sps:$4 sm:$0xff]   ;;  %v936_v36 = vld [vmem:[%s1404_s1 + $0x240] ss:$40 sps:$4 sm:$0xff]   ;;  %v944_v39 = vld [vmem:[%s1404_s1 + $0x1f4] ss:$40 sps:$4 sm:$0xff]  }
   0xd   :  { %v965_v37 = vld [vmem:[%s1404_s1 + $0x58] ss:$40 sps:$4 sm:$0xff]   ;;  %v971_v41 = vld [vmem:[%s1404_s1 + $0x8] ss:$40 sps:$4 sm:$0xff]   ;;  %v975_v42 = vld [vmem:[%s1404_s1 + $0x28c] ss:$40 sps:$4 sm:$0xff]  }
   0xe   :  { %618 = vmatpush1.bf16.msra.mxu1 %v941_v20  ;;  %v942_v40 = vld [vmem:[%s1404_s1 + $0x1f0] ss:$40 sps:$4 sm:$0xff]   ;;  %v950_v43 = vld [vmem:[%s1404_s1 + $0x1a4] ss:$40 sps:$4 sm:$0xff]   ;;  %v948_v44 = vld [vmem:[%s1404_s1 + $0x1a0] ss:$40 sps:$4 sm:$0xff]  }
   0xf   :  { %579 = vmatpush1.bf16.msra.mxu0 %v912_v8  ;;  %619 = vmatprep.subr.bf16.mxu1 %v945_v21  ;;  %v977_v45 = vld [vmem:[%s1404_s1 + $0x288] ss:$40 sps:$4 sm:$0xff]   ;;  %v983_v46 = vld [vmem:[%s1404_s1 + $0x24c] ss:$40 sps:$4 sm:$0xff]   ;;  %v989_v50 = vld [vmem:[%s1404_s1 + $0x1fc] ss:$40 sps:$4 sm:$0xff]  }
  0x10   :  { %580 = vmatprep.subr.bf16.mxu0 %v913_v11  ;;  %v956_v47 = vld [vmem:[%s1404_s1 + $0x154] ss:$40 sps:$4 sm:$0xff]   ;;  %v954_v48 = vld [vmem:[%s1404_s1 + $0x150] ss:$40 sps:$4 sm:$0xff]   ;;  %v962_v51 = vld [vmem:[%s1404_s1 + $0x104] ss:$40 sps:$4 sm:$0xff]  }
  0x11   :  { %v981_v49 = vld [vmem:[%s1404_s1 + $0x248] ss:$40 sps:$4 sm:$0xff]   ;;  %v987_v53 = vld [vmem:[%s1404_s1 + $0x1f8] ss:$40 sps:$4 sm:$0xff]   ;;  %v995_v54 = vld [vmem:[%s1404_s1 + $0x1ac] ss:$40 sps:$4 sm:$0xff]  }
  0x12   :  { %620 = vmatpush1.bf16.msra.mxu1 %v947_v24  ;;  %v960_v52 = vld [vmem:[%s1404_s1 + $0x100] ss:$40 sps:$4 sm:$0xff]   ;;  %v968_v55 = vld [vmem:[%s1404_s1 + $0xb4] ss:$40 sps:$4 sm:$0xff]   ;;  %v966_v56 = vld [vmem:[%s1404_s1 + $0xb0] ss:$40 sps:$4 sm:$0xff]  }
  0x13   :  { %581 = vmatpush1.bf16.msra.mxu0 %v915_v15  ;;  %621 = vmatprep.subr.bf16.mxu1 %v951_v25  ;;  %v993_v57 = vld [vmem:[%s1404_s1 + $0x1a8] ss:$40 sps:$4 sm:$0xff]   ;;  %v1001_v58 = vld [vmem:[%s1404_s1 + $0x15c] ss:$40 sps:$4 sm:$0xff]   ;;  %v999_v61 = vld [vmem:[%s1404_s1 + $0x158] ss:$40 sps:$4 sm:$0xff]  }
  0x14   :  { %582 = vmatprep.subr.bf16.mxu0 %v916_v17  ;;  %v974_v59 = vld [vmem:[%s1404_s1 + $0x64] ss:$40 sps:$4 sm:$0xff]   ;;  %v972_v60 = vld [vmem:[%s1404_s1 + $0x60] ss:$40 sps:$4 sm:$0xff]   ;;  %v980_v63 = vld [vmem:[%s1404_s1 + $0x14] ss:$40 sps:$4 sm:$0xff]  }
  0x15   :  { %v1007_v62 = vld [vmem:[%s1404_s1 + $0x10c] ss:$40 sps:$4 sm:$0xff]   ;;  %v106_v0 = vld [vmem:[%s1406_s2] sm:$0xff]  ;;  %v1005_v1 = vld [vmem:[%s1404_s1 + $0x108] ss:$40 sps:$4 sm:$0xff]  }
  0x16   :  { %622 = vmatpush1.bf16.msra.mxu1 %v953_v28  ;;  %109 = vperm.xlu0 %900, %v106_v0   ;;  %v978_v2 = vld [vmem:[%s1404_s1 + $0x10] ss:$40 sps:$4 sm:$0xff]   ;;  %v1013_v3 = vld [vmem:[%s1404_s1 + $0xbc] ss:$40 sps:$4 sm:$0xff]   ;;  %v1019_v7 = vld [vmem:[%s1404_s1 + $0x6c] ss:$40 sps:$4 sm:$0xff]  }
  0x17   :  { %583 = vmatpush1.bf16.msra.mxu0 %v918_v19  ;;  %623 = vmatprep.subr.bf16.mxu1 %v957_v29  ;;  %v986_v4 = vld [vmem:[%s1404_s1 + $0x294] ss:$40 sps:$4 sm:$0xff]   ;;  %v1011_v5 = vld [vmem:[%s1404_s1 + $0xb8] ss:$40 sps:$4 sm:$0xff]   ;;  %v1017_v9 = vld [vmem:[%s1404_s1 + $0x68] ss:$40 sps:$4 sm:$0xff]  }
  0x18   :  { %584 = vmatprep.subr.bf16.mxu0 %v919_v22  ;;  %v984_v6 = vld [vmem:[%s1404_s1 + $0x290] ss:$40 sps:$4 sm:$0xff]   ;;  %v992_v8 = vld [vmem:[%s1404_s1 + $0x254] ss:$40 sps:$4 sm:$0xff]   ;;  %v998_v12 = vld [vmem:[%s1404_s1 + $0x204] ss:$40 sps:$4 sm:$0xff]  }
  0x19   :  { %v990_v10 = vld [vmem:[%s1404_s1 + $0x250] ss:$40 sps:$4 sm:$0xff]   ;;  %v1025_v11 = vld [vmem:[%s1404_s1 + $0x1c] ss:$40 sps:$4 sm:$0xff]   ;;  %v996_v14 = vld [vmem:[%s1404_s1 + $0x200] ss:$40 sps:$4 sm:$0xff]  }
  0x1a   :  { %624 = vmatpush1.bf16.msra.mxu1 %v959_v32  ;;  %v1023_v13 = vld [vmem:[%s1404_s1 + $0x18] ss:$40 sps:$4 sm:$0xff]   ;;  %v1031_v15 = vld [vmem:[%s1404_s1 + $0x29c] ss:$40 sps:$4 sm:$0xff]  }
  0x1b   :  { %585 = vmatpush1.bf16.msra.mxu0 %v921_v23  ;;  %625 = vmatprep.subr.bf16.mxu1 %v963_v33  ;;  %v1004_v17 = vld [vmem:[%s1404_s1 + $0x1b4] ss:$40 sps:$4 sm:$0xff]   ;;  %v1029_v18 = vld [vmem:[%s1404_s1 + $0x298] ss:$40 sps:$4 sm:$0xff]   ;;  %v1010_v20 = vld [vmem:[%s1404_s1 + $0x164] ss:$40 sps:$4 sm:$0xff]  }
  0x1c   :  { %586 = vmatprep.subr.bf16.mxu0 %v922_v26  ;;  %v1002_v19 = vld [vmem:[%s1404_s1 + $0x1b0] ss:$40 sps:$4 sm:$0xff]   ;;  %v1016_v21 = vld [vmem:[%s1404_s1 + $0x114] ss:$40 sps:$4 sm:$0xff]   ;;  %v1022_v23 = vld [vmem:[%s1404_s1 + $0xc4] ss:$40 sps:$4 sm:$0xff]  }
  0x1d   :  { %v1014_v22 = vld [vmem:[%s1404_s1 + $0x110] ss:$40 sps:$4 sm:$0xff]   ;;  %v1020_v24 = vld [vmem:[%s1404_s1 + $0xc0] ss:$40 sps:$4 sm:$0xff]   ;;  %v1028_v25 = vld [vmem:[%s1404_s1 + $0x74] ss:$40 sps:$4 sm:$0xff]  }
  0x1e   :  { %626 = vmatpush1.bf16.msra.mxu1 %v965_v37  ;;  %v1026_v26 = vld [vmem:[%s1404_s1 + $0x70] ss:$40 sps:$4 sm:$0xff]   ;;  %v1032_v28 = vld [vmem:[%s1404_s1 + $0x20] ss:$40 sps:$4 sm:$0xff]   ;;  %v1037_v29 = vld [vmem:[%s1404_s1 + $0x2a4] ss:$40 sps:$4 sm:$0xff]  }
  0x1f   :  { %587 = vmatpush1.bf16.msra.mxu0 %v924_v27  ;;  %627 = vmatprep.subr.bf16.mxu1 %v969_v38  ;;  %v1034_v27 = vld [vmem:[%s1404_s1 + $0x24] ss:$40 sps:$4 sm:$0xff]  }
  0x20   :  { %602 = vmatprep.subr.bf16.mxu0 %v928_v30  ;;  %v1035_v30 = vld [vmem:[%s1404_s1 + $0x2a0] ss:$40 sps:$4 sm:$0xff]  }
  0x22   :  { %628 = vmatpush1.bf16.msra.mxu1 %v971_v41 }
  0x23   :  { %603 = vmatpush2.bf16.msra.mxu0 %v930_v31  ;;  %643 = vmatprep.subr.bf16.mxu1 %v975_v42 }
  0x24   :  { %654 = vmatprep.subr.bf16.mxu0 %v938_v34 }
  0x26   :  { %605 = vmatmul.mubr.bf16.vlgmr.msra.gmra.mxu0 %v1184_v35  ;;  %644 = vmatpush2.bf16.msra.mxu1 %v977_v45 }
  0x27   :  { %655 = vmatpush1.bf16.msra.mxu0 %v936_v36  ;;  %896 = vmatprep.mubr.msk.bf16.mxu0 %vm568_vm0, %v1124_v16 }
  0x28   :  { %656 = vmatprep.subr.bf16.mxu0 %v944_v39  ;;  %695 = vmatprep.subr.bf16.mxu1 %v983_v46 }
  0x29   :  { %646 = vmatmul.mubr.bf16.vlgmr.msra.gmra.mxu1 %v1184_v35 }
  0x2a   :  { %696 = vmatpush1.bf16.msra.mxu1 %v981_v49  ;;  %897 = vmatprep.mubr.msk.bf16.mxu1 %vm568_vm0, %v1124_v16 }
  0x2b   :  { %657 = vmatpush1.bf16.msra.mxu0 %v942_v40  ;;  %697 = vmatprep.subr.bf16.mxu1 %v989_v50 }
  0x2c   :  { %658 = vmatprep.subr.bf16.mxu0 %v950_v43 }
  0x2e   :  { %698 = vmatpush1.bf16.msra.mxu1 %v987_v53 }
  0x2f   :  { %659 = vmatpush1.bf16.msra.mxu0 %v948_v44  ;;  %699 = vmatprep.subr.bf16.mxu1 %v995_v54 }
  0x30   :  { %660 = vmatprep.subr.bf16.mxu0 %v956_v47 }
  0x32   :  { %700 = vmatpush1.bf16.msra.mxu1 %v993_v57 }
  0x33   :  { %661 = vmatpush1.bf16.msra.mxu0 %v954_v48  ;;  %701 = vmatprep.subr.bf16.mxu1 %v1001_v58 }
  0x34   :  { %662 = vmatprep.subr.bf16.mxu0 %v962_v51 }
  0x36   :  { %702 = vmatpush1.bf16.msra.mxu1 %v999_v61 }
  0x37   :  { %663 = vmatpush1.bf16.msra.mxu0 %v960_v52  ;;  %703 = vmatprep.subr.bf16.mxu1 %v1007_v62 }
  0x38   :  { %664 = vmatprep.subr.bf16.mxu0 %v968_v55 }
  0x3a   :  { %704 = vmatpush1.bf16.msra.mxu1 %v1005_v1 }
  0x3b   :  { %665 = vmatpush1.bf16.msra.mxu0 %v966_v56  ;;  %705 = vmatprep.subr.bf16.mxu1 %v1013_v3 }
  0x3c   :  { %666 = vmatprep.subr.bf16.mxu0 %v974_v59 }
  0x3e   :  { %706 = vmatpush1.bf16.msra.mxu1 %v1011_v5 }
  0x3f   :  { %667 = vmatpush1.bf16.msra.mxu0 %v972_v60  ;;  %707 = vmatprep.subr.bf16.mxu1 %v1019_v7 }
  0x40   :  { %668 = vmatprep.subr.bf16.mxu0 %v980_v63 }
  0x42   :  { %708 = vmatpush1.bf16.msra.mxu1 %v1017_v9 }
  0x43   :  { %669 = vmatpush1.bf16.msra.mxu0 %v978_v2  ;;  %709 = vmatprep.subr.bf16.mxu1 %v1025_v11 }
  0x44   :  { %684 = vmatprep.subr.bf16.mxu0 %v986_v4 }
  0x46   :  { %710 = vmatpush1.bf16.msra.mxu1 %v1023_v13 }
  0x47   :  { %685 = vmatpush2.bf16.msra.mxu0 %v984_v6  ;;  %725 = vmatprep.subr.bf16.mxu1 %v1031_v15 }
  0x48   :  { %736 = vmatprep.subr.bf16.mxu0 %v992_v8 }
  0x4a   :  { %687 = vmatmul.mubr.bf16.vlgmr.msra.gmra.mxu0 %v1184_v35  ;;  %726 = vmatpush2.bf16.msra.mxu1 %v1029_v18 }
  0x4b   :  { %737 = vmatpush1.bf16.msra.mxu0 %v990_v10  ;;  %898 = vmatprep.mubr.msk.bf16.mxu0 %vm568_vm0, %v1124_v16  ;;  %v1008_v16 = vld [vmem:[%s1404_s1 + $0x160] ss:$40 sps:$4 sm:$0xff]  }
  0x4c   :  { %738 = vmatprep.subr.bf16.mxu0 %v998_v12 }
  0x4d   :  { %728 = vmatmul.mubr.bf16.vlgmr.msra.gmra.mxu1 %v1184_v35 }
  0x4f   :  { %739 = vmatpush1.bf16.msra.mxu0 %v996_v14 }
  0x50   :  { %740 = vmatprep.subr.bf16.mxu0 %v1004_v17 }
  0x53   :  { %741 = vmatpush1.bf16.msra.mxu0 %v1002_v19 }
  0x54   :  { %742 = vmatprep.subr.bf16.mxu0 %v1010_v20 }
  0x57   :  { %743 = vmatpush1.bf16.msra.mxu0 %v1008_v16 }
  0x58   :  { %744 = vmatprep.subr.bf16.mxu0 %v1016_v21 }
  0x5b   :  { %745 = vmatpush1.bf16.msra.mxu0 %v1014_v22 }
  0x5c   :  { %746 = vmatprep.subr.bf16.mxu0 %v1022_v23 }
  0x5f   :  { %747 = vmatpush1.bf16.msra.mxu0 %v1020_v24 }
  0x60   :  { %748 = vmatprep.subr.bf16.mxu0 %v1028_v25 }
  0x63   :  { %749 = vmatpush1.bf16.msra.mxu0 %v1026_v26 }
  0x64   :  { %750 = vmatprep.subr.bf16.mxu0 %v1034_v27 }
  0x67   :  { %751 = vmatpush1.bf16.msra.mxu0 %v1032_v28 }
  0x68   :  { %766 = vmatprep.subr.bf16.mxu0 %v1037_v29 }
  0x6b   :  { %767 = vmatpush2.bf16.msra.mxu0 %v1035_v30 }
  0x6e   :  { %769 = vmatmul.mubr.bf16.vlgmr.msra.gmra.mxu0 %v1184_v35 }
  0x91   :  { %v110_v31 = vpop.permute.xlu0 %109 }
  0xe6   :  { %v606_v32 = vpop.f32.mrf.mxu0 }
  0xe7   :  { %v607_v33 = vadd.f32 %v606_v32, %v110_v31 }
  0xe8   :  { %v608_v34 = vpop.f32.mrf.mxu0 }
  0xe9   :  { %1038 = vtanh.f32 %v607_v33  ;;  %v609_v36 = vadd.f32 %v608_v34, %v110_v31  ;;  %v647_v39 = vpop.f32.mrf.mxu1 }
  0xea   :  { %v610_v37 = vpop.f32.mrf.mxu0  ;;  %v648_v40 = vadd.f32 %v647_v39, %v110_v31 }
  0xeb   :  { %1040 = vtanh.f32 %v609_v36  ;;  %v649_v41 = vpop.f32.mrf.mxu1 }
  0xec   :  { %v611_v38 = vpop.f32.mrf.mxu0  ;;  %1042 = vtanh.f32 %v648_v40  ;;  %v650_v42 = vadd.f32 %v649_v41, %v110_v31 }
  0xed   :  { %v651_v43 = vpop.f32.mrf.mxu1 }
  0xee   :  { %1044 = vtanh.f32 %v650_v42 }
  0xef   :  { %v652_v35 = vpop.f32.mrf.mxu1 }
  0xf6   :  { %v1039_v44 = vpop.eup %1038 }
  0xf7   :  { %787 = vst [vmem:[%s1407_s3] sm:$0xff] %v1039_v44 }
  0xf8   :  { %v1041_v45 = vpop.eup %1040 }
  0xf9   :  { %788 = vst [vmem:[%s1407_s3 + $0x8] sm:$0xff] %v1041_v45  ;;  %v1043_v46 = vpop.eup %1042 }
  0xfa   :  { %789 = vst [vmem:[%s1407_s3 + $0x10] sm:$0xff] %v1043_v46 }
  0xfb   :  { %v1045_v47 = vpop.eup %1044 }
  0xfc   :  { %790 = vst [vmem:[%s1407_s3 + $0x18] sm:$0xff] %v1045_v47 }
 0x10a   :  { %v688_v48 = vpop.f32.mrf.mxu0 }
 0x10b   :  { %v689_v49 = vadd.f32 %v688_v48, %v110_v31 }
 0x10c   :  { %v690_v50 = vpop.f32.mrf.mxu0 }
 0x10d   :  { %1046 = vtanh.f32 %v689_v49  ;;  %v691_v51 = vadd.f32 %v690_v50, %v110_v31  ;;  %v729_v54 = vpop.f32.mrf.mxu1 }
 0x10e   :  { %v692_v52 = vpop.f32.mrf.mxu0  ;;  %v730_v55 = vadd.f32 %v729_v54, %v110_v31 }
 0x10f   :  { %1048 = vtanh.f32 %v691_v51  ;;  %v731_v56 = vpop.f32.mrf.mxu1 }
 0x110   :  { %v693_v53 = vpop.f32.mrf.mxu0  ;;  %1050 = vtanh.f32 %v730_v55  ;;  %v732_v57 = vadd.f32 %v731_v56, %v110_v31 }
 0x111   :  { %v733_v58 = vpop.f32.mrf.mxu1 }
 0x112   :  { %1052 = vtanh.f32 %v732_v57 }
 0x113   :  { %v734_v60 = vpop.f32.mrf.mxu1 }
 0x11a   :  { %v1047_v59 = vpop.eup %1046 }
 0x11b   :  { %791 = vst [vmem:[%s1407_s3 + $0x20] sm:$0xff] %v1047_v59 }
 0x11c   :  { %v1049_v61 = vpop.eup %1048 }
 0x11d   :  { %792 = vst [vmem:[%s1407_s3 + $0x28] sm:$0xff] %v1049_v61  ;;  %v1051_v62 = vpop.eup %1050 }
 0x11e   :  { %793 = vst [vmem:[%s1407_s3 + $0x30] sm:$0xff] %v1051_v62 }
 0x11f   :  { %v1053_v63 = vpop.eup %1052 }
 0x120   :  { %794 = vst [vmem:[%s1407_s3 + $0x38] sm:$0xff] %v1053_v63 }
 0x12e   :  { %v770_v0 = vpop.f32.mrf.mxu0 }
 0x12f   :  { %v771_v1 = vadd.f32 %v770_v0, %v110_v31 }
 0x130   :  { %v772_v2 = vpop.f32.mrf.mxu0 }
 0x131   :  { %1054 = vtanh.f32 %v771_v1  ;;  %v773_v3 = vadd.f32 %v772_v2, %v110_v31 }
 0x132   :  { %v774_v4 = vpop.f32.mrf.mxu0 }
 0x133   :  { %1056 = vtanh.f32 %v773_v3 }
 0x134   :  { %v775_v5 = vpop.f32.mrf.mxu0 }
 0x13e   :  { %v1055_v6 = vpop.eup %1054 }
 0x13f   :  { %795 = vst [vmem:[%s1407_s3 + $0x40] sm:$0xff] %v1055_v6 }
 0x140   :  { %v1057_v7 = vpop.eup %1056 }
 0x141   :  { %797 = vst.msk [vmem:[%s1407_s3 + $0x48] sm:$0xff] %vm796_vm1, %v1057_v7 }

</bundles_post_ra>
